<compile_context>
chip_gen: v7x
topology: tpu7x:2x2x1
jax: 0.10.0
libtpu: 0.0.40
codegen_flags: <defaults>
</compile_context>

<pallas_src>
import functools
import math

import numpy as np
import jax
import jax.numpy as jnp
from jax.experimental import pallas as pl
from jax.experimental.pallas import tpu as pltpu


# ----------------------------------------------------------------------------
# Kernel 1: spectrogram + posterior encoder (WaveNet), layer-streamed.
# ----------------------------------------------------------------------------
def _posterior_kernel(chunks_ref, mask_ref, eps_ref,
                      wdft_ref, mel_ref,
                      pre_w_ref, pre_b_ref,
                      in_w_ref, in_b_ref, rs_w_ref, rs_b_ref,
                      proj_w_ref, proj_b_ref,
                      out_ref,
                      x_sc, skip_sc,
                      *, kernel_size, d_model, hidden,
                      n_frames, hop, n_sub, nf_pad, out_pad):
    T, D, H, K = n_frames, d_model, hidden, kernel_size
    pad = (K - 1) // 2
    l = pl.program_id(1)
    n_layers = pl.num_programs(1)
    mask = mask_ref[0]                                      # (T, 1)

    # -- prologue (layer 0): framing + windowed DFT + mel + pre 1x1 conv ------
    @pl.when(l == 0)
    def _():
        wdft = wdft_ref[...]                                # (n_fft, 2*NF) bf16
        chunks = chunks_ref[0].astype(jnp.bfloat16)         # (n_chunks, hop)
        reim = jnp.zeros((T, 2 * nf_pad), jnp.float32)
        for j in range(n_sub):                              # framing as shifted matmuls
            reim = reim + jnp.dot(chunks[j:j + T, :],
                                  wdft[j * hop:(j + 1) * hop, :],
                                  preferred_element_type=jnp.float32)
        re = reim[:, :nf_pad]
        im = reim[:, nf_pad:]
        mag = jnp.sqrt(re * re + im * im + 1e-6)            # (T, NF) lane-dense
        spec = jnp.dot(mag.astype(jnp.bfloat16), mel_ref[...],
                       preferred_element_type=jnp.float32)  # (T, nmel)
        x0 = jnp.dot(spec.astype(jnp.bfloat16), pre_w_ref[...],
                     preferred_element_type=jnp.float32) + pre_b_ref[...]
        x_sc[...] = x0 * mask
        skip_sc[...] = jnp.zeros((T, D), jnp.float32)

    # -- one WaveNet layer per grid step: im2col -> single (T,K*D)x(K*D,2D) ---
    xc = x_sc[...]
    zrow = jnp.zeros((pad, D), jnp.float32)
    xp = jnp.concatenate([zrow, xc, zrow], axis=0)          # (T + 2*pad, D)
    col = jnp.concatenate([xp[k:k + T, :] for k in range(K)],
                          axis=-1).astype(jnp.bfloat16)     # (T, K*D)
    acc = jnp.dot(col, in_w_ref[0],
                  preferred_element_type=jnp.float32) + in_b_ref[0]
    gate = jnp.tanh(acc[:, :D]) * jax.nn.sigmoid(acc[:, D:])
    rs = jnp.dot(gate.astype(jnp.bfloat16), rs_w_ref[0],
                 preferred_element_type=jnp.float32) + rs_b_ref[0]
    x_sc[...] = (xc + rs[:, :D]) * mask                     # residual
    skip_sc[...] = skip_sc[...] + rs[:, D:]                 # skip accumulate

    # -- epilogue (last layer): projection + reparameterise, lane-dense store -
    @pl.when(l == n_layers - 1)
    def _():
        skip = skip_sc[...] * mask
        stats = jnp.dot(skip.astype(jnp.bfloat16), proj_w_ref[...],
                        preferred_element_type=jnp.float32) + proj_b_ref[...]
        stats = stats * mask                                # (T, 2H) = [m | logs]
        m = stats[:, :H]
        logs = stats[:, H:]
        z = (m + eps_ref[0] * jnp.exp(logs)) * mask
        pieces = [stats, z]
        if out_pad:
            pieces.append(jnp.zeros((T, out_pad), jnp.float32))
        out_ref[0] = jnp.concatenate(pieces, axis=-1)       # (T, 128-multiple)


# ----------------------------------------------------------------------------
# Kernel 2: whole text-encoder stack + final projection (one call, grid=(1,)).
# ----------------------------------------------------------------------------
def _text_kernel(h_ref, mask_ref, bias_ref,
                 wqkv_ref, bqkv_ref, wo_ref, bo_ref, g1_ref, be1_ref,
                 w1_ref, fb1_ref, w2_ref, fb2_ref, g2_ref, be2_ref,
                 pw_ref, pb_ref,
                 out_ref,
                 *, n_blocks, n_heads, kernel_size, d_model, n_filter,
                 hidden, batch, seq, out_pad):
    B, T, D, F, H = batch, seq, d_model, n_filter, hidden
    nH = n_heads
    dh = D // nH
    K = kernel_size
    pad = (K - 1) // 2
    scale = 1.0 / math.sqrt(dh)

    mask2 = mask_ref[...].reshape(B * T, 1)                 # (B*T, 1)
    bias = bias_ref[...]                                    # (B, 1, T) key mask
    zrow_d = jnp.zeros((pad, D), jnp.float32)
    zrow_f = jnp.zeros((pad, F), jnp.float32)

    def block(l, hf):                                       # hf: (B*T, D) f32
        # --- attention: fused QKV projection, batch folded into M -----------
        qkv = jnp.dot(hf.astype(jnp.bfloat16), wqkv_ref[l],
                      preferred_element_type=jnp.float32) + bqkv_ref[l]
        qkv3 = qkv.reshape(B, T, 3 * D)
        heads = []
        for hd in range(nH):                                # batched-over-B einsums
            q = (qkv3[:, :, hd * dh:(hd + 1) * dh] * scale).astype(jnp.bfloat16)
            k = qkv3[:, :, D + hd * dh:D + (hd + 1) * dh].astype(jnp.bfloat16)
            v = qkv3[:, :, 2 * D + hd * dh:2 * D + (hd + 1) * dh].astype(jnp.bfloat16)
            s = jnp.einsum('bqd,bkd->bqk', q, k,
                           preferred_element_type=jnp.float32) + bias
            s = s - jnp.max(s, axis=-1, keepdims=True)
            p = jnp.exp(s)
            p = p * pl.reciprocal(jnp.sum(p, axis=-1, keepdims=True), approx=True)
            heads.append(jnp.einsum('bqk,bkd->bqd', p.astype(jnp.bfloat16), v,
                                    preferred_element_type=jnp.float32))
        attn = jnp.concatenate(heads, axis=-1).reshape(B * T, D)
        attn = jnp.dot(attn.astype(jnp.bfloat16), wo_ref[l],
                       preferred_element_type=jnp.float32) + bo_ref[l]
        h1 = hf + attn * mask2
        mu = jnp.mean(h1, axis=-1, keepdims=True)
        var = jnp.mean((h1 - mu) ** 2, axis=-1, keepdims=True)
        h1 = (h1 - mu) * jax.lax.rsqrt(var + 1e-5) * g1_ref[l] + be1_ref[l]

        # --- conv-FFN: register-level im2col (per-batch halos) -> 2 matmuls --
        hm = h1 * mask2
        cols = []
        for b in range(B):                                  # static, B is small
            xb = jnp.concatenate([zrow_d, hm[b * T:(b + 1) * T, :], zrow_d], axis=0)
            cols.append(jnp.concatenate([xb[k:k + T, :] for k in range(K)], axis=-1))
        col1 = jnp.concatenate(cols, axis=0).astype(jnp.bfloat16)   # (B*T, K*D)
        y1 = jnp.dot(col1, w1_ref[l],
                     preferred_element_type=jnp.float32) + fb1_ref[l]
        y1 = jnp.maximum(y1, 0.0) * mask2       # TODO(synk): dropout_p is a no-op
        cols = []
        for b in range(B):
            yb = jnp.concatenate([zrow_f, y1[b * T:(b + 1) * T, :], zrow_f], axis=0)
            cols.append(jnp.concatenate([yb[k:k + T, :] for k in range(K)], axis=-1))
        col2 = jnp.concatenate(cols, axis=0).astype(jnp.bfloat16)   # (B*T, K*F)
        y2 = jnp.dot(col2, w2_ref[l],
                     preferred_element_type=jnp.float32) + fb2_ref[l]
        h2 = h1 + y2 * mask2
        mu = jnp.mean(h2, axis=-1, keepdims=True)
        var = jnp.mean((h2 - mu) ** 2, axis=-1, keepdims=True)
        return (h2 - mu) * jax.lax.rsqrt(var + 1e-5) * g2_ref[l] + be2_ref[l]

    hfin = jax.lax.fori_loop(0, n_blocks, block, h_ref[...].reshape(B * T, D))
    hfin = hfin * mask2

    # --- final 1x1 projection -> [m_p | logs_p], lane-dense combined output --
    stats = jnp.dot(hfin.astype(jnp.bfloat16), pw_ref[...],
                    preferred_element_type=jnp.float32) + pb_ref[...]
    stats = stats * mask2                                   # (B*T, 2H)
    if out_pad:
        stats = jnp.concatenate(
            [stats, jnp.zeros((B * T, out_pad), jnp.float32)], axis=-1)
    out_ref[...] = stats.reshape(B, T, 2 * H + out_pad)


# ----------------------------------------------------------------------------
# Deterministic "constant" components (window / DFT / mel filterbank)
# ----------------------------------------------------------------------------
def _hann(n):
    return (0.5 - 0.5 * np.cos(2.0 * np.pi * np.arange(n) / n)).astype(np.float32)


def _dft_mats(n_fft):
    n = np.arange(n_fft)[:, None]
    f = np.arange(n_fft // 2 + 1)[None, :]
    ang = 2.0 * np.pi * n * f / n_fft
    return np.cos(ang).astype(np.float32), (-np.sin(ang)).astype(np.float32)


def _mel_fb(n_freq, n_mel, sr, fmin, fmax):
    def h2m(f):
        return 2595.0 * np.log10(1.0 + f / 700.0)

    def m2h(m):
        return 700.0 * (10.0 ** (m / 2595.0) - 1.0)

    hz = m2h(np.linspace(h2m(fmin), h2m(fmax), n_mel + 2))
    freqs = np.linspace(0.0, sr / 2.0, n_freq)
    fb = np.zeros((n_freq, n_mel), np.float32)
    for m in range(n_mel):
        lo, c, hi = hz[m], hz[m + 1], hz[m + 2]
        lower = (freqs - lo) / max(c - lo, 1e-5)
        upper = (hi - freqs) / max(hi - c, 1e-5)
        fb[:, m] = np.maximum(0.0, np.minimum(lower, upper))
    return fb


def _n_freq_pad(n_fft):
    # pad n_fft//2+1 frequency bins up to a 128-lane boundary
    return ((n_fft // 2 + 1 + 127) // 128) * 128


# ----------------------------------------------------------------------------
# Parameter init (deterministic, synthetic)
# ----------------------------------------------------------------------------
def _keygen(key):
    counter = [0]

    def nxt():
        counter[0] += 1
        return jax.random.fold_in(key, counter[0])

    return nxt


def _dense(k, fan_in, shape):
    return jax.random.normal(k, shape, jnp.float32) / math.sqrt(fan_in)


def init_params(key, cfg):
    nxt = _keygen(key)
    D = cfg["d_model"]
    H = cfg["hidden_channels"]
    nmel = cfg["n_mel_channels"]
    Kp = cfg["post_kernel_size"]
    L = cfg["post_n_layers"]
    Fil = cfg["ffn_filter"]
    ks = cfg["kernel_size"]
    nB = cfg["n_blocks"]
    n_fft = cfg["n_fft"]
    n_freq = n_fft // 2 + 1
    NF = _n_freq_pad(n_fft)
    bf16 = jnp.bfloat16

    # window + real/imag DFT fused into one bf16 (n_fft, 2*NF) matrix (freq
    # axis padded to 128 lanes); mel filterbank rows padded to match.
    win = _hann(cfg["win_length"])
    wr, wi = _dft_mats(n_fft)
    wdft = np.zeros((n_fft, 2 * NF), np.float32)
    wdft[:, :n_freq] = wr * win[:, None]
    wdft[:, NF:NF + n_freq] = wi * win[:, None]
    mel = np.zeros((NF, nmel), np.float32)
    mel[:n_freq] = _mel_fb(n_freq, nmel, cfg["sample_rate"],
                           cfg["fmin"], cfg["fmax"])
    spec = dict(wdft=jnp.asarray(wdft).astype(bf16),
                mel=jnp.asarray(mel).astype(bf16))

    in_w = jnp.stack([_dense(nxt(), Kp * D, (Kp * D, 2 * D)) for _ in range(L)])
    rs_list = []
    for l in range(L):
        w = _dense(nxt(), D, (D, 2 * D))
        if l == L - 1:                          # last layer: skip-only output
            w = w.at[:, :D].set(0.0)
        rs_list.append(w)
    rs_w = jnp.stack(rs_list)

    post = dict(
        pre_w=_dense(nxt(), nmel, (nmel, D)).astype(bf16),
        pre_b=jnp.zeros((1, D), jnp.float32),
        in_w=in_w.astype(bf16),                 # (L, K*D, 2D), streamed per layer
        in_b=jnp.zeros((L, 1, 2 * D), jnp.float32),
        rs_w=rs_w.astype(bf16),                 # (L, D, 2D)
        rs_b=jnp.zeros((L, 1, 2 * D), jnp.float32),
        proj_w=_dense(nxt(), D, (D, 2 * H)).astype(bf16),
        proj_b=jnp.zeros((1, 2 * H), jnp.float32),
    )

    wqkv = jnp.stack([jnp.concatenate([_dense(nxt(), D, (D, D)) for _ in range(3)],
                                      axis=-1) for _ in range(nB)])
    text = dict(
        emb=jax.random.normal(nxt(), (cfg["token_size"], D), jnp.float32) * 0.02,
        wqkv=wqkv.astype(bf16),
        bqkv=jnp.zeros((nB, 1, 3 * D), jnp.float32),
        wo=jnp.stack([_dense(nxt(), D, (D, D)) for _ in range(nB)]).astype(bf16),
        bo=jnp.zeros((nB, 1, D), jnp.float32),
        ln1_g=jnp.ones((nB, 1, D), jnp.float32),
        ln1_b=jnp.zeros((nB, 1, D), jnp.float32),
        w1=jnp.stack([_dense(nxt(), ks * D, (ks * D, Fil))
                      for _ in range(nB)]).astype(bf16),
        b1=jnp.zeros((nB, 1, Fil), jnp.float32),
        w2=jnp.stack([_dense(nxt(), ks * Fil, (ks * Fil, D))
                      for _ in range(nB)]).astype(bf16),
        b2=jnp.zeros((nB, 1, D), jnp.float32),
        ln2_g=jnp.ones((nB, 1, D), jnp.float32),
        ln2_b=jnp.zeros((nB, 1, D), jnp.float32),
    )
    proj = dict(w=_dense(nxt(), D, (D, 2 * H)).astype(bf16),
                b=jnp.zeros((1, 2 * H), jnp.float32))
    return dict(spec=spec, post=post, text=text, proj=proj)


# ----------------------------------------------------------------------------
# Model forward pieces (wrappers around the two pallas_calls)
# ----------------------------------------------------------------------------
def generate_mask(lengths, max_len):
    return (jnp.arange(max_len)[None, :] < lengths[:, None]).astype(jnp.float32)


def posterior_encoder(sp, p, cfg, y, y_lengths, rng):
    B, Tw = y.shape
    n_fft, hop = cfg["n_fft"], cfg["hop_length"]
    nmel = cfg["n_mel_channels"]
    D = cfg["d_model"]
    H = cfg["hidden_channels"]
    L = cfg["post_n_layers"]
    K = cfg["post_kernel_size"]
    NF = _n_freq_pad(n_fft)
    n_sub = n_fft // hop
    assert Tw % hop == 0 and n_fft % hop == 0 and cfg["win_length"] == n_fft

    pad = (n_fft - hop) // 2                    # VITS-style framing -> Tw // hop frames
    yp = jnp.pad(y, ((0, 0), (pad, pad)), mode="reflect")
    T = (Tw - hop) // hop + 1
    n_chunks = yp.shape[1] // hop               # = T + n_sub - 1
    chunks = yp.reshape(B, n_chunks, hop)       # frames are rebuilt in-kernel

    y_mask = generate_mask(y_lengths // hop, T)
    mask = y_mask[..., None]
    eps = jax.random.normal(rng, (B, T, H), jnp.float32)
    out_w = max(128, ((3 * H + 127) // 128) * 128)

    out = pl.pallas_call(
        functools.partial(_posterior_kernel, kernel_size=K, d_model=D, hidden=H,
                          n_frames=T, hop=hop, n_sub=n_sub, nf_pad=NF,
                          out_pad=out_w - 3 * H),
        out_shape=jax.ShapeDtypeStruct((B, T, out_w), jnp.float32),
        grid=(B, L),
        in_specs=[
            pl.BlockSpec((1, n_chunks, hop), lambda b, l: (b, 0, 0)),
            pl.BlockSpec((1, T, 1), lambda b, l: (b, 0, 0)),
            pl.BlockSpec((1, T, H), lambda b, l: (b, 0, 0)),
            pl.BlockSpec((n_fft, 2 * NF), lambda b, l: (0, 0)),
            pl.BlockSpec((NF, nmel), lambda b, l: (0, 0)),
            pl.BlockSpec((nmel, D), lambda b, l: (0, 0)),
            pl.BlockSpec((1, D), lambda b, l: (0, 0)),
            pl.BlockSpec((1, K * D, 2 * D), lambda b, l: (l, 0, 0)),  # streamed
            pl.BlockSpec((1, 1, 2 * D), lambda b, l: (l, 0, 0)),
            pl.BlockSpec((1, D, 2 * D), lambda b, l: (l, 0, 0)),      # streamed
            pl.BlockSpec((1, 1, 2 * D), lambda b, l: (l, 0, 0)),
            pl.BlockSpec((D, 2 * H), lambda b, l: (0, 0)),
            pl.BlockSpec((1, 2 * H), lambda b, l: (0, 0)),
        ],
        out_specs=pl.BlockSpec((1, T, out_w), lambda b, l: (b, 0, 0)),
        scratch_shapes=[pltpu.VMEM((T, D), jnp.float32),   # residual carry
                        pltpu.VMEM((T, D), jnp.float32)],  # skip accumulator
        compiler_params=pltpu.CompilerParams(
            dimension_semantics=("parallel", "arbitrary"),
            vmem_limit_bytes=64 * 1024 * 1024),
    )(chunks, mask, eps, sp["wdft"], sp["mel"],
      p["pre_w"], p["pre_b"], p["in_w"], p["in_b"], p["rs_w"], p["rs_b"],
      p["proj_w"], p["proj_b"])

    m_q = out[..., :H]
    logs_q = out[..., H:2 * H]
    z = out[..., 2 * H:3 * H]
    return z, m_q, logs_q


def text_encoder(tp, prj, cfg, tokens, x_mask):
    D = cfg["d_model"]
    nH = cfg["n_heads"]
    ks = cfg["kernel_size"]
    Fil = cfg["ffn_filter"]
    H = cfg["hidden_channels"]
    nB = cfg["n_blocks"]
    B, T = tokens.shape

    mask = x_mask[..., None]                           # (B, T, 1)
    bias = ((1.0 - x_mask) * -1e9)[:, None, :]         # (B, 1, T) additive key mask
    h0 = tp["emb"][tokens] * math.sqrt(D) * mask       # token gather stays in XLA
    out_w = max(128, ((2 * H + 127) // 128) * 128)

    stats = pl.pallas_call(
        functools.partial(_text_kernel, n_blocks=nB, n_heads=nH, kernel_size=ks,
                          d_model=D, n_filter=Fil, hidden=H, batch=B, seq=T,
                          out_pad=out_w - 2 * H),
        out_shape=jax.ShapeDtypeStruct((B, T, out_w), jnp.float32),
        grid=(1,),
        in_specs=[
            pl.BlockSpec((B, T, D), lambda i: (0, 0, 0)),
            pl.BlockSpec((B, T, 1), lambda i: (0, 0, 0)),
            pl.BlockSpec((B, 1, T), lambda i: (0, 0, 0)),
            pl.BlockSpec((nB, D, 3 * D), lambda i: (0, 0, 0)),
            pl.BlockSpec((nB, 1, 3 * D), lambda i: (0, 0, 0)),
            pl.BlockSpec((nB, D, D), lambda i: (0, 0, 0)),
            pl.BlockSpec((nB, 1, D), lambda i: (0, 0, 0)),
            pl.BlockSpec((nB, 1, D), lambda i: (0, 0, 0)),
            pl.BlockSpec((nB, 1, D), lambda i: (0, 0, 0)),
            pl.BlockSpec((nB, ks * D, Fil), lambda i: (0, 0, 0)),
            pl.BlockSpec((nB, 1, Fil), lambda i: (0, 0, 0)),
            pl.BlockSpec((nB, ks * Fil, D), lambda i: (0, 0, 0)),
            pl.BlockSpec((nB, 1, D), lambda i: (0, 0, 0)),
            pl.BlockSpec((nB, 1, D), lambda i: (0, 0, 0)),
            pl.BlockSpec((nB, 1, D), lambda i: (0, 0, 0)),
            pl.BlockSpec((D, 2 * H), lambda i: (0, 0)),
            pl.BlockSpec((1, 2 * H), lambda i: (0, 0)),
        ],
        out_specs=pl.BlockSpec((B, T, out_w), lambda i: (0, 0, 0)),
        compiler_params=pltpu.CompilerParams(
            dimension_semantics=("arbitrary",),
            vmem_limit_bytes=64 * 1024 * 1024),
    )(h0, mask, bias, tp["wqkv"], tp["bqkv"], tp["wo"], tp["bo"],
      tp["ln1_g"], tp["ln1_b"], tp["w1"], tp["b1"], tp["w2"], tp["b2"],
      tp["ln2_g"], tp["ln2_b"], prj["w"], prj["b"])

    m_p = stats[..., :H]
    logs_p = stats[..., H:2 * H]
    return m_p, logs_p


def vits_forward(params, cfg, x, y, x_lengths, y_lengths, rng):
    B, Tx = x.shape
    x_mask = generate_mask(x_lengths, Tx)
    # TODO(synk): sid / speaker-embedding conditioning path not exercised (sid=None).
    z, m_q, logs_q = posterior_encoder(params["spec"], params["post"], cfg,
                                       y.astype(jnp.float32), y_lengths, rng)
    m_p, logs_p = text_encoder(params["text"], params["proj"], cfg, x, x_mask)
    return z, m_q, logs_q, m_p, logs_p


# ----------------------------------------------------------------------------
# Main
# ----------------------------------------------------------------------------
if __name__ == "__main__":
    cfg = dict(
        token_size=32, sample_rate=22050,
        n_fft=64, win_length=64, hop_length=16, fmin=0.0, fmax=8000.0,
        n_mel_channels=16, d_model=32, n_blocks=2, n_heads=2, kernel_size=3,
        hidden_channels=32, post_kernel_size=5, post_n_layers=16,
        ffn_filter=128,
    )

    key = jax.random.PRNGKey(0)
    kx, ky, kz = jax.random.split(key, 3)
    B, Tx, Twav = 2, 8, 512
    x = jax.random.randint(kx, (B, Tx), 0, cfg["token_size"], dtype=jnp.int32)
    y = jax.random.normal(ky, (B, Twav), jnp.float32)
    x_lengths = jnp.array([8, 6], jnp.int32)
    y_lengths = jnp.array([512, 384], jnp.int32)

    params = init_params(jax.random.PRNGKey(42), cfg)

    @jax.jit
    def fwd(params, x, y, x_lengths, y_lengths, rng):
        return vits_forward(params, cfg, x, y, x_lengths, y_lengths, rng)

    outs = fwd(params, x, y, x_lengths, y_lengths, kz)
    outs = jax.block_until_ready(outs)

    z, m_q, logs_q, m_p, logs_p = outs
    T_spec = Twav // cfg["hop_length"]
    assert z.shape == (B, T_spec, cfg["hidden_channels"])
    assert m_q.shape == (B, T_spec, cfg["hidden_channels"])
    assert logs_q.shape == (B, T_spec, cfg["hidden_channels"])
    assert m_p.shape == (B, Tx, cfg["hidden_channels"])
    assert logs_p.shape == (B, Tx, cfg["hidden_channels"])
    assert all(bool(jnp.all(jnp.isfinite(o))) for o in outs)
    print("KERNEL_OK")
</pallas_src>

<mosaic_0001>
module attributes {stable_mosaic.version = 11 : i64} {
  func.func @_posterior_kernel(%arg0: i32, %arg1: i32, %arg2: memref<1x35x16xf32, #tpu.memory_space<vmem>>, %arg3: memref<1x32x1xf32, #tpu.memory_space<vmem>>, %arg4: memref<1x32x32xf32, #tpu.memory_space<vmem>>, %arg5: memref<64x256xbf16, #tpu.memory_space<vmem>>, %arg6: memref<128x16xbf16, #tpu.memory_space<vmem>>, %arg7: memref<16x32xbf16, #tpu.memory_space<vmem>>, %arg8: memref<1x32xf32, #tpu.memory_space<vmem>>, %arg9: memref<1x160x64xbf16, #tpu.memory_space<vmem>>, %arg10: memref<1x1x64xf32, #tpu.memory_space<vmem>>, %arg11: memref<1x32x64xbf16, #tpu.memory_space<vmem>>, %arg12: memref<1x1x64xf32, #tpu.memory_space<vmem>>, %arg13: memref<32x64xbf16, #tpu.memory_space<vmem>>, %arg14: memref<1x64xf32, #tpu.memory_space<vmem>>, %arg15: memref<1x32x128xf32, #tpu.memory_space<vmem>>, %arg16: memref<32x32xf32, #tpu.memory_space<vmem>>, %arg17: memref<32x32xf32, #tpu.memory_space<vmem>>) attributes {dimension_semantics = [#tpu.dimension_semantics<parallel>, #tpu.dimension_semantics<arbitrary>], iteration_bounds = array<i64: 2, 16>, scalar_prefetch = 0 : i64, scratch_operands = 2 : i64, tpu.core_type = #tpu.core_type<tc>, window_params = [{transform_indices = @transform_0, window_bounds = array<i64: 1, 35, 16>}, {transform_indices = @transform_1, window_bounds = array<i64: 1, 32, 1>}, {transform_indices = @transform_2, window_bounds = array<i64: 1, 32, 32>}, {pipeline_mode = #tpu.pipeline_mode<synchronous>, transform_indices = @transform_3, window_bounds = array<i64: 64, 256>}, {pipeline_mode = #tpu.pipeline_mode<synchronous>, transform_indices = @transform_4, window_bounds = array<i64: 128, 16>}, {pipeline_mode = #tpu.pipeline_mode<synchronous>, transform_indices = @transform_5, window_bounds = array<i64: 16, 32>}, {pipeline_mode = #tpu.pipeline_mode<synchronous>, transform_indices = @transform_6, window_bounds = array<i64: 1, 32>}, {transform_indices = @transform_7, window_bounds = array<i64: 1, 160, 64>}, {transform_indices = @transform_8, window_bounds = array<i64: 1, 1, 64>}, {transform_indices = @transform_9, window_bounds = array<i64: 1, 32, 64>}, {transform_indices = @transform_10, window_bounds = array<i64: 1, 1, 64>}, {pipeline_mode = #tpu.pipeline_mode<synchronous>, transform_indices = @transform_11, window_bounds = array<i64: 32, 64>}, {pipeline_mode = #tpu.pipeline_mode<synchronous>, transform_indices = @transform_12, window_bounds = array<i64: 1, 64>}, {transform_indices = @transform_13, window_bounds = array<i64: 1, 32, 128>}]} {
    %c0 = arith.constant 0 : index
    %c0_0 = arith.constant 0 : index
    %c0_1 = arith.constant 0 : index
    %0 = vector.load %arg3[%c0, %c0_0, %c0_1] : memref<1x32x1xf32, #tpu.memory_space<vmem>>, vector<1x32x1xf32>
    %1 = vector.shape_cast %0 : vector<1x32x1xf32> to vector<32x1xf32>
    %c0_i32 = arith.constant 0 : i32
    %2 = arith.cmpi eq, %arg1, %c0_i32 : i32
    %3 = arith.extui %2 : i1 to i32
    %c0_i32_2 = arith.constant 0 : i32
    %4 = arith.cmpi ne, %3, %c0_i32_2 : i32
    scf.if %4 {
      %c0_27 = arith.constant 0 : index
      %c0_28 = arith.constant 0 : index
      %51 = vector.load %arg5[%c0_27, %c0_28] : memref<64x256xbf16, #tpu.memory_space<vmem>>, vector<64x256xbf16>
      %c0_29 = arith.constant 0 : index
      %c0_30 = arith.constant 0 : index
      %c0_31 = arith.constant 0 : index
      %52 = vector.load %arg2[%c0_29, %c0_30, %c0_31] : memref<1x35x16xf32, #tpu.memory_space<vmem>>, vector<1x35x16xf32>
      %53 = vector.shape_cast %52 : vector<1x35x16xf32> to vector<35x16xf32>
      %54 = arith.truncf %53 : vector<35x16xf32> to vector<35x16xbf16>
      %cst_32 = arith.constant 0.000000e+00 : f32
      %55 = vector.broadcast %cst_32 : f32 to vector<32x256xf32>
      %56 = vector.extract_strided_slice %54 {offsets = [0, 0], sizes = [32, 16], strides = [1, 1]} : vector<35x16xbf16> to vector<32x16xbf16>
      %57 = vector.extract_strided_slice %51 {offsets = [0, 0], sizes = [16, 256], strides = [1, 1]} : vector<64x256xbf16> to vector<16x256xbf16>
      %cst_33 = arith.constant dense<0.000000e+00> : vector<32x256xf32>
      %58 = tpu.matmul %56, %57, %cst_33 {dimension_numbers = #tpu.dot_dimension_numbers<[1], [0], [0], [1], [0, 0, 1, 1], [], []>} : vector<32x16xbf16>, vector<16x256xbf16>, vector<32x256xf32> -> vector<32x256xf32>
      %59 = arith.addf %55, %58 : vector<32x256xf32>
      %60 = vector.extract_strided_slice %54 {offsets = [1, 0], sizes = [32, 16], strides = [1, 1]} : vector<35x16xbf16> to vector<32x16xbf16>
      %61 = vector.extract_strided_slice %51 {offsets = [16, 0], sizes = [16, 256], strides = [1, 1]} : vector<64x256xbf16> to vector<16x256xbf16>
      %cst_34 = arith.constant dense<0.000000e+00> : vector<32x256xf32>
      %62 = tpu.matmul %60, %61, %cst_34 {dimension_numbers = #tpu.dot_dimension_numbers<[1], [0], [0], [1], [0, 0, 1, 1], [], []>} : vector<32x16xbf16>, vector<16x256xbf16>, vector<32x256xf32> -> vector<32x256xf32>
      %63 = arith.addf %59, %62 : vector<32x256xf32>
      %64 = vector.extract_strided_slice %54 {offsets = [2, 0], sizes = [32, 16], strides = [1, 1]} : vector<35x16xbf16> to vector<32x16xbf16>
      %65 = vector.extract_strided_slice %51 {offsets = [32, 0], sizes = [16, 256], strides = [1, 1]} : vector<64x256xbf16> to vector<16x256xbf16>
      %cst_35 = arith.constant dense<0.000000e+00> : vector<32x256xf32>
      %66 = tpu.matmul %64, %65, %cst_35 {dimension_numbers = #tpu.dot_dimension_numbers<[1], [0], [0], [1], [0, 0, 1, 1], [], []>} : vector<32x16xbf16>, vector<16x256xbf16>, vector<32x256xf32> -> vector<32x256xf32>
      %67 = arith.addf %63, %66 : vector<32x256xf32>
      %68 = vector.extract_strided_slice %54 {offsets = [3, 0], sizes = [32, 16], strides = [1, 1]} : vector<35x16xbf16> to vector<32x16xbf16>
      %69 = vector.extract_strided_slice %51 {offsets = [48, 0], sizes = [16, 256], strides = [1, 1]} : vector<64x256xbf16> to vector<16x256xbf16>
      %cst_36 = arith.constant dense<0.000000e+00> : vector<32x256xf32>
      %70 = tpu.matmul %68, %69, %cst_36 {dimension_numbers = #tpu.dot_dimension_numbers<[1], [0], [0], [1], [0, 0, 1, 1], [], []>} : vector<32x16xbf16>, vector<16x256xbf16>, vector<32x256xf32> -> vector<32x256xf32>
      %71 = arith.addf %67, %70 : vector<32x256xf32>
      %72 = vector.extract_strided_slice %71 {offsets = [0, 0], sizes = [32, 128], strides = [1, 1]} : vector<32x256xf32> to vector<32x128xf32>
      %73 = vector.extract_strided_slice %71 {offsets = [0, 128], sizes = [32, 128], strides = [1, 1]} : vector<32x256xf32> to vector<32x128xf32>
      %74 = arith.mulf %72, %72 : vector<32x128xf32>
      %75 = arith.mulf %73, %73 : vector<32x128xf32>
      %76 = arith.addf %74, %75 : vector<32x128xf32>
      %cst_37 = arith.constant 9.99999997E-7 : f32
      %77 = vector.broadcast %cst_37 : f32 to vector<32x128xf32>
      %78 = arith.addf %76, %77 : vector<32x128xf32>
      %79 = math.sqrt %78 : vector<32x128xf32>
      %80 = arith.truncf %79 : vector<32x128xf32> to vector<32x128xbf16>
      %c0_38 = arith.constant 0 : index
      %c0_39 = arith.constant 0 : index
      %81 = vector.load %arg6[%c0_38, %c0_39] : memref<128x16xbf16, #tpu.memory_space<vmem>>, vector<128x16xbf16>
      %cst_40 = arith.constant dense<0.000000e+00> : vector<32x16xf32>
      %82 = tpu.matmul %80, %81, %cst_40 {dimension_numbers = #tpu.dot_dimension_numbers<[1], [0], [0], [1], [0, 0, 1, 1], [], []>} : vector<32x128xbf16>, vector<128x16xbf16>, vector<32x16xf32> -> vector<32x16xf32>
      %83 = arith.truncf %82 : vector<32x16xf32> to vector<32x16xbf16>
      %c0_41 = arith.constant 0 : index
      %c0_42 = arith.constant 0 : index
      %84 = vector.load %arg7[%c0_41, %c0_42] : memref<16x32xbf16, #tpu.memory_space<vmem>>, vector<16x32xbf16>
      %cst_43 = arith.constant dense<0.000000e+00> : vector<32x32xf32>
      %85 = tpu.matmul %83, %84, %cst_43 {dimension_numbers = #tpu.dot_dimension_numbers<[1], [0], [0], [1], [0, 0, 1, 1], [], []>} : vector<32x16xbf16>, vector<16x32xbf16>, vector<32x32xf32> -> vector<32x32xf32>
      %c0_44 = arith.constant 0 : index
      %c0_45 = arith.constant 0 : index
      %86 = vector.load %arg8[%c0_44, %c0_45] : memref<1x32xf32, #tpu.memory_space<vmem>>, vector<1x32xf32>
      %87 = vector.broadcast %86 : vector<1x32xf32> to vector<32x32xf32>
      %88 = arith.addf %85, %87 : vector<32x32xf32>
      %89 = vector.broadcast %1 : vector<32x1xf32> to vector<32x32xf32>
      %90 = arith.mulf %88, %89 : vector<32x32xf32>
      %c0_46 = arith.constant 0 : index
      %c0_47 = arith.constant 0 : index
      %91 = vector.load %arg16[%c0_46, %c0_47] : memref<32x32xf32, #tpu.memory_space<vmem>>, vector<32x32xf32>
      tpu.vector_store %arg16[%c0_46, %c0_47], %90 {strides = array<i32>} : memref<32x32xf32, #tpu.memory_space<vmem>>, vector<32x32xf32>,
      %cst_48 = arith.constant 0.000000e+00 : f32
      %92 = vector.broadcast %cst_48 : f32 to vector<32x32xf32>
      %c0_49 = arith.constant 0 : index
      %c0_50 = arith.constant 0 : index
      %93 = vector.load %arg17[%c0_49, %c0_50] : memref<32x32xf32, #tpu.memory_space<vmem>>, vector<32x32xf32>
      tpu.vector_store %arg17[%c0_49, %c0_50], %92 {strides = array<i32>} : memref<32x32xf32, #tpu.memory_space<vmem>>, vector<32x32xf32>,
    } else {
    }
    %c0_3 = arith.constant 0 : index
    %c0_4 = arith.constant 0 : index
    %5 = vector.load %arg16[%c0_3, %c0_4] : memref<32x32xf32, #tpu.memory_space<vmem>>, vector<32x32xf32>
    %cst = arith.constant 0.000000e+00 : f32
    %6 = vector.broadcast %cst : f32 to vector<2x32xf32>
    %7 = tpu.concatenate %6, %5, %6 in 0 : vector<2x32xf32>, vector<32x32xf32>, vector<2x32xf32> -> vector<36x32xf32>
    %8 = vector.extract_strided_slice %7 {offsets = [0, 0], sizes = [32, 32], strides = [1, 1]} : vector<36x32xf32> to vector<32x32xf32>
    %9 = vector.extract_strided_slice %7 {offsets = [1, 0], sizes = [32, 32], strides = [1, 1]} : vector<36x32xf32> to vector<32x32xf32>
    %10 = vector.extract_strided_slice %7 {offsets = [2, 0], sizes = [32, 32], strides = [1, 1]} : vector<36x32xf32> to vector<32x32xf32>
    %11 = vector.extract_strided_slice %7 {offsets = [3, 0], sizes = [32, 32], strides = [1, 1]} : vector<36x32xf32> to vector<32x32xf32>
    %12 = vector.extract_strided_slice %7 {offsets = [4, 0], sizes = [32, 32], strides = [1, 1]} : vector<36x32xf32> to vector<32x32xf32>
    %13 = tpu.concatenate %8, %9, %10, %11, %12 in 1 : vector<32x32xf32>, vector<32x32xf32>, vector<32x32xf32>, vector<32x32xf32>, vector<32x32xf32> -> vector<32x160xf32>
    %14 = arith.truncf %13 : vector<32x160xf32> to vector<32x160xbf16>
    %c0_5 = arith.constant 0 : index
    %c0_6 = arith.constant 0 : index
    %c0_7 = arith.constant 0 : index
    %15 = vector.load %arg9[%c0_5, %c0_6, %c0_7] : memref<1x160x64xbf16, #tpu.memory_space<vmem>>, vector<1x160x64xbf16>
    %16 = vector.shape_cast %15 : vector<1x160x64xbf16> to vector<160x64xbf16>
    %cst_8 = arith.constant dense<0.000000e+00> : vector<32x64xf32>
    %17 = tpu.matmul %14, %16, %cst_8 {dimension_numbers = #tpu.dot_dimension_numbers<[1], [0], [0], [1], [0, 0, 1, 1], [], []>} : vector<32x160xbf16>, vector<160x64xbf16>, vector<32x64xf32> -> vector<32x64xf32>
    %c0_9 = arith.constant 0 : index
    %c0_10 = arith.constant 0 : index
    %c0_11 = arith.constant 0 : index
    %18 = vector.load %arg10[%c0_9, %c0_10, %c0_11] : memref<1x1x64xf32, #tpu.memory_space<vmem>>, vector<1x1x64xf32>
    %19 = vector.shape_cast %18 : vector<1x1x64xf32> to vector<1x64xf32>
    %20 = vector.broadcast %19 : vector<1x64xf32> to vector<32x64xf32>
    %21 = arith.addf %17, %20 : vector<32x64xf32>
    %22 = vector.extract_strided_slice %21 {offsets = [0, 0], sizes = [32, 32], strides = [1, 1]} : vector<32x64xf32> to vector<32x32xf32>
    %23 = math.tanh %22 : vector<32x32xf32>
    %24 = vector.extract_strided_slice %21 {offsets = [0, 32], sizes = [32, 32], strides = [1, 1]} : vector<32x64xf32> to vector<32x32xf32>
    %25 = arith.negf %24 : vector<32x32xf32>
    %26 = math.exp %25 : vector<32x32xf32>
    %cst_12 = arith.constant 1.000000e+00 : f32
    %27 = vector.broadcast %cst_12 : f32 to vector<32x32xf32>
    %28 = arith.addf %27, %26 : vector<32x32xf32>
    %29 = arith.divf %27, %28 : vector<32x32xf32>
    %30 = arith.mulf %23, %29 : vector<32x32xf32>
    %31 = arith.truncf %30 : vector<32x32xf32> to vector<32x32xbf16>
    %c0_13 = arith.constant 0 : index
    %c0_14 = arith.constant 0 : index
    %c0_15 = arith.constant 0 : index
    %32 = vector.load %arg11[%c0_13, %c0_14, %c0_15] : memref<1x32x64xbf16, #tpu.memory_space<vmem>>, vector<1x32x64xbf16>
    %33 = vector.shape_cast %32 : vector<1x32x64xbf16> to vector<32x64xbf16>
    %cst_16 = arith.constant dense<0.000000e+00> : vector<32x64xf32>
    %34 = tpu.matmul %31, %33, %cst_16 {dimension_numbers = #tpu.dot_dimension_numbers<[1], [0], [0], [1], [0, 0, 1, 1], [], []>} : vector<32x32xbf16>, vector<32x64xbf16>, vector<32x64xf32> -> vector<32x64xf32>
    %c0_17 = arith.constant 0 : index
    %c0_18 = arith.constant 0 : index
    %c0_19 = arith.constant 0 : index
    %35 = vector.load %arg12[%c0_17, %c0_18, %c0_19] : memref<1x1x64xf32, #tpu.memory_space<vmem>>, vector<1x1x64xf32>
    %36 = vector.shape_cast %35 : vector<1x1x64xf32> to vector<1x64xf32>
    %37 = vector.broadcast %36 : vector<1x64xf32> to vector<32x64xf32>
    %38 = arith.addf %34, %37 : vector<32x64xf32>
    %39 = vector.extract_strided_slice %38 {offsets = [0, 0], sizes = [32, 32], strides = [1, 1]} : vector<32x64xf32> to vector<32x32xf32>
    %40 = arith.addf %5, %39 : vector<32x32xf32>
    %41 = vector.broadcast %1 : vector<32x1xf32> to vector<32x32xf32>
    %42 = arith.mulf %40, %41 : vector<32x32xf32>
    %c0_20 = arith.constant 0 : index
    %c0_21 = arith.constant 0 : index
    %43 = vector.load %arg16[%c0_20, %c0_21] : memref<32x32xf32, #tpu.memory_space<vmem>>, vector<32x32xf32>
    tpu.vector_store %arg16[%c0_20, %c0_21], %42 {strides = array<i32>} : memref<32x32xf32, #tpu.memory_space<vmem>>, vector<32x32xf32>,
    %c0_22 = arith.constant 0 : index
    %c0_23 = arith.constant 0 : index
    %44 = vector.load %arg17[%c0_22, %c0_23] : memref<32x32xf32, #tpu.memory_space<vmem>>, vector<32x32xf32>
    %45 = vector.extract_strided_slice %38 {offsets = [0, 32], sizes = [32, 32], strides = [1, 1]} : vector<32x64xf32> to vector<32x32xf32>
    %46 = arith.addf %44, %45 : vector<32x32xf32>
    %c0_24 = arith.constant 0 : index
    %c0_25 = arith.constant 0 : index
    %47 = vector.load %arg17[%c0_24, %c0_25] : memref<32x32xf32, #tpu.memory_space<vmem>>, vector<32x32xf32>
    tpu.vector_store %arg17[%c0_24, %c0_25], %46 {strides = array<i32>} : memref<32x32xf32, #tpu.memory_space<vmem>>, vector<32x32xf32>,
    %c15_i32 = arith.constant 15 : i32
    %48 = arith.cmpi eq, %arg1, %c15_i32 : i32
    %49 = arith.extui %48 : i1 to i32
    %c0_i32_26 = arith.constant 0 : i32
    %50 = arith.cmpi ne, %49, %c0_i32_26 : i32
    scf.if %50 {
      %c0_27 = arith.constant 0 : index
      %c0_28 = arith.constant 0 : index
      %51 = vector.load %arg17[%c0_27, %c0_28] : memref<32x32xf32, #tpu.memory_space<vmem>>, vector<32x32xf32>
      %52 = vector.broadcast %1 : vector<32x1xf32> to vector<32x32xf32>
      %53 = arith.mulf %51, %52 : vector<32x32xf32>
      %54 = arith.truncf %53 : vector<32x32xf32> to vector<32x32xbf16>
      %c0_29 = arith.constant 0 : index
      %c0_30 = arith.constant 0 : index
      %55 = vector.load %arg13[%c0_29, %c0_30] : memref<32x64xbf16, #tpu.memory_space<vmem>>, vector<32x64xbf16>
      %cst_31 = arith.constant dense<0.000000e+00> : vector<32x64xf32>
      %56 = tpu.matmul %54, %55, %cst_31 {dimension_numbers = #tpu.dot_dimension_numbers<[1], [0], [0], [1], [0, 0, 1, 1], [], []>} : vector<32x32xbf16>, vector<32x64xbf16>, vector<32x64xf32> -> vector<32x64xf32>
      %c0_32 = arith.constant 0 : index
      %c0_33 = arith.constant 0 : index
      %57 = vector.load %arg14[%c0_32, %c0_33] : memref<1x64xf32, #tpu.memory_space<vmem>>, vector<1x64xf32>
      %58 = vector.broadcast %57 : vector<1x64xf32> to vector<32x64xf32>
      %59 = arith.addf %56, %58 : vector<32x64xf32>
      %60 = vector.broadcast %1 : vector<32x1xf32> to vector<32x64xf32>
      %61 = arith.mulf %59, %60 : vector<32x64xf32>
      %62 = vector.extract_strided_slice %61 {offsets = [0, 0], sizes = [32, 32], strides = [1, 1]} : vector<32x64xf32> to vector<32x32xf32>
      %63 = vector.extract_strided_slice %61 {offsets = [0, 32], sizes = [32, 32], strides = [1, 1]} : vector<32x64xf32> to vector<32x32xf32>
      %c0_34 = arith.constant 0 : index
      %c0_35 = arith.constant 0 : index
      %c0_36 = arith.constant 0 : index
      %64 = vector.load %arg4[%c0_34, %c0_35, %c0_36] : memref<1x32x32xf32, #tpu.memory_space<vmem>>, vector<1x32x32xf32>
      %65 = vector.shape_cast %64 : vector<1x32x32xf32> to vector<32x32xf32>
      %66 = math.exp %63 : vector<32x32xf32>
      %67 = arith.mulf %65, %66 : vector<32x32xf32>
      %68 = arith.addf %62, %67 : vector<32x32xf32>
      %69 = vector.broadcast %1 : vector<32x1xf32> to vector<32x32xf32>
      %70 = arith.mulf %68, %69 : vector<32x32xf32>
      %cst_37 = arith.constant 0.000000e+00 : f32
      %71 = vector.broadcast %cst_37 : f32 to vector<32x32xf32>
      %72 = tpu.concatenate %61, %70, %71 in 1 : vector<32x64xf32>, vector<32x32xf32>, vector<32x32xf32> -> vector<32x128xf32>
      %c0_38 = arith.constant 0 : index
      %c0_39 = arith.constant 0 : index
      %c0_40 = arith.constant 0 : index
      %73 = vector.load %arg15[%c0_38, %c0_39, %c0_40] : memref<1x32x128xf32, #tpu.memory_space<vmem>>, vector<1x32x128xf32>
      %74 = vector.shape_cast %73 : vector<1x32x128xf32> to vector<32x128xf32>
      %75 = vector.shape_cast %72 : vector<32x128xf32> to vector<1x32x128xf32>
      tpu.vector_store %arg15[%c0_38, %c0_39, %c0_40], %75 {strides = array<i32>} : memref<1x32x128xf32, #tpu.memory_space<vmem>>, vector<1x32x128xf32>,
    } else {
    }
    return
  }
  func.func @transform_0(%arg0: i32, %arg1: i32) -> (i32, i32, i32) {
    %c0_i32 = arith.constant 0 : i32
    %c0_i32_0 = arith.constant 0 : i32
    %c0_i32_1 = arith.constant 0 : i32
    return %arg0, %c0_i32, %c0_i32_0 : i32, i32, i32
  }
  func.func @transform_1(%arg0: i32, %arg1: i32) -> (i32, i32, i32) {
    %c0_i32 = arith.constant 0 : i32
    %c0_i32_0 = arith.constant 0 : i32
    %c0_i32_1 = arith.constant 0 : i32
    return %arg0, %c0_i32, %c0_i32_0 : i32, i32, i32
  }
  func.func @transform_2(%arg0: i32, %arg1: i32) -> (i32, i32, i32) {
    %c0_i32 = arith.constant 0 : i32
    %c0_i32_0 = arith.constant 0 : i32
    %c0_i32_1 = arith.constant 0 : i32
    return %arg0, %c0_i32, %c0_i32_0 : i32, i32, i32
  }
  func.func @transform_3(%arg0: i32, %arg1: i32) -> (i32, i32) {
    %c0_i32 = arith.constant 0 : i32
    %c0_i32_0 = arith.constant 0 : i32
    %c0_i32_1 = arith.constant 0 : i32
    return %c0_i32, %c0_i32_0 : i32, i32
  }
  func.func @transform_4(%arg0: i32, %arg1: i32) -> (i32, i32) {
    %c0_i32 = arith.constant 0 : i32
    %c0_i32_0 = arith.constant 0 : i32
    %c0_i32_1 = arith.constant 0 : i32
    return %c0_i32, %c0_i32_0 : i32, i32
  }
  func.func @transform_5(%arg0: i32, %arg1: i32) -> (i32, i32) {
    %c0_i32 = arith.constant 0 : i32
    %c0_i32_0 = arith.constant 0 : i32
    %c0_i32_1 = arith.constant 0 : i32
    return %c0_i32, %c0_i32_0 : i32, i32
  }
  func.func @transform_6(%arg0: i32, %arg1: i32) -> (i32, i32) {
    %c0_i32 = arith.constant 0 : i32
    %c0_i32_0 = arith.constant 0 : i32
    %c0_i32_1 = arith.constant 0 : i32
    return %c0_i32, %c0_i32_0 : i32, i32
  }
  func.func @transform_7(%arg0: i32, %arg1: i32) -> (i32, i32, i32) {
    %c0_i32 = arith.constant 0 : i32
    %c0_i32_0 = arith.constant 0 : i32
    %c0_i32_1 = arith.constant 0 : i32
    return %arg1, %c0_i32, %c0_i32_0 : i32, i32, i32
  }
  func.func @transform_8(%arg0: i32, %arg1: i32) -> (i32, i32, i32) {
    %c0_i32 = arith.constant 0 : i32
    %c0_i32_0 = arith.constant 0 : i32
    %c0_i32_1 = arith.constant 0 : i32
    return %arg1, %c0_i32, %c0_i32_0 : i32, i32, i32
  }
  func.func @transform_9(%arg0: i32, %arg1: i32) -> (i32, i32, i32) {
    %c0_i32 = arith.constant 0 : i32
    %c0_i32_0 = arith.constant 0 : i32
    %c0_i32_1 = arith.constant 0 : i32
    return %arg1, %c0_i32, %c0_i32_0 : i32, i32, i32
  }
  func.func @transform_10(%arg0: i32, %arg1: i32) -> (i32, i32, i32) {
    %c0_i32 = arith.constant 0 : i32
    %c0_i32_0 = arith.constant 0 : i32
    %c0_i32_1 = arith.constant 0 : i32
    return %arg1, %c0_i32, %c0_i32_0 : i32, i32, i32
  }
  func.func @transform_11(%arg0: i32, %arg1: i32) -> (i32, i32) {
    %c0_i32 = arith.constant 0 : i32
    %c0_i32_0 = arith.constant 0 : i32
    %c0_i32_1 = arith.constant 0 : i32
    return %c0_i32, %c0_i32_0 : i32, i32
  }
  func.func @transform_12(%arg0: i32, %arg1: i32) -> (i32, i32) {
    %c0_i32 = arith.constant 0 : i32
    %c0_i32_0 = arith.constant 0 : i32
    %c0_i32_1 = arith.constant 0 : i32
    return %c0_i32, %c0_i32_0 : i32, i32
  }
  func.func @transform_13(%arg0: i32, %arg1: i32) -> (i32, i32, i32) {
    %c0_i32 = arith.constant 0 : i32
    %c0_i32_0 = arith.constant 0 : i32
    %c0_i32_1 = arith.constant 0 : i32
    return %arg0, %c0_i32, %c0_i32_0 : i32, i32, i32
  }
}

module attributes {stable_mosaic.version = 11 : i64} {
  func.func @_text_kernel(%arg0: i32, %arg1: memref<2x8x32xf32, #tpu.memory_space<vmem>>, %arg2: memref<2x8x1xf32, #tpu.memory_space<vmem>>, %arg3: memref<2x1x8xf32, #tpu.memory_space<vmem>>, %arg4: memref<2x32x96xbf16, #tpu.memory_space<vmem>>, %arg5: memref<2x1x96xf32, #tpu.memory_space<vmem>>, %arg6: memref<2x32x32xbf16, #tpu.memory_space<vmem>>, %arg7: memref<2x1x32xf32, #tpu.memory_space<vmem>>, %arg8: memref<2x1x32xf32, #tpu.memory_space<vmem>>, %arg9: memref<2x1x32xf32, #tpu.memory_space<vmem>>, %arg10: memref<2x96x128xbf16, #tpu.memory_space<vmem>>, %arg11: memref<2x1x128xf32, #tpu.memory_space<vmem>>, %arg12: memref<2x384x32xbf16, #tpu.memory_space<vmem>>, %arg13: memref<2x1x32xf32, #tpu.memory_space<vmem>>, %arg14: memref<2x1x32xf32, #tpu.memory_space<vmem>>, %arg15: memref<2x1x32xf32, #tpu.memory_space<vmem>>, %arg16: memref<32x64xbf16, #tpu.memory_space<vmem>>, %arg17: memref<1x64xf32, #tpu.memory_space<vmem>>, %arg18: memref<2x8x128xf32, #tpu.memory_space<vmem>>) attributes {dimension_semantics = [#tpu.dimension_semantics<arbitrary>], iteration_bounds = array<i64: 1>, scalar_prefetch = 0 : i64, scratch_operands = 0 : i64, tpu.core_type = #tpu.core_type<tc>, window_params = [{pipeline_mode = #tpu.pipeline_mode<synchronous>, transform_indices = @transform_0, window_bounds = array<i64: 2, 8, 32>}, {pipeline_mode = #tpu.pipeline_mode<synchronous>, transform_indices = @transform_1, window_bounds = array<i64: 2, 8, 1>}, {pipeline_mode = #tpu.pipeline_mode<synchronous>, transform_indices = @transform_2, window_bounds = array<i64: 2, 1, 8>}, {pipeline_mode = #tpu.pipeline_mode<synchronous>, transform_indices = @transform_3, window_bounds = array<i64: 2, 32, 96>}, {pipeline_mode = #tpu.pipeline_mode<synchronous>, transform_indices = @transform_4, window_bounds = array<i64: 2, 1, 96>}, {pipeline_mode = #tpu.pipeline_mode<synchronous>, transform_indices = @transform_5, window_bounds = array<i64: 2, 32, 32>}, {pipeline_mode = #tpu.pipeline_mode<synchronous>, transform_indices = @transform_6, window_bounds = array<i64: 2, 1, 32>}, {pipeline_mode = #tpu.pipeline_mode<synchronous>, transform_indices = @transform_7, window_bounds = array<i64: 2, 1, 32>}, {pipeline_mode = #tpu.pipeline_mode<synchronous>, transform_indices = @transform_8, window_bounds = array<i64: 2, 1, 32>}, {pipeline_mode = #tpu.pipeline_mode<synchronous>, transform_indices = @transform_9, window_bounds = array<i64: 2, 96, 128>}, {pipeline_mode = #tpu.pipeline_mode<synchronous>, transform_indices = @transform_10, window_bounds = array<i64: 2, 1, 128>}, {pipeline_mode = #tpu.pipeline_mode<synchronous>, transform_indices = @transform_11, window_bounds = array<i64: 2, 384, 32>}, {pipeline_mode = #tpu.pipeline_mode<synchronous>, transform_indices = @transform_12, window_bounds = array<i64: 2, 1, 32>}, {pipeline_mode = #tpu.pipeline_mode<synchronous>, transform_indices = @transform_13, window_bounds = array<i64: 2, 1, 32>}, {pipeline_mode = #tpu.pipeline_mode<synchronous>, transform_indices = @transform_14, window_bounds = array<i64: 2, 1, 32>}, {pipeline_mode = #tpu.pipeline_mode<synchronous>, transform_indices = @transform_15, window_bounds = array<i64: 32, 64>}, {pipeline_mode = #tpu.pipeline_mode<synchronous>, transform_indices = @transform_16, window_bounds = array<i64: 1, 64>}, {pipeline_mode = #tpu.pipeline_mode<synchronous>, transform_indices = @transform_17, window_bounds = array<i64: 2, 8, 128>}]} {
    %c0 = arith.constant 0 : index
    %c0_0 = arith.constant 0 : index
    %c0_1 = arith.constant 0 : index
    %0 = vector.load %arg2[%c0, %c0_0, %c0_1] : memref<2x8x1xf32, #tpu.memory_space<vmem>>, vector<2x8x1xf32>
    %1 = vector.shape_cast %0 : vector<2x8x1xf32> to vector<16x1xf32>
    %c0_2 = arith.constant 0 : index
    %c0_3 = arith.constant 0 : index
    %c0_4 = arith.constant 0 : index
    %2 = vector.load %arg3[%c0_2, %c0_3, %c0_4] : memref<2x1x8xf32, #tpu.memory_space<vmem>>, vector<2x1x8xf32>
    %cst = arith.constant 0.000000e+00 : f32
    %3 = vector.broadcast %cst : f32 to vector<1x32xf32>
    %cst_5 = arith.constant 0.000000e+00 : f32
    %4 = vector.broadcast %cst_5 : f32 to vector<1x128xf32>
    %c0_6 = arith.constant 0 : index
    %c0_7 = arith.constant 0 : index
    %c0_8 = arith.constant 0 : index
    %5 = vector.load %arg1[%c0_6, %c0_7, %c0_8] : memref<2x8x32xf32, #tpu.memory_space<vmem>>, vector<2x8x32xf32>
    %6 = vector.shape_cast %5 : vector<2x8x32xf32> to vector<16x32xf32>
    %c0_i32 = arith.constant 0 : i32
    %c2_i32 = arith.constant 2 : i32
    %7 = arith.addi %c0_i32, %c2_i32 : i32
    %c1_i32 = arith.constant 1 : i32
    %8 = scf.for %arg19 = %c0_i32 to %7 step %c1_i32 iter_args(%arg20 = %6) -> (vector<16x32xf32>)  : i32 {
      %23 = arith.truncf %arg20 : vector<16x32xf32> to vector<16x32xbf16>
      %24 = arith.index_cast %arg19 : i32 to index
      %c0_19 = arith.constant 0 : index
      %c0_20 = arith.constant 0 : index
      %25 = vector.load %arg4[%24, %c0_19, %c0_20] : memref<2x32x96xbf16, #tpu.memory_space<vmem>>, vector<1x32x96xbf16>
      %26 = vector.shape_cast %25 : vector<1x32x96xbf16> to vector<32x96xbf16>
      %cst_21 = arith.constant dense<0.000000e+00> : vector<16x96xf32>
      %27 = tpu.matmul %23, %26, %cst_21 {dimension_numbers = #tpu.dot_dimension_numbers<[1], [0], [0], [1], [0, 0, 1, 1], [], []>} : vector<16x32xbf16>, vector<32x96xbf16>, vector<16x96xf32> -> vector<16x96xf32>
      %28 = arith.index_cast %arg19 : i32 to index
      %c0_22 = arith.constant 0 : index
      %c0_23 = arith.constant 0 : index
      %29 = vector.load %arg5[%28, %c0_22, %c0_23] : memref<2x1x96xf32, #tpu.memory_space<vmem>>, vector<1x1x96xf32>
      %30 = vector.shape_cast %29 : vector<1x1x96xf32> to vector<1x96xf32>
      %31 = vector.broadcast %30 : vector<1x96xf32> to vector<16x96xf32>
      %32 = arith.addf %27, %31 : vector<16x96xf32>
      %33 = vector.shape_cast %32 : vector<16x96xf32> to vector<2x8x96xf32>
      %34 = vector.extract_strided_slice %33 {offsets = [0, 0, 0], sizes = [2, 8, 16], strides = [1, 1, 1]} : vector<2x8x96xf32> to vector<2x8x16xf32>
      %cst_24 = arith.constant 2.500000e-01 : f32
      %35 = vector.broadcast %cst_24 : f32 to vector<2x8x16xf32>
      %36 = arith.mulf %34, %35 : vector<2x8x16xf32>
      %37 = arith.truncf %36 : vector<2x8x16xf32> to vector<2x8x16xbf16>
      %38 = vector.extract_strided_slice %33 {offsets = [0, 0, 32], sizes = [2, 8, 16], strides = [1, 1, 1]} : vector<2x8x96xf32> to vector<2x8x16xf32>
      %39 = arith.truncf %38 : vector<2x8x16xf32> to vector<2x8x16xbf16>
      %40 = vector.extract_strided_slice %33 {offsets = [0, 0, 64], sizes = [2, 8, 16], strides = [1, 1, 1]} : vector<2x8x96xf32> to vector<2x8x16xf32>
      %41 = arith.truncf %40 : vector<2x8x16xf32> to vector<2x8x16xbf16>
      "tpu.trace_start"() <{level = 10 : i32, message = "bqd,bkd->bqk"}> : () -> ()
      %cst_25 = arith.constant dense<0.000000e+00> : vector<2x8x8xf32>
      %42 = tpu.matmul %37, %39, %cst_25 {dimension_numbers = #tpu.dot_dimension_numbers<[2], [2], [1], [1], [0, 0, 0, 1, 1, 1], [0], [0]>} : vector<2x8x16xbf16>, vector<2x8x16xbf16>, vector<2x8x8xf32> -> vector<2x8x8xf32>
      "tpu.trace_stop"() : () -> ()
      %43 = vector.broadcast %2 : vector<2x1x8xf32> to vector<2x8x8xf32>
      %44 = arith.addf %42, %43 : vector<2x8x8xf32>
      %cst_26 = arith.constant dense<0xFF800000> : vector<2x8xf32>
      %45 = vector.multi_reduction <maximumf>, %44, %cst_26 [2] : vector<2x8x8xf32> to vector<2x8xf32>
      %46 = vector.shape_cast %45 : vector<2x8xf32> to vector<2x8x1xf32>
      %47 = vector.broadcast %46 : vector<2x8x1xf32> to vector<2x8x8xf32>
      %48 = arith.subf %44, %47 : vector<2x8x8xf32>
      %49 = math.exp %48 : vector<2x8x8xf32>
      %cst_27 = arith.constant dense<0.000000e+00> : vector<2x8xf32>
      %50 = vector.multi_reduction <add>, %49, %cst_27 [2] : vector<2x8x8xf32> to vector<2x8xf32>
      %51 = vector.shape_cast %50 : vector<2x8xf32> to vector<2x8x1xf32>
      %52 = tpu.reciprocal %51 {approx = true} : vector<2x8x1xf32> -> vector<2x8x1xf32>
      %53 = vector.broadcast %52 : vector<2x8x1xf32> to vector<2x8x8xf32>
      %54 = arith.mulf %49, %53 : vector<2x8x8xf32>
      %55 = arith.truncf %54 : vector<2x8x8xf32> to vector<2x8x8xbf16>
      "tpu.trace_start"() <{level = 10 : i32, message = "bqk,bkd->bqd"}> : () -> ()
      %cst_28 = arith.constant dense<0.000000e+00> : vector<2x8x16xf32>
      %56 = tpu.matmul %55, %41, %cst_28 {dimension_numbers = #tpu.dot_dimension_numbers<[2], [1], [1], [2], [0, 0, 0, 1, 1, 2], [0], [0]>} : vector<2x8x8xbf16>, vector<2x8x16xbf16>, vector<2x8x16xf32> -> vector<2x8x16xf32>
      "tpu.trace_stop"() : () -> ()
      %57 = vector.extract_strided_slice %33 {offsets = [0, 0, 16], sizes = [2, 8, 16], strides = [1, 1, 1]} : vector<2x8x96xf32> to vector<2x8x16xf32>
      %cst_29 = arith.constant 2.500000e-01 : f32
      %58 = vector.broadcast %cst_29 : f32 to vector<2x8x16xf32>
      %59 = arith.mulf %57, %58 : vector<2x8x16xf32>
      %60 = arith.truncf %59 : vector<2x8x16xf32> to vector<2x8x16xbf16>
      %61 = vector.extract_strided_slice %33 {offsets = [0, 0, 48], sizes = [2, 8, 16], strides = [1, 1, 1]} : vector<2x8x96xf32> to vector<2x8x16xf32>
      %62 = arith.truncf %61 : vector<2x8x16xf32> to vector<2x8x16xbf16>
      %63 = vector.extract_strided_slice %33 {offsets = [0, 0, 80], sizes = [2, 8, 16], strides = [1, 1, 1]} : vector<2x8x96xf32> to vector<2x8x16xf32>
      %64 = arith.truncf %63 : vector<2x8x16xf32> to vector<2x8x16xbf16>
      "tpu.trace_start"() <{level = 10 : i32, message = "bqd,bkd->bqk"}> : () -> ()
      %cst_30 = arith.constant dense<0.000000e+00> : vector<2x8x8xf32>
      %65 = tpu.matmul %60, %62, %cst_30 {dimension_numbers = #tpu.dot_dimension_numbers<[2], [2], [1], [1], [0, 0, 0, 1, 1, 1], [0], [0]>} : vector<2x8x16xbf16>, vector<2x8x16xbf16>, vector<2x8x8xf32> -> vector<2x8x8xf32>
      "tpu.trace_stop"() : () -> ()
      %66 = vector.broadcast %2 : vector<2x1x8xf32> to vector<2x8x8xf32>
      %67 = arith.addf %65, %66 : vector<2x8x8xf32>
      %cst_31 = arith.constant dense<0xFF800000> : vector<2x8xf32>
      %68 = vector.multi_reduction <maximumf>, %67, %cst_31 [2] : vector<2x8x8xf32> to vector<2x8xf32>
      %69 = vector.shape_cast %68 : vector<2x8xf32> to vector<2x8x1xf32>
      %70 = vector.broadcast %69 : vector<2x8x1xf32> to vector<2x8x8xf32>
      %71 = arith.subf %67, %70 : vector<2x8x8xf32>
      %72 = math.exp %71 : vector<2x8x8xf32>
      %cst_32 = arith.constant dense<0.000000e+00> : vector<2x8xf32>
      %73 = vector.multi_reduction <add>, %72, %cst_32 [2] : vector<2x8x8xf32> to vector<2x8xf32>
      %74 = vector.shape_cast %73 : vector<2x8xf32> to vector<2x8x1xf32>
      %75 = tpu.reciprocal %74 {approx = true} : vector<2x8x1xf32> -> vector<2x8x1xf32>
      %76 = vector.broadcast %75 : vector<2x8x1xf32> to vector<2x8x8xf32>
      %77 = arith.mulf %72, %76 : vector<2x8x8xf32>
      %78 = arith.truncf %77 : vector<2x8x8xf32> to vector<2x8x8xbf16>
      "tpu.trace_start"() <{level = 10 : i32, message = "bqk,bkd->bqd"}> : () -> ()
      %cst_33 = arith.constant dense<0.000000e+00> : vector<2x8x16xf32>
      %79 = tpu.matmul %78, %64, %cst_33 {dimension_numbers = #tpu.dot_dimension_numbers<[2], [1], [1], [2], [0, 0, 0, 1, 1, 2], [0], [0]>} : vector<2x8x8xbf16>, vector<2x8x16xbf16>, vector<2x8x16xf32> -> vector<2x8x16xf32>
      "tpu.trace_stop"() : () -> ()
      %80 = tpu.concatenate %56, %79 in 2 : vector<2x8x16xf32>, vector<2x8x16xf32> -> vector<2x8x32xf32>
      %81 = vector.shape_cast %80 : vector<2x8x32xf32> to vector<16x32xf32>
      %82 = arith.truncf %81 : vector<16x32xf32> to vector<16x32xbf16>
      %83 = arith.index_cast %arg19 : i32 to index
      %c0_34 = arith.constant 0 : index
      %c0_35 = arith.constant 0 : index
      %84 = vector.load %arg6[%83, %c0_34, %c0_35] : memref<2x32x32xbf16, #tpu.memory_space<vmem>>, vector<1x32x32xbf16>
      %85 = vector.shape_cast %84 : vector<1x32x32xbf16> to vector<32x32xbf16>
      %cst_36 = arith.constant dense<0.000000e+00> : vector<16x32xf32>
      %86 = tpu.matmul %82, %85, %cst_36 {dimension_numbers = #tpu.dot_dimension_numbers<[1], [0], [0], [1], [0, 0, 1, 1], [], []>} : vector<16x32xbf16>, vector<32x32xbf16>, vector<16x32xf32> -> vector<16x32xf32>
      %87 = arith.index_cast %arg19 : i32 to index
      %c0_37 = arith.constant 0 : index
      %c0_38 = arith.constant 0 : index
      %88 = vector.load %arg7[%87, %c0_37, %c0_38] : memref<2x1x32xf32, #tpu.memory_space<vmem>>, vector<1x1x32xf32>
      %89 = vector.shape_cast %88 : vector<1x1x32xf32> to vector<1x32xf32>
      %90 = vector.broadcast %89 : vector<1x32xf32> to vector<16x32xf32>
      %91 = arith.addf %86, %90 : vector<16x32xf32>
      %92 = vector.broadcast %1 : vector<16x1xf32> to vector<16x32xf32>
      %93 = arith.mulf %91, %92 : vector<16x32xf32>
      %94 = arith.addf %arg20, %93 : vector<16x32xf32>
      %cst_39 = arith.constant dense<0.000000e+00> : vector<16xf32>
      %95 = vector.multi_reduction <add>, %94, %cst_39 [1] : vector<16x32xf32> to vector<16xf32>
      %96 = vector.shape_cast %95 : vector<16xf32> to vector<16x1xf32>
      %cst_40 = arith.constant 3.200000e+01 : f32
      %97 = vector.broadcast %cst_40 : f32 to vector<16x1xf32>
      %98 = arith.divf %96, %97 : vector<16x1xf32>
      %99 = vector.broadcast %98 : vector<16x1xf32> to vector<16x32xf32>
      %100 = arith.subf %94, %99 : vector<16x32xf32>
      %101 = arith.mulf %100, %100 : vector<16x32xf32>
      %cst_41 = arith.constant dense<0.000000e+00> : vector<16xf32>
      %102 = vector.multi_reduction <add>, %101, %cst_41 [1] : vector<16x32xf32> to vector<16xf32>
      %103 = vector.shape_cast %102 : vector<16xf32> to vector<16x1xf32>
      %cst_42 = arith.constant 3.200000e+01 : f32
      %104 = vector.broadcast %cst_42 : f32 to vector<16x1xf32>
      %105 = arith.divf %103, %104 : vector<16x1xf32>
      %106 = vector.broadcast %98 : vector<16x1xf32> to vector<16x32xf32>
      %107 = arith.subf %94, %106 : vector<16x32xf32>
      %cst_43 = arith.constant 9.99999974E-6 : f32
      %108 = vector.broadcast %cst_43 : f32 to vector<16x1xf32>
      %109 = arith.addf %105, %108 : vector<16x1xf32>
      %110 = math.rsqrt %109 : vector<16x1xf32>
      %111 = vector.broadcast %110 : vector<16x1xf32> to vector<16x32xf32>
      %112 = arith.mulf %107, %111 : vector<16x32xf32>
      %113 = arith.index_cast %arg19 : i32 to index
      %c0_44 = arith.constant 0 : index
      %c0_45 = arith.constant 0 : index
      %114 = vector.load %arg8[%113, %c0_44, %c0_45] : memref<2x1x32xf32, #tpu.memory_space<vmem>>, vector<1x1x32xf32>
      %115 = vector.shape_cast %114 : vector<1x1x32xf32> to vector<1x32xf32>
      %116 = vector.broadcast %115 : vector<1x32xf32> to vector<16x32xf32>
      %117 = arith.mulf %112, %116 : vector<16x32xf32>
      %118 = arith.index_cast %arg19 : i32 to index
      %c0_46 = arith.constant 0 : index
      %c0_47 = arith.constant 0 : index
      %119 = vector.load %arg9[%118, %c0_46, %c0_47] : memref<2x1x32xf32, #tpu.memory_space<vmem>>, vector<1x1x32xf32>
      %120 = vector.shape_cast %119 : vector<1x1x32xf32> to vector<1x32xf32>
      %121 = vector.broadcast %120 : vector<1x32xf32> to vector<16x32xf32>
      %122 = arith.addf %117, %121 : vector<16x32xf32>
      %123 = vector.broadcast %1 : vector<16x1xf32> to vector<16x32xf32>
      %124 = arith.mulf %122, %123 : vector<16x32xf32>
      %125 = vector.extract_strided_slice %124 {offsets = [0, 0], sizes = [8, 32], strides = [1, 1]} : vector<16x32xf32> to vector<8x32xf32>
      %126 = tpu.concatenate %3, %125, %3 in 0 : vector<1x32xf32>, vector<8x32xf32>, vector<1x32xf32> -> vector<10x32xf32>
      %127 = vector.extract_strided_slice %126 {offsets = [0, 0], sizes = [8, 32], strides = [1, 1]} : vector<10x32xf32> to vector<8x32xf32>
      %128 = vector.extract_strided_slice %126 {offsets = [1, 0], sizes = [8, 32], strides = [1, 1]} : vector<10x32xf32> to vector<8x32xf32>
      %129 = vector.extract_strided_slice %126 {offsets = [2, 0], sizes = [8, 32], strides = [1, 1]} : vector<10x32xf32> to vector<8x32xf32>
      %130 = tpu.concatenate %127, %128, %129 in 1 : vector<8x32xf32>, vector<8x32xf32>, vector<8x32xf32> -> vector<8x96xf32>
      %131 = vector.extract_strided_slice %124 {offsets = [8, 0], sizes = [8, 32], strides = [1, 1]} : vector<16x32xf32> to vector<8x32xf32>
      %132 = tpu.concatenate %3, %131, %3 in 0 : vector<1x32xf32>, vector<8x32xf32>, vector<1x32xf32> -> vector<10x32xf32>
      %133 = vector.extract_strided_slice %132 {offsets = [0, 0], sizes = [8, 32], strides = [1, 1]} : vector<10x32xf32> to vector<8x32xf32>
      %134 = vector.extract_strided_slice %132 {offsets = [1, 0], sizes = [8, 32], strides = [1, 1]} : vector<10x32xf32> to vector<8x32xf32>
      %135 = vector.extract_strided_slice %132 {offsets = [2, 0], sizes = [8, 32], strides = [1, 1]} : vector<10x32xf32> to vector<8x32xf32>
      %136 = tpu.concatenate %133, %134, %135 in 1 : vector<8x32xf32>, vector<8x32xf32>, vector<8x32xf32> -> vector<8x96xf32>
      %137 = tpu.concatenate %130, %136 in 0 : vector<8x96xf32>, vector<8x96xf32> -> vector<16x96xf32>
      %138 = arith.truncf %137 : vector<16x96xf32> to vector<16x96xbf16>
      %139 = arith.index_cast %arg19 : i32 to index
      %c0_48 = arith.constant 0 : index
      %c0_49 = arith.constant 0 : index
      %140 = vector.load %arg10[%139, %c0_48, %c0_49] : memref<2x96x128xbf16, #tpu.memory_space<vmem>>, vector<1x96x128xbf16>
      %141 = vector.shape_cast %140 : vector<1x96x128xbf16> to vector<96x128xbf16>
      %cst_50 = arith.constant dense<0.000000e+00> : vector<16x128xf32>
      %142 = tpu.matmul %138, %141, %cst_50 {dimension_numbers = #tpu.dot_dimension_numbers<[1], [0], [0], [1], [0, 0, 1, 1], [], []>} : vector<16x96xbf16>, vector<96x128xbf16>, vector<16x128xf32> -> vector<16x128xf32>
      %143 = arith.index_cast %arg19 : i32 to index
      %c0_51 = arith.constant 0 : index
      %c0_52 = arith.constant 0 : index
      %144 = vector.load %arg11[%143, %c0_51, %c0_52] : memref<2x1x128xf32, #tpu.memory_space<vmem>>, vector<1x1x128xf32>
      %145 = vector.shape_cast %144 : vector<1x1x128xf32> to vector<1x128xf32>
      %146 = vector.broadcast %145 : vector<1x128xf32> to vector<16x128xf32>
      %147 = arith.addf %142, %146 : vector<16x128xf32>
      %cst_53 = arith.constant 0.000000e+00 : f32
      %148 = vector.broadcast %cst_53 : f32 to vector<16x128xf32>
      %149 = arith.maximumf %147, %148 : vector<16x128xf32>
      %150 = vector.broadcast %1 : vector<16x1xf32> to vector<16x128xf32>
      %151 = arith.mulf %149, %150 : vector<16x128xf32>
      %152 = vector.extract_strided_slice %151 {offsets = [0, 0], sizes = [8, 128], strides = [1, 1]} : vector<16x128xf32> to vector<8x128xf32>
      %153 = tpu.concatenate %4, %152, %4 in 0 : vector<1x128xf32>, vector<8x128xf32>, vector<1x128xf32> -> vector<10x128xf32>
      %154 = vector.extract_strided_slice %153 {offsets = [0, 0], sizes = [8, 128], strides = [1, 1]} : vector<10x128xf32> to vector<8x128xf32>
      %155 = vector.extract_strided_slice %153 {offsets = [1, 0], sizes = [8, 128], strides = [1, 1]} : vector<10x128xf32> to vector<8x128xf32>
      %156 = vector.extract_strided_slice %153 {offsets = [2, 0], sizes = [8, 128], strides = [1, 1]} : vector<10x128xf32> to vector<8x128xf32>
      %157 = tpu.concatenate %154, %155, %156 in 1 : vector<8x128xf32>, vector<8x128xf32>, vector<8x128xf32> -> vector<8x384xf32>
      %158 = vector.extract_strided_slice %151 {offsets = [8, 0], sizes = [8, 128], strides = [1, 1]} : vector<16x128xf32> to vector<8x128xf32>
      %159 = tpu.concatenate %4, %158, %4 in 0 : vector<1x128xf32>, vector<8x128xf32>, vector<1x128xf32> -> vector<10x128xf32>
      %160 = vector.extract_strided_slice %159 {offsets = [0, 0], sizes = [8, 128], strides = [1, 1]} : vector<10x128xf32> to vector<8x128xf32>
      %161 = vector.extract_strided_slice %159 {offsets = [1, 0], sizes = [8, 128], strides = [1, 1]} : vector<10x128xf32> to vector<8x128xf32>
      %162 = vector.extract_strided_slice %159 {offsets = [2, 0], sizes = [8, 128], strides = [1, 1]} : vector<10x128xf32> to vector<8x128xf32>
      %163 = tpu.concatenate %160, %161, %162 in 1 : vector<8x128xf32>, vector<8x128xf32>, vector<8x128xf32> -> vector<8x384xf32>
      %164 = tpu.concatenate %157, %163 in 0 : vector<8x384xf32>, vector<8x384xf32> -> vector<16x384xf32>
      %165 = arith.truncf %164 : vector<16x384xf32> to vector<16x384xbf16>
      %166 = arith.index_cast %arg19 : i32 to index
      %c0_54 = arith.constant 0 : index
      %c0_55 = arith.constant 0 : index
      %167 = vector.load %arg12[%166, %c0_54, %c0_55] : memref<2x384x32xbf16, #tpu.memory_space<vmem>>, vector<1x384x32xbf16>
      %168 = vector.shape_cast %167 : vector<1x384x32xbf16> to vector<384x32xbf16>
      %cst_56 = arith.constant dense<0.000000e+00> : vector<16x32xf32>
      %169 = tpu.matmul %165, %168, %cst_56 {dimension_numbers = #tpu.dot_dimension_numbers<[1], [0], [0], [1], [0, 0, 1, 1], [], []>} : vector<16x384xbf16>, vector<384x32xbf16>, vector<16x32xf32> -> vector<16x32xf32>
      %170 = arith.index_cast %arg19 : i32 to index
      %c0_57 = arith.constant 0 : index
      %c0_58 = arith.constant 0 : index
      %171 = vector.load %arg13[%170, %c0_57, %c0_58] : memref<2x1x32xf32, #tpu.memory_space<vmem>>, vector<1x1x32xf32>
      %172 = vector.shape_cast %171 : vector<1x1x32xf32> to vector<1x32xf32>
      %173 = vector.broadcast %172 : vector<1x32xf32> to vector<16x32xf32>
      %174 = arith.addf %169, %173 : vector<16x32xf32>
      %175 = vector.broadcast %1 : vector<16x1xf32> to vector<16x32xf32>
      %176 = arith.mulf %174, %175 : vector<16x32xf32>
      %177 = arith.addf %122, %176 : vector<16x32xf32>
      %cst_59 = arith.constant dense<0.000000e+00> : vector<16xf32>
      %178 = vector.multi_reduction <add>, %177, %cst_59 [1] : vector<16x32xf32> to vector<16xf32>
      %179 = vector.shape_cast %178 : vector<16xf32> to vector<16x1xf32>
      %cst_60 = arith.constant 3.200000e+01 : f32
      %180 = vector.broadcast %cst_60 : f32 to vector<16x1xf32>
      %181 = arith.divf %179, %180 : vector<16x1xf32>
      %182 = vector.broadcast %181 : vector<16x1xf32> to vector<16x32xf32>
      %183 = arith.subf %177, %182 : vector<16x32xf32>
      %184 = arith.mulf %183, %183 : vector<16x32xf32>
      %cst_61 = arith.constant dense<0.000000e+00> : vector<16xf32>
      %185 = vector.multi_reduction <add>, %184, %cst_61 [1] : vector<16x32xf32> to vector<16xf32>
      %186 = vector.shape_cast %185 : vector<16xf32> to vector<16x1xf32>
      %cst_62 = arith.constant 3.200000e+01 : f32
      %187 = vector.broadcast %cst_62 : f32 to vector<16x1xf32>
      %188 = arith.divf %186, %187 : vector<16x1xf32>
      %189 = vector.broadcast %181 : vector<16x1xf32> to vector<16x32xf32>
      %190 = arith.subf %177, %189 : vector<16x32xf32>
      %cst_63 = arith.constant 9.99999974E-6 : f32
      %191 = vector.broadcast %cst_63 : f32 to vector<16x1xf32>
      %192 = arith.addf %188, %191 : vector<16x1xf32>
      %193 = math.rsqrt %192 : vector<16x1xf32>
      %194 = vector.broadcast %193 : vector<16x1xf32> to vector<16x32xf32>
      %195 = arith.mulf %190, %194 : vector<16x32xf32>
      %196 = arith.index_cast %arg19 : i32 to index
      %c0_64 = arith.constant 0 : index
      %c0_65 = arith.constant 0 : index
      %197 = vector.load %arg14[%196, %c0_64, %c0_65] : memref<2x1x32xf32, #tpu.memory_space<vmem>>, vector<1x1x32xf32>
      %198 = vector.shape_cast %197 : vector<1x1x32xf32> to vector<1x32xf32>
      %199 = vector.broadcast %198 : vector<1x32xf32> to vector<16x32xf32>
      %200 = arith.mulf %195, %199 : vector<16x32xf32>
      %201 = arith.index_cast %arg19 : i32 to index
      %c0_66 = arith.constant 0 : index
      %c0_67 = arith.constant 0 : index
      %202 = vector.load %arg15[%201, %c0_66, %c0_67] : memref<2x1x32xf32, #tpu.memory_space<vmem>>, vector<1x1x32xf32>
      %203 = vector.shape_cast %202 : vector<1x1x32xf32> to vector<1x32xf32>
      %204 = vector.broadcast %203 : vector<1x32xf32> to vector<16x32xf32>
      %205 = arith.addf %200, %204 : vector<16x32xf32>
      scf.yield %205 : vector<16x32xf32>
    }
    %c2_i32_9 = arith.constant 2 : i32
    %9 = vector.broadcast %1 : vector<16x1xf32> to vector<16x32xf32>
    %10 = arith.mulf %8, %9 : vector<16x32xf32>
    %11 = arith.truncf %10 : vector<16x32xf32> to vector<16x32xbf16>
    %c0_10 = arith.constant 0 : index
    %c0_11 = arith.constant 0 : index
    %12 = vector.load %arg16[%c0_10, %c0_11] : memref<32x64xbf16, #tpu.memory_space<vmem>>, vector<32x64xbf16>
    %cst_12 = arith.constant dense<0.000000e+00> : vector<16x64xf32>
    %13 = tpu.matmul %11, %12, %cst_12 {dimension_numbers = #tpu.dot_dimension_numbers<[1], [0], [0], [1], [0, 0, 1, 1], [], []>} : vector<16x32xbf16>, vector<32x64xbf16>, vector<16x64xf32> -> vector<16x64xf32>
    %c0_13 = arith.constant 0 : index
    %c0_14 = arith.constant 0 : index
    %14 = vector.load %arg17[%c0_13, %c0_14] : memref<1x64xf32, #tpu.memory_space<vmem>>, vector<1x64xf32>
    %15 = vector.broadcast %14 : vector<1x64xf32> to vector<16x64xf32>
    %16 = arith.addf %13, %15 : vector<16x64xf32>
    %17 = vector.broadcast %1 : vector<16x1xf32> to vector<16x64xf32>
    %18 = arith.mulf %16, %17 : vector<16x64xf32>
    %cst_15 = arith.constant 0.000000e+00 : f32
    %19 = vector.broadcast %cst_15 : f32 to vector<16x64xf32>
    %20 = tpu.concatenate %18, %19 in 1 : vector<16x64xf32>, vector<16x64xf32> -> vector<16x128xf32>
    %21 = vector.shape_cast %20 : vector<16x128xf32> to vector<2x8x128xf32>
    %c0_16 = arith.constant 0 : index
    %c0_17 = arith.constant 0 : index
    %c0_18 = arith.constant 0 : index
    %22 = vector.load %arg18[%c0_16, %c0_17, %c0_18] : memref<2x8x128xf32, #tpu.memory_space<vmem>>, vector<2x8x128xf32>
    tpu.vector_store %arg18[%c0_16, %c0_17, %c0_18], %21 {strides = array<i32>} : memref<2x8x128xf32, #tpu.memory_space<vmem>>, vector<2x8x128xf32>,
    return
  }
  func.func @transform_0(%arg0: i32) -> (i32, i32, i32) {
    %c0_i32 = arith.constant 0 : i32
    %c0_i32_0 = arith.constant 0 : i32
    %c0_i32_1 = arith.constant 0 : i32
    %c0_i32_2 = arith.constant 0 : i32
    return %c0_i32, %c0_i32_0, %c0_i32_1 : i32, i32, i32
  }
  func.func @transform_1(%arg0: i32) -> (i32, i32, i32) {
    %c0_i32 = arith.constant 0 : i32
    %c0_i32_0 = arith.constant 0 : i32
    %c0_i32_1 = arith.constant 0 : i32
    %c0_i32_2 = arith.constant 0 : i32
    return %c0_i32, %c0_i32_0, %c0_i32_1 : i32, i32, i32
  }
  func.func @transform_2(%arg0: i32) -> (i32, i32, i32) {
    %c0_i32 = arith.constant 0 : i32
    %c0_i32_0 = arith.constant 0 : i32
    %c0_i32_1 = arith.constant 0 : i32
    %c0_i32_2 = arith.constant 0 : i32
    return %c0_i32, %c0_i32_0, %c0_i32_1 : i32, i32, i32
  }
  func.func @transform_3(%arg0: i32) -> (i32, i32, i32) {
    %c0_i32 = arith.constant 0 : i32
    %c0_i32_0 = arith.constant 0 : i32
    %c0_i32_1 = arith.constant 0 : i32
    %c0_i32_2 = arith.constant 0 : i32
    return %c0_i32, %c0_i32_0, %c0_i32_1 : i32, i32, i32
  }
  func.func @transform_4(%arg0: i32) -> (i32, i32, i32) {
    %c0_i32 = arith.constant 0 : i32
    %c0_i32_0 = arith.constant 0 : i32
    %c0_i32_1 = arith.constant 0 : i32
    %c0_i32_2 = arith.constant 0 : i32
    return %c0_i32, %c0_i32_0, %c0_i32_1 : i32, i32, i32
  }
  func.func @transform_5(%arg0: i32) -> (i32, i32, i32) {
    %c0_i32 = arith.constant 0 : i32
    %c0_i32_0 = arith.constant 0 : i32
    %c0_i32_1 = arith.constant 0 : i32
    %c0_i32_2 = arith.constant 0 : i32
    return %c0_i32, %c0_i32_0, %c0_i32_1 : i32, i32, i32
  }
  func.func @transform_6(%arg0: i32) -> (i32, i32, i32) {
    %c0_i32 = arith.constant 0 : i32
    %c0_i32_0 = arith.constant 0 : i32
    %c0_i32_1 = arith.constant 0 : i32
    %c0_i32_2 = arith.constant 0 : i32
    return %c0_i32, %c0_i32_0, %c0_i32_1 : i32, i32, i32
  }
  func.func @transform_7(%arg0: i32) -> (i32, i32, i32) {
    %c0_i32 = arith.constant 0 : i32
    %c0_i32_0 = arith.constant 0 : i32
    %c0_i32_1 = arith.constant 0 : i32
    %c0_i32_2 = arith.constant 0 : i32
    return %c0_i32, %c0_i32_0, %c0_i32_1 : i32, i32, i32
  }
  func.func @transform_8(%arg0: i32) -> (i32, i32, i32) {
    %c0_i32 = arith.constant 0 : i32
    %c0_i32_0 = arith.constant 0 : i32
    %c0_i32_1 = arith.constant 0 : i32
    %c0_i32_2 = arith.constant 0 : i32
    return %c0_i32, %c0_i32_0, %c0_i32_1 : i32, i32, i32
  }
  func.func @transform_9(%arg0: i32) -> (i32, i32, i32) {
    %c0_i32 = arith.constant 0 : i32
    %c0_i32_0 = arith.constant 0 : i32
    %c0_i32_1 = arith.constant 0 : i32
    %c0_i32_2 = arith.constant 0 : i32
    return %c0_i32, %c0_i32_0, %c0_i32_1 : i32, i32, i32
  }
  func.func @transform_10(%arg0: i32) -> (i32, i32, i32) {
    %c0_i32 = arith.constant 0 : i32
    %c0_i32_0 = arith.constant 0 : i32
    %c0_i32_1 = arith.constant 0 : i32
    %c0_i32_2 = arith.constant 0 : i32
    return %c0_i32, %c0_i32_0, %c0_i32_1 : i32, i32, i32
  }
  func.func @transform_11(%arg0: i32) -> (i32, i32, i32) {
    %c0_i32 = arith.constant 0 : i32
    %c0_i32_0 = arith.constant 0 : i32
    %c0_i32_1 = arith.constant 0 : i32
    %c0_i32_2 = arith.constant 0 : i32
    return %c0_i32, %c0_i32_0, %c0_i32_1 : i32, i32, i32
  }
  func.func @transform_12(%arg0: i32) -> (i32, i32, i32) {
    %c0_i32 = arith.constant 0 : i32
    %c0_i32_0 = arith.constant 0 : i32
    %c0_i32_1 = arith.constant 0 : i32
    %c0_i32_2 = arith.constant 0 : i32
    return %c0_i32, %c0_i32_0, %c0_i32_1 : i32, i32, i32
  }
  func.func @transform_13(%arg0: i32) -> (i32, i32, i32) {
    %c0_i32 = arith.constant 0 : i32
    %c0_i32_0 = arith.constant 0 : i32
    %c0_i32_1 = arith.constant 0 : i32
    %c0_i32_2 = arith.constant 0 : i32
    return %c0_i32, %c0_i32_0, %c0_i32_1 : i32, i32, i32
  }
  func.func @transform_14(%arg0: i32) -> (i32, i32, i32) {
    %c0_i32 = arith.constant 0 : i32
    %c0_i32_0 = arith.constant 0 : i32
    %c0_i32_1 = arith.constant 0 : i32
    %c0_i32_2 = arith.constant 0 : i32
    return %c0_i32, %c0_i32_0, %c0_i32_1 : i32, i32, i32
  }
  func.func @transform_15(%arg0: i32) -> (i32, i32) {
    %c0_i32 = arith.constant 0 : i32
    %c0_i32_0 = arith.constant 0 : i32
    %c0_i32_1 = arith.constant 0 : i32
    return %c0_i32, %c0_i32_0 : i32, i32
  }
  func.func @transform_16(%arg0: i32) -> (i32, i32) {
    %c0_i32 = arith.constant 0 : i32
    %c0_i32_0 = arith.constant 0 : i32
    %c0_i32_1 = arith.constant 0 : i32
    return %c0_i32, %c0_i32_0 : i32, i32
  }
  func.func @transform_17(%arg0: i32) -> (i32, i32, i32) {
    %c0_i32 = arith.constant 0 : i32
    %c0_i32_0 = arith.constant 0 : i32
    %c0_i32_1 = arith.constant 0 : i32
    %c0_i32_2 = arith.constant 0 : i32
    return %c0_i32, %c0_i32_0, %c0_i32_1 : i32, i32, i32
  }
}

</mosaic_0001>

<bundles_post_ra>
// kernel: fwd.3
= control target key start
LH: loop header
LB: loop body
LE: loop exit
PB: predicated region body
PF: predicated region fallthrough
CT: control target
= control target key end

     0   :  { %s3107_s0 = inlined_call_operand.hbm [shape: f32[2,8,32], index: 0, kind: input, shape index: {}]   ;;  %s3108_s1 = inlined_call_operand.hbm [shape: f32[2,8,1], index: 1, kind: input, shape index: {}]   ;;  %s3109_s2 = inlined_call_operand.hbm [shape: f32[2,1,8], index: 2, kind: input, shape index: {}]   ;;  %s3110_s3 = inlined_call_operand.hbm [shape: bf16[2,32,96], index: 3, kind: input, shape index: {}]   ;;  %s3111_s4 = inlined_call_operand.hbm [shape: f32[2,1,96], index: 4, kind: input, shape index: {}]   ;;  %s3112_s5 = inlined_call_operand.hbm [shape: bf16[2,32,32], index: 5, kind: input, shape index: {}]   ;;  %s3113_s6 = inlined_call_operand.hbm [shape: f32[2,1,32], index: 6, kind: input, shape index: {}]   ;;  %s3114_s7 = inlined_call_operand.hbm [shape: f32[2,1,32], index: 7, kind: input, shape index: {}]   ;;  %s3115_s8 = inlined_call_operand.hbm [shape: f32[2,1,32], index: 8, kind: input, shape index: {}]   ;;  %s3116_s9 = inlined_call_operand.hbm [shape: bf16[2,96,128], index: 9, kind: input, shape index: {}]   ;;  %s3117_s10 = inlined_call_operand.hbm [shape: f32[2,1,128], index: 10, kind: input, shape index: {}]   ;;  %s3118_s11 = inlined_call_operand.hbm [shape: bf16[2,384,32], index: 11, kind: input, shape index: {}]   ;;  %s3119_s12 = inlined_call_operand.hbm [shape: f32[2,1,32], index: 12, kind: input, shape index: {}]   ;;  %s3120_s13 = inlined_call_operand.hbm [shape: f32[2,1,32], index: 13, kind: input, shape index: {}]   ;;  %s3121_s14 = inlined_call_operand.hbm [shape: f32[2,1,32], index: 14, kind: input, shape index: {}]   ;;  %s3122_s15 = inlined_call_operand.hbm [shape: bf16[32,64], index: 15, kind: input, shape index: {}]   ;;  %s3123_s16 = inlined_call_operand.hbm [shape: f32[1,64], index: 16, kind: input, shape index: {}]   ;;  %s3124_s17 = inlined_call_operand.hbm [shape: f32[2,8,128], index: 17, kind: output, shape index: {}]  }
   0x1   :  { %3129 = sst [smem:[#allocation40_spill]] %s3107_s0 }
   0x2   :  { %3130 = sst [smem:[#allocation41_spill]] %s3108_s1 }
   0x3   :  { %22 = vsyncpa [#allocation3], 0 }
   0x4   :  { %23 = vsyncpa [#allocation6], 0 }
   0x5   :  { %24 = vsyncpa [#allocation9], 0 }
   0x6   :  { %25 = vsyncpa [#allocation12], 0 }
   0x7   :  { %26 = vsyncpa [#allocation15], 0 }
   0x8   :  { %27 = vsyncpa [#allocation18], 0 }
   0x9   :  { %28 = vsyncpa [#allocation21], 0 }
   0xa   :  { %29 = vsyncpa [#allocation24], 0 }
   0xb   :  { %30 = vsyncpa [#allocation27], 0 }
   0xc   :  { %31 = vsyncpa [#allocation4], 0  ;;  %s2464_s24 = smov [#allocation5]   ;;  %s2465_s26 = smov [#allocation8]  }
   0xd   :  { %s49_s25 = sshll.u32 %s2464_s24, 4  ;;  %s73_s27 = sshll.u32 %s2465_s26, 4  ;;  %s50_s25 = int_to_ptr.vmem [resolvable:$true] %s49_s25  ;;  %s2591_s27 = int_to_ptr.vmem [resolvable:$true] %s73_s27 }
   0xe   :  { %s3131_s0 = sld [smem:[#allocation41_spill]] }
  0x14   :  { %s2024_s30 = scalar_lea.hbm %s3131_s0, 256 }
  0x15   :  { %p2025_p0 = scmp.ne.s32.totalorder %s3131_s0, %s2024_s30  ;;  %p2028_p1 = scmp.lt.u32.totalorder %s2024_s30, %s3131_s0 }
  0x17   :  { %p2030_p2 = pnand %p2028_p1, %p2025_p0 }
  0x19   :  { %2033 = shalt.err (!%p2030_p2)
}
  0x1a   :  { %s2034_s21 = scalar_lea.vmem %s50_s25, 256  ;;  %p2039_p4 = scmp.lt.s32.totalorder %s50_s25, %s50_s25 }
  0x1b   :  { %p2035_p3 = scmp.ne.s32.totalorder %s50_s25, %s2034_s21  ;;  %p2040_p5 = scmp.lt.s32.totalorder %s2034_s21, %s2034_s21 }
  0x1d   :  { %p2041_p6 = por %p2040_p5, %p2039_p4 }
  0x1f   :  { %p2042_p7 = pnand %p2041_p6, %p2035_p3 }
  0x21   :  { %2045 = shalt.err (!%p2042_p7)
}
  0x22   :  { %s3127_s22 = smov 128   ;;  %s3128_s23 = smov 8  }
  0x23   :  { %55 = dma.hbm_to_vmem [thread:$0]  %s3131_s0, 256, %s50_s25, [#allocation6], %s3127_s22, %s3127_s22, %s3128_s23  }
  0x24   :  { %s2046_s30 = scalar_lea.hbm %s3110_s3, 512 }
  0x25   :  { %p2047_p8 = scmp.ne.s32.totalorder %s3110_s3, %s2046_s30  ;;  %p2050_p9 = scmp.lt.u32.totalorder %s2046_s30, %s3110_s3 }
  0x27   :  { %p2052_p10 = pnand %p2050_p9, %p2047_p8 }
  0x29   :  { %2055 = shalt.err (!%p2052_p10)
}
  0x2a   :  { %s2056_s21 = scalar_lea.vmem %s2591_s27, 512  ;;  %p2061_p12 = scmp.lt.s32.totalorder %s2591_s27, %s2591_s27 }
  0x2b   :  { %p2057_p11 = scmp.ne.s32.totalorder %s2591_s27, %s2056_s21  ;;  %p2062_p13 = scmp.lt.s32.totalorder %s2056_s21, %s2056_s21 }
  0x2d   :  { %p2063_p0 = por %p2062_p13, %p2061_p12 }
  0x2f   :  { %p2064_p1 = pnand %p2063_p0, %p2057_p11 }
  0x31   :  { %2067 = shalt.err (!%p2064_p1)
}
  0x32   :  { %s2468_s25 = smov 64   ;;  %s2469_s0 = smov 4  }
  0x33   :  { %79 = dma.hbm_to_vmem [thread:$0]  %s3110_s3, 512, %s2591_s27, [#allocation9], %s2468_s25, %s2468_s25, %s2469_s0  }
  0x34   :  { %s2470_s28 = smov [#allocation11]   ;;  %s2068_s19 = scalar_lea.hbm %s3112_s5, 512 }
  0x35   :  { %s97_s29 = sshll.u32 %s2470_s28, 4  ;;  %p2069_p2 = scmp.ne.s32.totalorder %s3112_s5, %s2068_s19  ;;  %s98_s29 = int_to_ptr.vmem [resolvable:$true] %s97_s29 }
  0x36   :  { %p2072_p3 = scmp.lt.u32.totalorder %s2068_s19, %s3112_s5 }
  0x38   :  { %p2074_p4 = pnand %p2072_p3, %p2069_p2 }
  0x3a   :  { %2077 = shalt.err (!%p2074_p4)
}
  0x3b   :  { %s2078_s23 = scalar_lea.vmem %s98_s29, 512  ;;  %p2083_p6 = scmp.lt.s32.totalorder %s98_s29, %s98_s29 }
  0x3c   :  { %p2079_p5 = scmp.ne.s32.totalorder %s98_s29, %s2078_s23  ;;  %p2084_p7 = scmp.lt.s32.totalorder %s2078_s23, %s2078_s23 }
  0x3e   :  { %p2085_p8 = por %p2084_p7, %p2083_p6 }
  0x40   :  { %p2086_p9 = pnand %p2085_p8, %p2079_p5 }
  0x42   :  { %2089 = shalt.err (!%p2086_p9)
}
  0x43   :  { %103 = dma.hbm_to_vmem [thread:$0]  %s3112_s5, 512, %s98_s29, [#allocation12], %s2468_s25, %s2468_s25, %s2469_s0  }
  0x44   :  { %s2471_s24 = smov [#allocation14]   ;;  %s2472_s22 = smov [#allocation17]  }
  0x45   :  { %s121_s26 = sshll.u32 %s2471_s24, 4  ;;  %s145_s28 = sshll.u32 %s2472_s22, 4  ;;  %s122_s26 = int_to_ptr.vmem [resolvable:$true] %s121_s26  ;;  %s146_s28 = int_to_ptr.vmem [resolvable:$true] %s145_s28 }
  0x46   :  { %s2090_s19 = scalar_lea.hbm %s3114_s7, 32 }
  0x47   :  { %p2091_p10 = scmp.ne.s32.totalorder %s3114_s7, %s2090_s19  ;;  %p2094_p11 = scmp.lt.u32.totalorder %s2090_s19, %s3114_s7 }
  0x49   :  { %p2096_p12 = pnand %p2094_p11, %p2091_p10 }
  0x4b   :  { %2099 = shalt.err (!%p2096_p12)
}
  0x4c   :  { %s2100_s5 = scalar_lea.vmem %s122_s26, 32  ;;  %p2105_p0 = scmp.lt.s32.totalorder %s122_s26, %s122_s26 }
  0x4d   :  { %p2101_p13 = scmp.ne.s32.totalorder %s122_s26, %s2100_s5  ;;  %p2106_p1 = scmp.lt.s32.totalorder %s2100_s5, %s2100_s5 }
  0x4f   :  { %p2107_p2 = por %p2106_p1, %p2105_p0 }
  0x51   :  { %p2108_p3 = pnand %p2107_p2, %p2101_p13 }
  0x53   :  { %2111 = shalt.err (!%p2108_p3)
}
  0x54   :  { %s2473_s29 = smov 16   ;;  %s2474_s3 = smov 1  }
  0x55   :  { %127 = dma.hbm_to_vmem [thread:$0]  %s3114_s7, 32, %s122_s26, [#allocation15], %s2473_s29, %s2473_s29, %s2474_s3  }
  0x56   :  { %s2112_s18 = scalar_lea.hbm %s3116_s9, 1536 }
  0x57   :  { %p2113_p4 = scmp.ne.s32.totalorder %s3116_s9, %s2112_s18  ;;  %p2116_p5 = scmp.lt.u32.totalorder %s2112_s18, %s3116_s9 }
  0x59   :  { %p2118_p6 = pnand %p2116_p5, %p2113_p4 }
  0x5b   :  { %2121 = shalt.err (!%p2118_p6)
}
  0x5c   :  { %s2122_s21 = scalar_lea.vmem %s146_s28, 1536  ;;  %p2127_p8 = scmp.lt.s32.totalorder %s146_s28, %s146_s28 }
  0x5d   :  { %p2123_p7 = scmp.ne.s32.totalorder %s146_s28, %s2122_s21  ;;  %p2128_p9 = scmp.lt.s32.totalorder %s2122_s21, %s2122_s21 }
  0x5f   :  { %p2129_p10 = por %p2128_p9, %p2127_p8 }
  0x61   :  { %p2130_p11 = pnand %p2129_p10, %p2123_p7 }
  0x63   :  { %2133 = shalt.err (!%p2130_p11)
}
  0x64   :  { %151 = dma.hbm_to_vmem [thread:$0]  %s3116_s9, 1536, %s146_s28, [#allocation18], %s2468_s25, %s2468_s25, %s2469_s0  }
  0x65   :  { %s2475_s5 = smov [#allocation20]   ;;  %s2476_s24 = smov [#allocation23]  }
  0x66   :  { %s169_s27 = sshll.u32 %s2475_s5, 4  ;;  %s193_s22 = sshll.u32 %s2476_s24, 4  ;;  %s170_s27 = int_to_ptr.vmem [resolvable:$true] %s169_s27  ;;  %s194_s22 = int_to_ptr.vmem [resolvable:$true] %s193_s22 }
  0x67   :  { %s2134_s19 = scalar_lea.hbm %s3118_s11, 6144 }
  0x68   :  { %p2135_p12 = scmp.ne.s32.totalorder %s3118_s11, %s2134_s19  ;;  %p2138_p13 = scmp.lt.u32.totalorder %s2134_s19, %s3118_s11 }
  0x6a   :  { %p2140_p0 = pnand %p2138_p13, %p2135_p12 }
  0x6c   :  { %2143 = shalt.err (!%p2140_p0)
}
  0x6d   :  { %s2144_s9 = scalar_lea.vmem %s170_s27, 6144  ;;  %p2149_p2 = scmp.lt.s32.totalorder %s170_s27, %s170_s27 }
  0x6e   :  { %p2145_p1 = scmp.ne.s32.totalorder %s170_s27, %s2144_s9  ;;  %p2150_p3 = scmp.lt.s32.totalorder %s2144_s9, %s2144_s9 }
  0x70   :  { %p2151_p4 = por %p2150_p3, %p2149_p2 }
  0x72   :  { %p2152_p5 = pnand %p2151_p4, %p2145_p1 }
  0x74   :  { %2155 = shalt.err (!%p2152_p5)
}
  0x75   :  { %175 = dma.hbm_to_vmem [thread:$0]  %s3118_s11, 6144, %s170_s27, [#allocation21], %s2468_s25, %s2468_s25, %s2469_s0  }
  0x76   :  { %s2156_s24 = scalar_lea.hbm %s3120_s13, 32 }
  0x77   :  { %p2157_p6 = scmp.ne.s32.totalorder %s3120_s13, %s2156_s24  ;;  %p2160_p7 = scmp.lt.u32.totalorder %s2156_s24, %s3120_s13 }
  0x79   :  { %p2162_p8 = pnand %p2160_p7, %p2157_p6 }
  0x7b   :  { %2165 = shalt.err (!%p2162_p8)
}
  0x7c   :  { %s2166_s1 = scalar_lea.vmem %s194_s22, 32  ;;  %p2171_p10 = scmp.lt.s32.totalorder %s194_s22, %s194_s22 }
  0x7d   :  { %p2167_p9 = scmp.ne.s32.totalorder %s194_s22, %s2166_s1  ;;  %p2172_p11 = scmp.lt.s32.totalorder %s2166_s1, %s2166_s1 }
  0x7f   :  { %p2173_p12 = por %p2172_p11, %p2171_p10 }
  0x81   :  { %p2174_p13 = pnand %p2173_p12, %p2167_p9 }
  0x83   :  { %2177 = shalt.err (!%p2174_p13)
}
  0x84   :  { %199 = dma.hbm_to_vmem [thread:$0]  %s3120_s13, 32, %s194_s22, [#allocation24], %s2473_s29, %s2473_s29, %s2474_s3  }
  0x85   :  { %s2477_s20 = smov [#allocation26]   ;;  %s2478_s9 = smov [#allocation2]  }
  0x86   :  { %s217_s21 = sshll.u32 %s2477_s20, 4  ;;  %s37_s28 = sshll.u32 %s2478_s9, 4  ;;  %s218_s21 = int_to_ptr.vmem [resolvable:$true] %s217_s21  ;;  %s38_s28 = int_to_ptr.vmem [resolvable:$true] %s37_s28 }
  0x87   :  { %s2178_s5 = scalar_lea.hbm %s3122_s15, 256 }
  0x88   :  { %p2179_p0 = scmp.ne.s32.totalorder %s3122_s15, %s2178_s5  ;;  %p2182_p1 = scmp.lt.u32.totalorder %s2178_s5, %s3122_s15 }
  0x8a   :  { %p2184_p2 = pnand %p2182_p1, %p2179_p0 }
  0x8c   :  { %2187 = shalt.err (!%p2184_p2)
}
  0x8d   :  { %s2188_s13 = scalar_lea.vmem %s218_s21, 256  ;;  %p2193_p4 = scmp.lt.s32.totalorder %s218_s21, %s218_s21 }
  0x8e   :  { %p2189_p3 = scmp.ne.s32.totalorder %s218_s21, %s2188_s13  ;;  %p2194_p5 = scmp.lt.s32.totalorder %s2188_s13, %s2188_s13 }
  0x90   :  { %p2195_p6 = por %p2194_p5, %p2193_p4 }
  0x92   :  { %p2196_p7 = pnand %p2195_p6, %p2189_p3 }
  0x94   :  { %2199 = shalt.err (!%p2196_p7)
}
  0x95   :  { %223 = dma.hbm_to_vmem [thread:$0]  %s3122_s15, 256, %s218_s21, [#allocation27], %s2468_s25, %s2468_s25, %s2469_s0  }
  0x96   :  { %s3132_s27 = sld [smem:[#allocation40_spill]] }
  0x9c   :  { %s2200_s20 = scalar_lea.hbm %s3132_s27, 256 }
  0x9d   :  { %p2201_p8 = scmp.ne.s32.totalorder %s3132_s27, %s2200_s20  ;;  %p2204_p9 = scmp.lt.u32.totalorder %s2200_s20, %s3132_s27 }
  0x9f   :  { %p2206_p10 = pnand %p2204_p9, %p2201_p8 }
  0xa1   :  { %2209 = shalt.err (!%p2206_p10)
}
  0xa2   :  { %s2210_s24 = scalar_lea.vmem %s38_s28, 256  ;;  %p2215_p12 = scmp.lt.s32.totalorder %s38_s28, %s38_s28 }
  0xa3   :  { %p2211_p11 = scmp.ne.s32.totalorder %s38_s28, %s2210_s24  ;;  %p2216_p13 = scmp.lt.s32.totalorder %s2210_s24, %s2210_s24 }
  0xa5   :  { %p2217_p0 = por %p2216_p13, %p2215_p12 }
  0xa7   :  { %p2218_p1 = pnand %p2217_p0, %p2211_p11 }
  0xa9   :  { %2221 = shalt.err (!%p2218_p1)
}
  0xaa   :  { %s3133_s15 = smov 8   ;;  %s3134_s25 = smov 128  }
  0xab   :  { %43 = dma.hbm_to_vmem [thread:$0]  %s3132_s27, 256, %s38_s28, [#allocation3], %s3134_s25, %s3134_s25, %s3133_s15  }
  0xac   :  { %s2479_s30 = smov [#allocation7]   ;;  %s2480_s19 = smov [#allocation10]  }
  0xad   :  { %s61_s18 = sshll.u32 %s2479_s30, 4  ;;  %s85_s13 = sshll.u32 %s2480_s19, 4  ;;  %s62_s18 = int_to_ptr.vmem [resolvable:$true] %s61_s18  ;;  %s86_s13 = int_to_ptr.vmem [resolvable:$true] %s85_s13 }
  0xae   :  { %s2222_s1 = scalar_lea.hbm %s3109_s2, 32 }
  0xaf   :  { %p2223_p2 = scmp.ne.s32.totalorder %s3109_s2, %s2222_s1  ;;  %p2226_p3 = scmp.lt.u32.totalorder %s2222_s1, %s3109_s2 }
  0xb1   :  { %p2228_p4 = pnand %p2226_p3, %p2223_p2 }
  0xb3   :  { %2231 = shalt.err (!%p2228_p4)
}
  0xb4   :  { %s2232_s28 = scalar_lea.vmem %s62_s18, 32  ;;  %p2237_p6 = scmp.lt.s32.totalorder %s62_s18, %s62_s18 }
  0xb5   :  { %p2233_p5 = scmp.ne.s32.totalorder %s62_s18, %s2232_s28  ;;  %p2238_p7 = scmp.lt.s32.totalorder %s2232_s28, %s2232_s28 }
  0xb7   :  { %p2239_p8 = por %p2238_p7, %p2237_p6 }
  0xb9   :  { %p2240_p9 = pnand %p2239_p8, %p2233_p5 }
  0xbb   :  { %2243 = shalt.err (!%p2240_p9)
}
  0xbc   :  { %67 = dma.hbm_to_vmem [thread:$0]  %s3109_s2, 32, %s62_s18, [#allocation6], %s2473_s29, %s2473_s29, %s2474_s3  }
  0xbd   :  { %s2244_s15 = scalar_lea.hbm %s3111_s4, 32 }
  0xbe   :  { %p2245_p10 = scmp.ne.s32.totalorder %s3111_s4, %s2244_s15  ;;  %p2248_p11 = scmp.lt.u32.totalorder %s2244_s15, %s3111_s4 }
  0xc0   :  { %p2250_p12 = pnand %p2248_p11, %p2245_p10 }
  0xc2   :  { %2253 = shalt.err (!%p2250_p12)
}
  0xc3   :  { %s2254_s19 = scalar_lea.vmem %s86_s13, 32  ;;  %p2259_p0 = scmp.lt.s32.totalorder %s86_s13, %s86_s13 }
  0xc4   :  { %p2255_p13 = scmp.ne.s32.totalorder %s86_s13, %s2254_s19  ;;  %p2260_p1 = scmp.lt.s32.totalorder %s2254_s19, %s2254_s19 }
  0xc6   :  { %p2261_p2 = por %p2260_p1, %p2259_p0 }
  0xc8   :  { %p2262_p3 = pnand %p2261_p2, %p2255_p13 }
  0xca   :  { %2265 = shalt.err (!%p2262_p3)
}
  0xcb   :  { %91 = dma.hbm_to_vmem [thread:$0]  %s3111_s4, 32, %s86_s13, [#allocation9], %s2473_s29, %s2473_s29, %s2474_s3  }
  0xcc   :  { %s2481_s22 = smov [#allocation13]   ;;  %s2482_s1 = smov [#allocation16]  }
  0xcd   :  { %s109_s23 = sshll.u32 %s2481_s22, 4  ;;  %s133_s11 = sshll.u32 %s2482_s1, 4  ;;  %s110_s23 = int_to_ptr.vmem [resolvable:$true] %s109_s23  ;;  %s134_s11 = int_to_ptr.vmem [resolvable:$true] %s133_s11 }
  0xce   :  { %s2266_s7 = scalar_lea.hbm %s3113_s6, 32 }
  0xcf   :  { %p2267_p4 = scmp.ne.s32.totalorder %s3113_s6, %s2266_s7  ;;  %p2270_p5 = scmp.lt.u32.totalorder %s2266_s7, %s3113_s6 }
  0xd1   :  { %p2272_p6 = pnand %p2270_p5, %p2267_p4 }
  0xd3   :  { %2275 = shalt.err (!%p2272_p6)
}
  0xd4   :  { %s2276_s4 = scalar_lea.vmem %s110_s23, 32  ;;  %p2281_p8 = scmp.lt.s32.totalorder %s110_s23, %s110_s23 }
  0xd5   :  { %p2277_p7 = scmp.ne.s32.totalorder %s110_s23, %s2276_s4  ;;  %p2282_p9 = scmp.lt.s32.totalorder %s2276_s4, %s2276_s4 }
  0xd7   :  { %p2283_p10 = por %p2282_p9, %p2281_p8 }
  0xd9   :  { %p2284_p11 = pnand %p2283_p10, %p2277_p7 }
  0xdb   :  { %2287 = shalt.err (!%p2284_p11)
}
  0xdc   :  { %115 = dma.hbm_to_vmem [thread:$0]  %s3113_s6, 32, %s110_s23, [#allocation12], %s2473_s29, %s2473_s29, %s2474_s3  }
  0xdd   :  { %s2288_s0 = scalar_lea.hbm %s3115_s8, 32 }
  0xde   :  { %p2289_p12 = scmp.ne.s32.totalorder %s3115_s8, %s2288_s0  ;;  %p2292_p13 = scmp.lt.u32.totalorder %s2288_s0, %s3115_s8 }
  0xe0   :  { %p2294_p0 = pnand %p2292_p13, %p2289_p12 }
  0xe2   :  { %2297 = shalt.err (!%p2294_p0)
}
  0xe3   :  { %s2298_s18 = scalar_lea.vmem %s134_s11, 32  ;;  %p2303_p2 = scmp.lt.s32.totalorder %s134_s11, %s134_s11 }
  0xe4   :  { %p2299_p1 = scmp.ne.s32.totalorder %s134_s11, %s2298_s18  ;;  %p2304_p3 = scmp.lt.s32.totalorder %s2298_s18, %s2298_s18 }
  0xe6   :  { %p2305_p4 = por %p2304_p3, %p2303_p2 }
  0xe8   :  { %p2306_p5 = pnand %p2305_p4, %p2299_p1 }
  0xea   :  { %2309 = shalt.err (!%p2306_p5)
}
  0xeb   :  { %139 = dma.hbm_to_vmem [thread:$0]  %s3115_s8, 32, %s134_s11, [#allocation15], %s2473_s29, %s2473_s29, %s2474_s3  }
  0xec   :  { %s2483_s23 = smov [#allocation19]   ;;  %s2484_s20 = smov [#allocation22]  }
  0xed   :  { %s157_s1 = sshll.u32 %s2483_s23, 4  ;;  %s181_s9 = sshll.u32 %s2484_s20, 4  ;;  %s158_s1 = int_to_ptr.vmem [resolvable:$true] %s157_s1  ;;  %s182_s9 = int_to_ptr.vmem [resolvable:$true] %s181_s9 }
  0xee   :  { %s2310_s27 = scalar_lea.hbm %s3117_s10, 32 }
  0xef   :  { %p2311_p6 = scmp.ne.s32.totalorder %s3117_s10, %s2310_s27  ;;  %p2314_p7 = scmp.lt.u32.totalorder %s2310_s27, %s3117_s10 }
  0xf1   :  { %p2316_p8 = pnand %p2314_p7, %p2311_p6 }
  0xf3   :  { %2319 = shalt.err (!%p2316_p8)
}
  0xf4   :  { %s2320_s8 = scalar_lea.vmem %s158_s1, 32  ;;  %p2325_p10 = scmp.lt.s32.totalorder %s158_s1, %s158_s1 }
  0xf5   :  { %p2321_p9 = scmp.ne.s32.totalorder %s158_s1, %s2320_s8  ;;  %p2326_p11 = scmp.lt.s32.totalorder %s2320_s8, %s2320_s8 }
  0xf7   :  { %p2327_p12 = por %p2326_p11, %p2325_p10 }
  0xf9   :  { %p2328_p13 = pnand %p2327_p12, %p2321_p9 }
  0xfb   :  { %2331 = shalt.err (!%p2328_p13)
}
  0xfc   :  { %163 = dma.hbm_to_vmem [thread:$0]  %s3117_s10, 32, %s158_s1, [#allocation18], %s2473_s29, %s2473_s29, %s2474_s3  }
  0xfd   :  { %s2332_s0 = scalar_lea.hbm %s3119_s12, 32 }
  0xfe   :  { %p2333_p0 = scmp.ne.s32.totalorder %s3119_s12, %s2332_s0  ;;  %p2336_p1 = scmp.lt.u32.totalorder %s2332_s0, %s3119_s12 }
 0x100   :  { %p2338_p2 = pnand %p2336_p1, %p2333_p0 }
 0x102   :  { %2341 = shalt.err (!%p2338_p2)
}
 0x103   :  { %s2342_s18 = scalar_lea.vmem %s182_s9, 32  ;;  %p2347_p4 = scmp.lt.s32.totalorder %s182_s9, %s182_s9 }
 0x104   :  { %p2343_p3 = scmp.ne.s32.totalorder %s182_s9, %s2342_s18  ;;  %p2348_p5 = scmp.lt.s32.totalorder %s2342_s18, %s2342_s18 }
 0x106   :  { %p2349_p6 = por %p2348_p5, %p2347_p4 }
 0x108   :  { %p2350_p7 = pnand %p2349_p6, %p2343_p3 }
 0x10a   :  { %2353 = shalt.err (!%p2350_p7)
}
 0x10b   :  { %187 = dma.hbm_to_vmem [thread:$0]  %s3119_s12, 32, %s182_s9, [#allocation21], %s2473_s29, %s2473_s29, %s2474_s3  }
 0x10c   :  { %s2485_s22 = smov [#allocation25]   ;;  %s2486_s1 = smov [#allocation28]  }
 0x10d   :  { %s205_s23 = sshll.u32 %s2485_s22, 4  ;;  %s230_s20 = sshll.u32 %s2486_s1, 4  ;;  %s206_s23 = int_to_ptr.vmem [resolvable:$true] %s205_s23  ;;  %s231_s20 = int_to_ptr.vmem [resolvable:$true] %s230_s20 }
 0x10e   :  { %s2354_s27 = scalar_lea.hbm %s3121_s14, 32 }
 0x10f   :  { %p2355_p8 = scmp.ne.s32.totalorder %s3121_s14, %s2354_s27  ;;  %p2358_p9 = scmp.lt.u32.totalorder %s2354_s27, %s3121_s14 }
 0x111   :  { %p2360_p10 = pnand %p2358_p9, %p2355_p8 }
 0x113   :  { %2363 = shalt.err (!%p2360_p10)
}
 0x114   :  { %s2364_s12 = scalar_lea.vmem %s206_s23, 32  ;;  %p2369_p12 = scmp.lt.s32.totalorder %s206_s23, %s206_s23 }
 0x115   :  { %p2365_p11 = scmp.ne.s32.totalorder %s206_s23, %s2364_s12  ;;  %p2370_p13 = scmp.lt.s32.totalorder %s2364_s12, %s2364_s12 }
 0x117   :  { %p2371_p0 = por %p2370_p13, %p2369_p12 }
 0x119   :  { %p2372_p1 = pnand %p2371_p0, %p2365_p11 }
 0x11b   :  { %2375 = shalt.err (!%p2372_p1)
}
 0x11c   :  { %211 = dma.hbm_to_vmem [thread:$0]  %s3121_s14, 32, %s206_s23, [#allocation24], %s2473_s29, %s2473_s29, %s2474_s3  }
 0x11d   :  { %s2376_s15 = scalar_lea.hbm %s3123_s16, 16 }
 0x11e   :  { %p2377_p2 = scmp.ne.s32.totalorder %s3123_s16, %s2376_s15  ;;  %p2380_p3 = scmp.lt.u32.totalorder %s2376_s15, %s3123_s16 }
 0x120   :  { %p2382_p4 = pnand %p2380_p3, %p2377_p2 }
 0x122   :  { %2385 = shalt.err (!%p2382_p4)
}
 0x123   :  { %s2386_s19 = scalar_lea.vmem %s231_s20, 16  ;;  %s2390_s2 = scalar_lea.vmem %s231_s20, 32 }
 0x124   :  { %p2387_p5 = scmp.ne.s32.totalorder %s231_s20, %s2386_s19  ;;  %p2391_p6 = scmp.lt.s32.totalorder %s231_s20, %s231_s20 }
 0x125   :  { %p2392_p7 = scmp.lt.s32.totalorder %s2390_s2, %s2386_s19 }
 0x127   :  { %p2393_p8 = por %p2392_p7, %p2391_p6 }
 0x129   :  { %p2394_p9 = pnand %p2393_p8, %p2387_p5 }
 0x12b   :  { %2397 = shalt.err (!%p2394_p9)
}
 0x12c   :  { %233 = dma.hbm_to_vmem [thread:$0]  %s3123_s16, 16, %s231_s20, [#allocation27]  }
 0x12d   :  { %2432 = dma.done.wait [#allocation3], 256  }
 0x12e   :  { %2433 = vsyncadd [#allocation3], 4294967040 }
 0x12f   :  { %2434 = dma.done.wait [#allocation6], 288  }
 0x130   :  { %2435 = vsyncadd [#allocation6], 4294967008 }
 0x131   :  { %2436 = dma.done.wait [#allocation9], 544  }
 0x132   :  { %2437 = vsyncadd [#allocation9], 4294966752 }
 0x133   :  { %2438 = dma.done.wait [#allocation12], 544  }
 0x134   :  { %2439 = vsyncadd [#allocation12], 4294966752 }
 0x135   :  { %2440 = dma.done.wait [#allocation15], 64  }
 0x136   :  { %2441 = vsyncadd [#allocation15], 4294967232 }
 0x137   :  { %2442 = dma.done.wait [#allocation18], 1568  }
 0x138   :  { %2443 = vsyncadd [#allocation18], 4294965728 }
 0x139   :  { %2444 = dma.done.wait [#allocation21], 6176  }
 0x13a   :  { %2445 = vsyncadd [#allocation21], 4294961120 }
 0x13b   :  { %2446 = dma.done.wait [#allocation24], 64  }
 0x13c   :  { %2447 = vsyncadd [#allocation24], 4294967232 }
 0x13d   :  { %2448 = dma.done.wait [#allocation27], 272  }
 0x13e   :  { %2449 = vsyncadd [#allocation27], 4294967024  ;;  %v2850_v0 = vld [vmem:[#allocation5] sm:$0xff]  ;;  %v2852_v1 = vld [vmem:[#allocation5 + $0x8] sm:$0xff]  ;;  %s2862_s16 = smov 0  }
 0x13f   :  { %v2854_v2 = vld [vmem:[#allocation7] ss:$0 sm:$0xff]  ;;  %v2856_v3 = vld [vmem:[#allocation7 + $0x1] ss:$0 sm:$0xff]  ;;  %v291_v5 = vld [vmem:[#allocation2 + $0x8] sm:$0xff]  }
 0x140   :  { %v290_v4 = vld [vmem:[#allocation2] sm:$0xff]  }
 0x141 LB: > { %v2487_v6 = vmov 0.0   ;;  %vm2488_vm0 = vmmov 0   ;;  %s1710_s3 = sshll.u32 %s2462_s16, 4  ;;  %s1713_s18 = smul.u32 192, %s2462_s16  ;;  %vm328_vm1 = vcmask 261120   ;;  %v300_v9 = vpack.c.bf16 %v2454_v5, %v2458_v4  ;;  %s2462_s16 = sphi %s2862_s16, %s297_s16   ;;  %v2458_v4 = vphi %v290_v4, %v3136_v4   ;;  %v2454_v5 = vphi %v291_v5, %v3135_v5  }
 0x142   : > { %1777 = vmatprep.subr.bf16.mxu1 %v2487_v6  ;;  %1781 = vmatprep.mubr.msk.bf16.mxu1 %vm2488_vm0, %v2487_v6  ;;  %s303_s10 = scalar_lea.vmem [#allocation8], %s1710_s3  ;;  %s2881_s6 = scalar_lea.vmem [#allocation11], %s1710_s3  ;;  %vm394_vm2 = vcmask 130048   ;;  %vm490_vm3 = vcmask 64512   ;;  %vm520_vm4 = vcmask 1043456   ;;  %vm981_vm5 = vcmask 1040384  }
 0x143   : > { %1791 = vmatprep.subr.bf16.mxu0 %v2487_v6  ;;  %1793 = vmatprep.mubr.msk.bf16.mxu0 %vm2488_vm0, %v2487_v6  ;;  %v1963_v7 = vld [vmem:[%s303_s10] sm:$0xff]   ;;  %v1964_v8 = vld [vmem:[%s303_s10 + $0x8] sm:$0xff]   ;;  %s2884_s22 = scalar_lea.vmem [#allocation20], %s1713_s18  ;;  %s308_s23 = scalar_lea.vmem [#allocation10], %s2462_s16  ;;  %vm993_vm6 = vcmask 1045504   ;;  %vm986_vm7 = vcmask 1046528   ;;  %vm1699_vm10 = vmneg %vm981_vm5 }
 0x144   : > { %1778 = vmatpush3.bf16.msra.mxu1 %v1963_v7  ;;  %v1643_v10 = vld [vmem:[%s308_s23] ss:$0 sm:$0xff]  ;;  %s2489_s1 = smov 96   ;;  %s2490_s20 = smov 64   ;;  %vm1001_vm8 = vcmask 523264   ;;  %vm1084_vm9 = vcmask 785408   ;;  %vm1701_vm11 = vmpackc.low %vm1699_vm10, %vm1699_vm10 }
 0x145   : > { %1779 = vmatprep.subr.bf16.mxu1 %v2487_v6  ;;  %s2491_s7 = smov 80   ;;  %s2492_s28 = smov 112  }
 0x146   : > { %s2493_s27 = smov 48   ;;  %s2495_s26 = smov 16  }
 0x147   : > { %s851_s5 = scalar_lea.vmem [#allocation13], %s2462_s16  ;;  %s1712_s4 = smul.u32 48, %s2462_s16 }
 0x148   : > { %1780 = vmatpush3.bf16.msra.mxu1 %v1964_v8  ;;  %s956_s12 = scalar_lea.vmem [#allocation14], %s2462_s16  ;;  %s966_s9 = scalar_lea.vmem [#allocation16], %s2462_s16 }
 0x149   : > { %1785 = vmatprep.subr.bf16.mxu1 %v2487_v6  ;;  %s2987_s13 = scalar_lea.vmem [#allocation17], %s1712_s4  ;;  %s2496_s8 = smov 32  }
 0x14a   : > { %s1040_s11 = scalar_lea.vmem [#allocation19], %s2462_s16  ;;  %s1217_s24 = scalar_lea.vmem [#allocation22], %s2462_s16 }
 0x14b   : > { %1782 = vmatmul.mubr.msk.bf16.vlgmr.msra.gmra.mrb[0].mxu1 %vm328_vm1, %v300_v9  ;;  %s1481_s15 = scalar_lea.vmem [#allocation23], %s2462_s16  ;;  %s1491_s25 = scalar_lea.vmem [#allocation25], %s2462_s16 }
 0x14c   : > { %1787 = vmatprep.mubr.msk.bf16.mxu1 %vm2488_vm0, %v2487_v6  ;;  %s297_s16 = sadd.s32 1, %s2462_s16  }
 0x14d   : > { %p294_p10 = scmp.ge.s32.totalorder %s297_s16, 2  }
 0x14e   :  { %vm2499_vm12 = vmmov (%p294_p10), 0   ;;  %s2500_s0 = smov (%p294_p10), [#allocation29]  }
 0x14f   :  { %s1594_s21 = sshll.u32 (%p294_p10), %s2500_s0, 4  ;;  %s1595_s21 = int_to_ptr.vmem [resolvable:$true] %s1594_s21 }
 0x150   :  { %s2398_s30 = scalar_lea.vmem (%p294_p10), %s1595_s21, 256  ;;  %p2403_p12 = scmp.lt.s32.totalorder (%p294_p10), %s1595_s21, %s1595_s21 }
 0x151   :  { %p2399_p11 = scmp.ne.s32.totalorder (%p294_p10), %s1595_s21, %s2398_s30  ;;  %p2404_p13 = scmp.lt.s32.totalorder (%p294_p10), %s2398_s30, %s2398_s30 }
 0x153   :  { %p2405_p0 = por (%p294_p10), %p2404_p13, %p2403_p12 }
 0x155   :  { %p2406_p1 = pnand (%p294_p10), %p2405_p0, %p2399_p11 }
 0x21e   : > { %v366_v11 = vpop.f32.mrb[0].mxu1 }
 0x21f   : > { %v367_v12 = vadd.f32 %v1643_v10, %v366_v11  ;;  %v1783_v13 = vpop.f32.mrb[1].mxu1 }
 0x220   : > { %v369_v14 = vpop.f32.mrb[2].mxu1 }
 0x221   : > { %v2893_v15 = vpack.c.bf16 %v367_v12, %v367_v12  ;;  %v370_v16 = vadd.f32 %v1643_v10, %v369_v14  ;;  %v1784_v17 = vpop.f32.mrb[3].mxu1  ;;  %v373_v21 = vmul.f32 0.25, %v367_v12 }
 0x223   : > { %392 = vrot.lane.b32.xlu0 %v2893_v15, %s2489_s1  ;;  %v2896_v18 = vpack.c.bf16 %v370_v16, %v370_v16  ;;  %v375_v24 = vpack.c.bf16 %v373_v21, %v373_v21  ;;  %v374_v25 = vmul.f32 0.25, %v370_v16 }
 0x225   : > { %v376_v26 = vpack.c.bf16 %v374_v25, %v374_v25 }
 0x227   : > { %442 = vrot.lane.b32.xlu0 %v2896_v18, %s2489_s1 }
 0x295   : > { %v393_v19 = vpop.permute.xlu0 %392 }
 0x296   : > { %v399_v20 = vsel %vm394_vm2, %v393_v19, 0 }
 0x297   : > { %1786 = vmatpush3.bf16.xpose.msra.mxu1 %v399_v20 }
 0x298   : > { %1797 = vmatprep.subr.bf16.mxu1 %v2487_v6 }
 0x299   : > { %v443_v22 = vpop.permute.xlu0 %442 }
 0x29a   : > { %v448_v23 = vsel %vm394_vm2, %v443_v22, 0 }
 0x29b   : > { %1792 = vmatpush3.bf16.xpose.msra.mxu0 %v448_v23 }
 0x29c   : > { %1803 = vmatprep.subr.bf16.mxu0 %v2487_v6 }
 0x29e   : > { %1788 = vmatmul.mubr.msk.bf16.vlgmr.msra.gmra.mrb[4].mxu1 %vm394_vm2, %v375_v24 }
 0x29f   : > { %1799 = vmatprep.mubr.msk.bf16.mxu1 %vm2488_vm0, %v2487_v6 }
 0x2a2   : > { %1794 = vmatmul.mubr.msk.bf16.vlgmr.msra.gmra.mrb[0].mxu0 %vm394_vm2, %v376_v26 }
 0x2a3   : > { %1805 = vmatprep.mubr.msk.bf16.mxu0 %vm2488_vm0, %v2487_v6 }
 0x371   : > { %v435_v27 = vpop.f32.mrb[4].mxu1 }
 0x372   : > { %v436_v28 = vadd.f32 %v2854_v2, %v435_v27  ;;  %v1789_v29 = vpop.f32.mrb[5].mxu1 }
 0x373   : > { %v438_v30 = vpop.f32.mrb[6].mxu1 }
 0x374   : > { %v1790_v31 = vpop.f32.mrb[7].mxu1  ;;  %v491_v32 = vsel %vm490_vm3, %v436_v28, -inf }
 0x375   : > { %v484_v33 = vpop.f32.mrb[0].mxu0  ;;  %492 = vmax.xlane.f32.xlu1 %v491_v32 }
 0x376   : > { %v485_v34 = vadd.f32 %v2856_v3, %v484_v33  ;;  %v1795_v35 = vpop.f32.mrb[1].mxu0 }
 0x377   : > { %v487_v36 = vpop.f32.mrb[2].mxu0 }
 0x378   : > { %v1796_v37 = vpop.f32.mrb[3].mxu0  ;;  %v494_v38 = vsel %vm490_vm3, %v485_v34, -inf }
 0x379   : > { %495 = vmax.xlane.f32.xlu1 %v494_v38 }
 0x38a   : > { %515 = vrot.lane.b32.xlu1 %v2893_v15, %s2490_s20 }
 0x38e   : > { %564 = vrot.lane.b32.xlu1 %v2896_v18, %s2490_s20 }
 0x392   : > { %615 = vrot.lane.b32.xlu1 %v2893_v15, %s2491_s7 }
 0x402   : > { %v493_v39 = vpop.xlane.xlu1 %492 }
 0x403   : > { %v497_v40 = vsub.f32 %v436_v28, %v493_v39 }
 0x405   : > { %v499_v41 = vmul.f32 1.442695, %v497_v40 }
 0x406   : > { %v496_v42 = vpop.xlane.xlu1 %495 }
 0x407   : > { %1997 = vpow2.f32 %v499_v41  ;;  %v498_v43 = vsub.f32 %v485_v34, %v496_v42 }
 0x409   : > { %v501_v44 = vmul.f32 1.442695, %v498_v43 }
 0x40a   : > { %v516_v45 = vpop.permute.xlu1 %515 }
 0x40b   : > { %1999 = vpow2.f32 %v501_v44  ;;  %v522_v46 = vsel %vm520_vm4, %v516_v45, 0 }
 0x40c   : > { %1798 = vmatpush3.bf16.msra.mxu1 %v522_v46 }
 0x40d   : > { %1809 = vmatprep.subr.bf16.mxu1 %v2487_v6 }
 0x40e   : > { %v565_v47 = vpop.permute.xlu1 %564 }
 0x40f   : > { %v570_v48 = vsel %vm520_vm4, %v565_v47, 0 }
 0x410   : > { %1804 = vmatpush3.bf16.msra.mxu0 %v570_v48 }
 0x411   : > { %v1998_v49 = vpop.eup %1997  ;;  %1815 = vmatprep.subr.bf16.mxu0 %v2487_v6 }
 0x412   : > { %v503_v50 = vsel %vm490_vm3, %v1998_v49, 0.0  ;;  %v616_v53 = vpop.permute.xlu1 %615 }
 0x413   : > { %504 = vadd.xlane.f32.xlu0 %v503_v50  ;;  %v621_v60 = vsel %vm394_vm2, %v616_v53, 0  ;;  %v1966_v53 = vld [vmem:[%s2881_s6 + $0x8] sm:$0xff]  }
 0x415   : > { %v2000_v51 = vpop.eup %1999 }
 0x416   : > { %v506_v52 = vsel %vm490_vm3, %v2000_v51, 0.0 }
 0x417   : > { %507 = vadd.xlane.f32.xlu1 %v506_v52  ;;  %v1965_v52 = vld [vmem:[%s2881_s6] sm:$0xff]  }
 0x428   : > { %666 = vrot.lane.b32.xlu1 %v2896_v18, %s2491_s7 }
 0x429   : > { %613 = vrot.lane.b32.xlu0 %v375_v24, %s2492_s28 }
 0x42c   : > { %664 = vrot.lane.b32.xlu1 %v376_v26, %s2492_s28 }
 0x4a0   : > { %v505_v54 = vpop.xlane.xlu0 %504 }
 0x4a1   : > { %2001 = vrcp.f32 %v505_v54 }
 0x4a4   : > { %v508_v55 = vpop.xlane.xlu1 %507  ;;  %v614_v8 = vpop.permute.xlu0 %613 }
 0x4a5   : > { %2003 = vrcp.f32 %v508_v55  ;;  %v2494_v55 = vmov 0  }
 0x4a6   : > { %1951 = vset.pattern.permute.xlu1 %v2494_v55  ;;  %1952 = vset.pattern.permute.xlu0 %v2494_v55 }
 0x4a8   : > { %v667_v62 = vpop.permute.xlu1 %666 }
 0x4a9   : > { %v672_v7 = vsel %vm394_vm2, %v667_v62, 0 }
 0x4ab   : > { %v2002_v56 = vpop.eup %2001 }
 0x4ac   : > { %v511_v57 = vmul.f32 %v2002_v56, %v1998_v49  ;;  %v665_v9 = vpop.permute.xlu1 %664 }
 0x4ae   : > { %v513_v58 = vpack.c.bf16 %v511_v57, %v511_v57 }
 0x4af   : > { %v2004_v59 = vpop.eup %2003 }
 0x4b0   : > { %v512_v61 = vmul.f32 %v2004_v59, %v2000_v51  ;;  %1800 = vmatmul.mubr.msk.bf16.vlgmr.msra.gmra.mrb[8].mxu1 %vm490_vm3, %v513_v58 }
 0x4b1   : > { %1810 = vmatpush3.bf16.xpose.msra.mxu1 %v621_v60  ;;  %1811 = vmatprep.mubr.msk.bf16.mxu1 %vm2488_vm0, %v2487_v6 }
 0x4b2   : > { %v514_v63 = vpack.c.bf16 %v512_v61, %v512_v61  ;;  %1821 = vmatprep.subr.bf16.mxu1 %v2487_v6 }
 0x4b4   : > { %1806 = vmatmul.mubr.msk.bf16.vlgmr.msra.gmra.mrb[4].mxu0 %vm490_vm3, %v514_v63 }
 0x4b5   : > { %1816 = vmatpush3.bf16.xpose.msra.mxu0 %v672_v7  ;;  %1817 = vmatprep.mubr.msk.bf16.mxu0 %vm2488_vm0, %v2487_v6 }
 0x4b6   : > { %1827 = vmatprep.subr.bf16.mxu0 %v2487_v6 }
 0x4b8   : > { %1812 = vmatmul.mubr.msk.bf16.vlgmr.msra.gmra.mrb[12].mxu1 %vm394_vm2, %v614_v8 }
 0x4b9   : > { %1823 = vmatprep.mubr.msk.bf16.mxu1 %vm2488_vm0, %v2487_v6 }
 0x4bc   : > { %1818 = vmatmul.mubr.msk.bf16.vlgmr.msra.gmra.mrb[8].mxu0 %vm394_vm2, %v665_v9 }
 0x4bd   : > { %1829 = vmatprep.mubr.msk.bf16.mxu0 %vm2488_vm0, %v2487_v6 }
 0x583   : > { %v2941_v10 = vpop.f32.mrb[8].mxu1 }
 0x584   : > { %v1801_v11 = vpop.f32.mrb[9].mxu1 }
 0x585   : > { %v561_v12 = vpop.f32.mrb[10].mxu1 }
 0x586   : > { %v1802_v13 = vpop.f32.mrb[11].mxu1 }
 0x587   : > { %v2943_v14 = vpop.f32.mrb[4].mxu0 }
 0x588   : > { %v1807_v16 = vpop.f32.mrb[5].mxu0 }
 0x589   : > { %v609_v17 = vpop.f32.mrb[6].mxu0  ;;  %v1658_v16 = vld [vmem:[%s851_s5] ss:$0 sm:$0xff] }
 0x58a   : > { %v1808_v19 = vpop.f32.mrb[7].mxu0 }
 0x58b   : > { %v657_v20 = vpop.f32.mrb[12].mxu1 }
 0x58c   : > { %v658_v21 = vadd.f32 %v2854_v2, %v657_v20  ;;  %v1813_v22 = vpop.f32.mrb[13].mxu1  ;;  %v1706_v2 = vld [vmem:[#allocation28] ss:$0 sm:$0xff] (%p294_p10) }
 0x58d   : > { %v660_v23 = vpop.f32.mrb[14].mxu1 }
 0x58e   : > { %v1814_v24 = vpop.f32.mrb[15].mxu1  ;;  %v714_v25 = vsel %vm490_vm3, %v658_v21, -inf }
 0x58f   : > { %v708_v26 = vpop.f32.mrb[8].mxu0  ;;  %715 = vmax.xlane.f32.xlu1 %v714_v25 }
 0x590   : > { %v709_v27 = vadd.f32 %v2856_v3, %v708_v26  ;;  %v1819_v28 = vpop.f32.mrb[9].mxu0 }
 0x591   : > { %v711_v29 = vpop.f32.mrb[10].mxu0 }
 0x592   : > { %v1820_v30 = vpop.f32.mrb[11].mxu0  ;;  %v717_v31 = vsel %vm490_vm3, %v709_v27, -inf }
 0x593   : > { %718 = vmax.xlane.f32.xlu0 %v717_v31 }
 0x5a9   : > { %786 = vrot.lane.b32.xlu0 %v2896_v18, %s2493_s27 }
 0x5ad   : > { %922 = vperm.xlu0 %1952, %v2852_v1  }
 0x61c   : > { %v716_v32 = vpop.xlane.xlu1 %715 }
 0x61d   : > { %v720_v33 = vsub.f32 %v658_v21, %v716_v32 }
 0x61f   : > { %v722_v34 = vmul.f32 1.442695, %v720_v33 }
 0x620   : > { %v719_v35 = vpop.xlane.xlu0 %718 }
 0x621   : > { %2005 = vpow2.f32 %v722_v34  ;;  %v721_v36 = vsub.f32 %v709_v27, %v719_v35 }
 0x623   : > { %v724_v37 = vmul.f32 1.442695, %v721_v36 }
 0x624   : > { %v787_v38 = vpop.permute.xlu0 %786 }
 0x625   : > { %2007 = vpow2.f32 %v724_v37  ;;  %v792_v39 = vsel %vm520_vm4, %v787_v38, 0 }
 0x626   : > { %1828 = vmatpush3.bf16.msra.mxu0 %v792_v39  ;;  %v1968_v39 = vld [vmem:[%s2987_s13 + $0x8] sm:$0xff]  }
 0x627   : > { %1841 = vmatprep.subr.bf16.mxu0 %v2487_v6 }
 0x62b   : > { %v2006_v40 = vpop.eup %2005 }
 0x62c   : > { %v726_v41 = vsel %vm490_vm3, %v2006_v40, 0.0  ;;  %v2976_v23 = vpop.permute.xlu0 %922 }
 0x62d   : > { %727 = vadd.xlane.f32.xlu1 %v726_v41  ;;  %v1970_v41 = vld [vmem:[%s2987_s13 + $0x18] sm:$0xff]  }
 0x62f   : > { %v2008_v42 = vpop.eup %2007 }
 0x630   : > { %v729_v18 = vsel %vm490_vm3, %v2008_v42, 0.0 }
 0x631   : > { %730 = vadd.xlane.f32.xlu1 %v729_v18 }
 0x642   : > { %738 = vrot.lane.b32.xlu1 %v2893_v15, %s2493_s27 }
 0x6ba   : > { %v728_v43 = vpop.xlane.xlu1 %727 }
 0x6bb   : > { %2009 = vrcp.f32 %v728_v43 }
 0x6be   : > { %v731_v44 = vpop.xlane.xlu1 %730 }
 0x6bf   : > { %2011 = vrcp.f32 %v731_v44 }
 0x6c2   : > { %v739_v45 = vpop.permute.xlu1 %738 }
 0x6c3   : > { %v744_v46 = vsel %vm520_vm4, %v739_v45, 0 }
 0x6c4   : > { %1822 = vmatpush3.bf16.msra.mxu1 %v744_v46 }
 0x6c5   : > { %v2010_v47 = vpop.eup %2009  ;;  %1833 = vmatprep.subr.bf16.mxu1 %v2487_v6 }
 0x6c6   : > { %v734_v48 = vmul.f32 %v2010_v47, %v2006_v40  ;;  %v1969_v40 = vld [vmem:[%s2987_s13 + $0x10] sm:$0xff]  }
 0x6c8   : > { %v736_v49 = vpack.c.bf16 %v734_v48, %v734_v48 }
 0x6c9   : > { %v2012_v50 = vpop.eup %2011 }
 0x6ca   : > { %v735_v51 = vmul.f32 %v2012_v50, %v2008_v42  ;;  %1824 = vmatmul.mubr.msk.bf16.vlgmr.msra.gmra.mrb[16].mxu1 %vm490_vm3, %v736_v49  ;;  %v1971_v42 = vld [vmem:[%s2987_s13 + $0x20] sm:$0xff]  }
 0x6cb   : > { %1837 = vmatprep.mubr.msk.bf16.mxu1 %vm2488_vm0, %v2487_v6  ;;  %1834 = vmatpush3.bf16.msra.mxu1 %v1965_v52  ;;  %v1662_v49 = vld [vmem:[%s956_s12] ss:$0 sm:$0xff] }
 0x6cc   : > { %v737_v15 = vpack.c.bf16 %v735_v51, %v735_v51  ;;  %1835 = vmatprep.subr.bf16.mxu1 %v2487_v6 }
 0x6ce   : > { %1830 = vmatmul.mubr.msk.bf16.vlgmr.msra.gmra.mrb[12].mxu0 %vm490_vm3, %v737_v15  ;;  %v1663_v15 = vld [vmem:[%s966_s9] ss:$0 sm:$0xff] }
 0x6cf   : > { %1853 = vmatprep.mubr.msk.bf16.mxu0 %vm2488_vm0, %v2487_v6  ;;  %1836 = vmatpush3.bf16.msra.mxu1 %v1966_v53 }
 0x79d   : > { %v780_v54 = vpop.f32.mrb[16].mxu1 }
 0x79e   : > { %v1825_v56 = vpop.f32.mrb[17].mxu1 }
 0x79f   : > { %v783_v57 = vpop.f32.mrb[18].mxu1 }
 0x7a0   : > { %v1826_v58 = vpop.f32.mrb[19].mxu1 }
 0x7a1   : > { %v828_v59 = vpop.f32.mrb[12].mxu0  ;;  %v1972_v58 = vld [vmem:[%s2987_s13 + $0x28] sm:$0xff]  }
 0x7a2   : > { %v1946_v60 = vpack.i.bf16 %v828_v59, %v780_v54  ;;  %v1831_v61 = vpop.f32.mrb[13].mxu0 }
 0x7a3   : > { %v831_v62 = vpop.f32.mrb[14].mxu0 }
 0x7a4   : > { %v1832_v63 = vpop.f32.mrb[15].mxu0  ;;  %1947 = vrot.lane.b32.xlu1 %v1946_v60, %s2495_s26 }
 0x7a8   : > { %917 = vperm.xlu1 %1951, %v2850_v0  }
 0x816   : > { %v1948_v7 = vpop.permute.xlu1 %1947 }
 0x817   : > { %v1950_v8 = vunpack.i.h.bf16 %v1948_v7  ;;  %v1949_v9 = vunpack.i.l.bf16 %v1948_v7 }
 0x819   : > { %v843_v11 = vsel %vm394_vm2, %v2943_v14, %v1950_v8  ;;  %v842_v12 = vsel %vm394_vm2, %v2941_v10, %v1949_v9 }
 0x81a   : > { %v844_v13 = vpack.c.bf16 %v843_v11, %v842_v12 }
 0x81c   : > { %1838 = vmatmul.mubr.msk.bf16.vlgmr.msra.gmra.mrb[20].mxu1 %vm328_vm1, %v844_v13 }
 0x827   : > { %v2974_v19 = vpop.permute.xlu1 %917 }
 0x8ef   : > { %v908_v17 = vpop.f32.mrb[20].mxu1 }
 0x8f0   : > { %v909_v20 = vadd.f32 %v1658_v16, %v908_v17  ;;  %v1839_v21 = vpop.f32.mrb[21].mxu1 }
 0x8f1   : > { %v911_v22 = vpop.f32.mrb[22].mxu1  ;;  %v1975_v21 = vld [vmem:[%s2884_s22] sm:$0xff]  }
 0x8f2   : > { %v912_v24 = vadd.f32 %v1658_v16, %v911_v22  ;;  %v1840_v25 = vpop.f32.mrb[23].mxu1  ;;  %v925_v14 = vmul.f32 %v2974_v19, %v909_v20  ;;  %v1973_v16 = vld [vmem:[%s2884_s22 + $0x40] sm:$0xff]  }
 0x8f3   : > { %1743 = vmatprep.subr.bf16.mxu1 %v1973_v16  ;;  %v1976_v25 = vld [vmem:[%s2884_s22 + $0x48] sm:$0xff]  }
 0x8f4   : > { %v927_v26 = vadd.f32 %v2458_v4, %v925_v14  ;;  %v926_v10 = vmul.f32 %v2976_v23, %v912_v24  ;;  %1744 = vmatpush3.bf16.msra.mxu1 %v1975_v21 }
 0x8f5   : > { %1745 = vmatprep.subr.bf16.mxu1 %v1976_v25 }
 0x8f6   : > { %v929_v27 = vsel %vm328_vm1, %v927_v26, 0.0  ;;  %v928_v28 = vadd.f32 %v2454_v5, %v926_v10  ;;  %v1967_v5 = vld [vmem:[%s2987_s13] sm:$0xff]  }
 0x8f7   : > { %930 = vadd.xlane.f32.xlu1 %v929_v27  ;;  %1842 = vmatpush3.bf16.msra.mxu0 %v1967_v5 }
 0x8f8   : > { %v932_v29 = vsel %vm328_vm1, %v928_v28, 0.0  ;;  %1843 = vmatprep.subr.bf16.mxu0 %v2487_v6 }
 0x8f9   : > { %933 = vadd.xlane.f32.xlu0 %v932_v29 }
 0x8fb   : > { %1844 = vmatpush3.bf16.msra.mxu0 %v1968_v39 }
 0x8fc   : > { %1845 = vmatprep.subr.bf16.mxu0 %v2487_v6 }
 0x8ff   : > { %1846 = vmatpush3.bf16.msra.mxu0 %v1969_v40 }
 0x900   : > { %1847 = vmatprep.subr.bf16.mxu0 %v2487_v6 }
 0x903   : > { %1848 = vmatpush3.bf16.msra.mxu0 %v1970_v41 }
 0x904   : > { %1849 = vmatprep.subr.bf16.mxu0 %v2487_v6 }
 0x907   : > { %1850 = vmatpush3.bf16.msra.mxu0 %v1971_v42 }
 0x908   : > { %1851 = vmatprep.subr.bf16.mxu0 %v2487_v6 }
 0x90b   : > { %1852 = vmatpush3.bf16.msra.mxu0 %v1972_v58  ;;  %v1995_v58 = vld [vmem:[%s2884_s22 + $0xb8] sm:$0xff]  }
 0x90c   : > { %1857 = vmatprep.subr.bf16.mxu0 %v2487_v6 }
 0x984   : > { %v931_v30 = vpop.xlane.xlu1 %930 }
 0x985   : > { %v936_v31 = vmul.f32 0.03125, %v931_v30  ;;  %v1978_v30 = vld [vmem:[%s2884_s22 + $0x8] sm:$0xff]  }
 0x986   : > { %v934_v32 = vpop.xlane.xlu0 %933  ;;  %1746 = vmatpush3.bf16.msra.mxu1 %v1978_v30 }
 0x987   : > { %v938_v33 = vsub.f32 %v927_v26, %v936_v31  ;;  %v937_v34 = vmul.f32 0.03125, %v934_v32  ;;  %v1979_v31 = vld [vmem:[%s2884_s22 + $0x50] sm:$0xff]  }
 0x988   : > { %1747 = vmatprep.subr.bf16.mxu1 %v1979_v31  ;;  %v1981_v32 = vld [vmem:[%s2884_s22 + $0x10] sm:$0xff]  }
 0x989   : > { %v939_v35 = vsub.f32 %v928_v28, %v937_v34  ;;  %v940_v36 = vmul.f32 %v938_v33, %v938_v33  ;;  %v1984_v34 = vld [vmem:[%s2884_s22 + $0x18] sm:$0xff]  }
 0x98a   : > { %1748 = vmatpush3.bf16.msra.mxu1 %v1981_v32 }
 0x98b   : > { %v942_v4 = vsel %vm328_vm1, %v940_v36, 0.0  ;;  %v941_v37 = vmul.f32 %v939_v35, %v939_v35 }
 0x98c   : > { %943 = vadd.xlane.f32.xlu1 %v942_v4 }
 0x98d   : > { %v945_v38 = vsel %vm328_vm1, %v941_v37, 0.0 }
 0x98e   : > { %946 = vadd.xlane.f32.xlu0 %v945_v38 }
 0xa19   : > { %v944_v18 = vpop.xlane.xlu1 %943 }
 0xa1a   : > { %v948_v43 = vmul.f32 0.03125, %v944_v18  ;;  %v1974_v18 = vld [vmem:[%s2884_s22 + $0x80] sm:$0xff]  }
 0xa1b   : > { %v947_v44 = vpop.xlane.xlu0 %946 }
 0xa1c   : > { %v950_v45 = vadd.f32 1e-05, %v948_v43  ;;  %v949_v46 = vmul.f32 0.03125, %v947_v44  ;;  %v1977_v44 = vld [vmem:[%s2884_s22 + $0x88] sm:$0xff]  }
 0xa1e   : > { %2013 = vrsqrt.f32 %v950_v45  ;;  %v951_v47 = vadd.f32 1e-05, %v949_v46  ;;  %v1980_v45 = vld [vmem:[%s2884_s22 + $0x90] sm:$0xff]   ;;  %v1983_v46 = vld [vmem:[%s2884_s22 + $0x98] sm:$0xff]  }
 0xa20   : > { %2015 = vrsqrt.f32 %v951_v47  ;;  %v1985_v47 = vld [vmem:[%s2884_s22 + $0x60] sm:$0xff]  }
 0xa28   : > { %v2014_v48 = vpop.eup %2013 }
 0xa29   : > { %v954_v50 = vmul.f32 %v2014_v48, %v938_v33  ;;  %v1982_v33 = vld [vmem:[%s2884_s22 + $0x58] sm:$0xff]   ;;  %v1986_v48 = vld [vmem:[%s2884_s22 + $0xa0] sm:$0xff]  }
 0xa2a   : > { %v2016_v51 = vpop.eup %2015  ;;  %1749 = vmatprep.subr.bf16.mxu1 %v1982_v33 }
 0xa2b   : > { %v964_v52 = vmul.f32 %v1662_v49, %v954_v50  ;;  %v955_v53 = vmul.f32 %v2016_v51, %v939_v35  ;;  %1750 = vmatpush3.bf16.msra.mxu1 %v1984_v34  ;;  %v1988_v50 = vld [vmem:[%s2884_s22 + $0x68] sm:$0xff]  }
 0xa2c   : > { %1751 = vmatprep.subr.bf16.mxu1 %v1985_v47  ;;  %v1989_v51 = vld [vmem:[%s2884_s22 + $0xa8] sm:$0xff]  }
 0xa2d   : > { %v965_v54 = vmul.f32 %v1662_v49, %v955_v53  ;;  %v3001_v55 = vadd.f32 %v1663_v15, %v964_v52  ;;  %v1987_v49 = vld [vmem:[%s2884_s22 + $0x20] sm:$0xff]   ;;  %v1991_v52 = vld [vmem:[%s2884_s22 + $0x70] sm:$0xff]  }
 0xa2e   : > { %v1992_v53 = vld [vmem:[%s2884_s22 + $0xb0] sm:$0xff]  }
 0xa2f   : > { %v3003_v56 = vadd.f32 %v1663_v15, %v965_v54  ;;  %v976_v57 = vmul.f32 %v3001_v55, %v2974_v19  ;;  %1752 = vmatpush3.bf16.msra.mxu1 %v1987_v49  ;;  %v1990_v15 = vld [vmem:[%s2884_s22 + $0x28] sm:$0xff]   ;;  %v1993_v54 = vld [vmem:[%s2884_s22 + $0x30] sm:$0xff]  }
 0xa30   : > { %1753 = vmatprep.subr.bf16.mxu1 %v1988_v50 }
 0xa31   : > { %v977_v59 = vmul.f32 %v3003_v56, %v2976_v23  ;;  %v979_v60 = vrot.slane %v976_v57, 7  ;;  %v1994_v57 = vld [vmem:[%s2884_s22 + $0x78] sm:$0xff]  }
 0xa33   : > { %v982_v61 = vsel %vm981_vm5, 0.0, %v979_v60  ;;  %v983_v62 = vsel %vm981_vm5, %v979_v60, 0.0  ;;  %v1004_v63 = vrot.slane %v977_v59, 7  ;;  %1754 = vmatpush3.bf16.msra.mxu1 %v1990_v15  ;;  %v1996_v59 = vld [vmem:[%s2884_s22 + $0x38] sm:$0xff]   ;;  %v1665_v60 = vld [vmem:[%s1040_s11] ss:$0 sm:$0xff] }
 0xa34   : > { %v994_v7 = vrot.slane %v982_v61, 2  ;;  %v995_v8 = vrot.slane %v983_v62, 2  ;;  %v987_v12 = vrot.slane %v982_v61, 1  ;;  %v988_v13 = vrot.slane %v983_v62, 1  ;;  %1755 = vmatprep.subr.bf16.mxu1 %v1991_v52 }
 0xa35   : > { %v1006_v9 = vsel %vm981_vm5, 0.0, %v1004_v63  ;;  %v1007_v11 = vsel %vm981_vm5, %v1004_v63, 0.0 }
 0xa36   : > { %v1016_v17 = vrot.slane %v1006_v9, 2  ;;  %v1017_v20 = vrot.slane %v1007_v11, 2  ;;  %v1010_v22 = vrot.slane %v1006_v9, 1  ;;  %v1011_v24 = vrot.slane %v1007_v11, 1 }
 0xa37   : > { %v996_v14 = vsel %vm993_vm6, %v994_v7, %v995_v8  ;;  %v989_v27 = vsel %vm986_vm7, %v987_v12, %v988_v13  ;;  %1756 = vmatpush3.bf16.msra.mxu1 %v1993_v54 }
 0xa38   : > { %v1018_v26 = vsel %vm993_vm6, %v1016_v17, %v1017_v20  ;;  %v1012_v28 = vsel %vm986_vm7, %v1010_v22, %v1011_v24  ;;  %1757 = vmatprep.subr.bf16.mxu1 %v1994_v57 }
 0xa39   : > { %v1958_v10 = vpack.i.bf16 %v1018_v26, %v996_v14  ;;  %v1953_v29 = vpack.i.bf16 %v1012_v28, %v989_v27 }
 0xa3b   : > { %1959 = vrot.lane.b32.xlu0 %v1958_v10, %s2490_s20  ;;  %1954 = vrot.lane.b32.xlu1 %v1953_v29, %s2496_s8 }
 0xa3c   : > { %1758 = vmatpush3.bf16.msra.mxu1 %v1996_v59 }
 0xaad   : > { %v1960_v35 = vpop.permute.xlu0 %1959  ;;  %v1955_v37 = vpop.permute.xlu1 %1954 }
 0xaae   : > { %v1962_v36 = vunpack.i.h.bf16 %v1960_v35  ;;  %v1961_v4 = vunpack.i.l.bf16 %v1960_v35  ;;  %v1957_v38 = vunpack.i.h.bf16 %v1955_v37  ;;  %v1956_v5 = vunpack.i.l.bf16 %v1955_v37 }
 0xab0   : > { %v1022_v39 = vsel %vm328_vm1, %v1006_v9, %v1957_v38  ;;  %v1000_v40 = vsel %vm328_vm1, %v982_v61, %v1956_v5 }
 0xab1   : > { %v1023_v41 = vsel %vm1001_vm8, %v1022_v39, %v1962_v36  ;;  %v1002_v42 = vsel %vm1001_vm8, %v1000_v40, %v1961_v4  ;;  %v1674_v39 = vld [vmem:[%s1217_s24] ss:$0 sm:$0xff] }
 0xab2   : > { %v1024_v43 = vpack.c.bf16 %v1023_v41, %v1002_v42 }
 0xab4   : > { %1854 = vmatmul.mubr.msk.bf16.vlgmr.msra.gmra.mrb[16].mxu0 %vm1084_vm9, %v1024_v43 }
 0xab5   : > { %1858 = vmatpush3.bf16.msra.mxu0 %v1974_v18  ;;  %1873 = vmatprep.mubr.msk.bf16.mxu0 %vm2488_vm0, %v2487_v6 }
 0xab6   : > { %1859 = vmatprep.subr.bf16.mxu0 %v2487_v6 }
 0xab9   : > { %1860 = vmatpush3.bf16.msra.mxu0 %v1977_v44 }
 0xaba   : > { %1861 = vmatprep.subr.bf16.mxu0 %v2487_v6 }
 0xabd   : > { %1862 = vmatpush3.bf16.msra.mxu0 %v1980_v45 }
 0xabe   : > { %1863 = vmatprep.subr.bf16.mxu0 %v2487_v6 }
 0xac1   : > { %1864 = vmatpush3.bf16.msra.mxu0 %v1983_v46 }
 0xac2   : > { %1865 = vmatprep.subr.bf16.mxu0 %v2487_v6 }
 0xac5   : > { %1866 = vmatpush3.bf16.msra.mxu0 %v1986_v48 }
 0xac6   : > { %1867 = vmatprep.subr.bf16.mxu0 %v2487_v6 }
 0xac9   : > { %1868 = vmatpush3.bf16.msra.mxu0 %v1989_v51 }
 0xaca   : > { %1869 = vmatprep.subr.bf16.mxu0 %v2487_v6 }
 0xacd   : > { %1870 = vmatpush3.bf16.msra.mxu0 %v1992_v53 }
 0xace   : > { %1871 = vmatprep.subr.bf16.mxu0 %v2487_v6 }
 0xad1   : > { %1872 = vmatpush3.bf16.msra.mxu0 %v1995_v58 }
 0xb87   : > { %v1122_v61 = vpop.f32.mrb[16].mxu0 }
 0xb88   : > { %v1123_v62 = vadd.f32 %v1665_v60, %v1122_v61  ;;  %v1855_v63 = vpop.f32.mrb[17].mxu0 }
 0xb89   : > { %v1125_v7 = vpop.f32.mrb[18].mxu0 }
 0xb8a   : > { %v1129_v8 = vmax.f32 %v1123_v62, 0.0  ;;  %v1126_v9 = vadd.f32 %v1665_v60, %v1125_v7  ;;  %v1856_v11 = vpop.f32.mrb[19].mxu0 }
 0xb8c   : > { %v1131_v12 = vmul.f32 %v1129_v8, %v2974_v19  ;;  %v1130_v13 = vmax.f32 %v1126_v9, 0.0 }
 0xb8e   : > { %v1134_v16 = vrot.slane %v1131_v12, 7  ;;  %v1132_v6 = vmul.f32 %v1130_v13, %v2976_v23 }
 0xb90   : > { %v1136_v17 = vsel %vm981_vm5, 0.0, %v1134_v16  ;;  %v1137_v20 = vsel %vm981_vm5, %v1134_v16, 0.0  ;;  %v1149_v21 = vrot.slane %v1132_v6, 7 }
 0xb91   : > { %v1140_v22 = vrot.slane %v1136_v17, 1  ;;  %v1141_v24 = vrot.slane %v1137_v20, 1  ;;  %v1144_v25 = vrot.slane %v1136_v17, 2  ;;  %v1145_v14 = vrot.slane %v1137_v20, 2  ;;  %v1705_v20 = vld [vmem:[%s1491_s25] ss:$0 sm:$0xff] }
 0xb92   : > { %v1151_v26 = vsel %vm981_vm5, 0.0, %v1149_v21  ;;  %v1152_v10 = vsel %vm981_vm5, %v1149_v21, 0.0  ;;  %v1702_v27 = vpack.c.bf16 %v1149_v21, %v1134_v16  ;;  %v1704_v16 = vld [vmem:[%s1481_s15] ss:$0 sm:$0xff] }
 0xb93   : > { %v1155_v28 = vrot.slane %v1151_v26, 1  ;;  %v1156_v29 = vrot.slane %v1152_v10, 1  ;;  %v1159_v30 = vrot.slane %v1151_v26, 2  ;;  %v1160_v31 = vrot.slane %v1152_v10, 2  ;;  %v2022_v10 = vld [vmem:[#allocation26] sm:$0xff] (%p294_p10)  }
 0xb94   : > { %v1142_v32 = vsel %vm986_vm7, %v1140_v22, %v1141_v24  ;;  %v1146_v34 = vsel %vm993_vm6, %v1144_v25, %v1145_v14  ;;  %v2497_v26 = vmov (%p294_p10), 0  }
 0xb95   : > { %v1157_v33 = vsel %vm986_vm7, %v1155_v28, %v1156_v29  ;;  %v1161_v35 = vsel %vm993_vm6, %v1159_v30, %v1160_v31  ;;  %2021 = vset.pattern.permute.xlu0 (%p294_p10), %v2497_v26  ;;  %v2023_v28 = vld [vmem:[#allocation26 + $0x8] sm:$0xff] (%p294_p10)  }
 0xb96   : > { %v1164_v36 = vpack.c.bf16 %v1157_v33, %v1142_v32  ;;  %v1165_v4 = vpack.c.bf16 %v1161_v35, %v1146_v34 }
 0xb98   : > { %1401 = vmatprep.mubr.bf16.mxu1 %v1164_v36  ;;  %1874 = vmatmul.mubr.bf16.vlgmr.msra.gmra.mrb[20].mxu0 %v1165_v4 }
 0xb99   : > { %1703 = vmatmul.mubr.msk.bf16.vlgmr.msra.gmra.mrb[24].mxu1 %vm1701_vm11, %v1702_v27  ;;  %v2498_v27 = vmov (%p294_p10), 0.0  }
 0xb9a   :  { %1877 = vmatprep.subr.bf16.mxu0 (%p294_p10), %v2498_v27  ;;  %1881 = vmatprep.mubr.msk.bf16.mxu0 (%p294_p10), %vm2499_vm12, %v2498_v27 }
 0xb9b   :  { %1878 = vmatpush3.bf16.msra.mxu0 (%p294_p10), %v2022_v10 }
 0xb9c   :  { %1879 = vmatprep.subr.bf16.mxu0 (%p294_p10), %v2498_v27 }
 0xb9f   :  { %1880 = vmatpush3.bf16.msra.mxu0 (%p294_p10), %v2023_v28 }
 0xc6b   : > { %v1444_v37 = vpop.f32.mrb[20].mxu0 }
 0xc6c   : > { %v1759_v38 = vpop.f32.mrb[24].mxu1  ;;  %v1875_v5 = vpop.f32.mrb[21].mxu0 }
 0xc6d   : > { %v1760_v40 = vpop.f32.mrb[25].mxu1  ;;  %v1447_v41 = vpop.f32.mrb[22].mxu0 }
 0xc6e   : > { %v1761_v42 = vadd.f32 %v1760_v40, %v1759_v38  ;;  %v1762_v18 = vpop.f32.mrb[26].mxu1  ;;  %v1876_v43 = vpop.f32.mrb[23].mxu0 }
 0xc6f   : > { %v1763_v44 = vpop.f32.mrb[27].mxu1 }
 0xc70   : > { %v1404_v45 = vadd.f32 %v1761_v42, %v1674_v39  ;;  %v1764_v46 = vadd.f32 %v1763_v44, %v1762_v18 }
 0xc72   : > { %v1445_v47 = vadd.f32 %v1444_v37, %v1404_v45  ;;  %v1407_v48 = vadd.f32 %v1764_v46, %v1674_v39 }
 0xc74   : > { %v1448_v49 = vadd.f32 %v1447_v41, %v1407_v48  ;;  %v1451_v50 = vmul.f32 %v1445_v47, %v2974_v19 }
 0xc76   : > { %v1453_v51 = vadd.f32 %v1451_v50, %v3001_v55  ;;  %v1452_v15 = vmul.f32 %v1448_v49, %v2976_v23 }
 0xc78   : > { %v1455_v52 = vsel %vm328_vm1, %v1453_v51, 0.0  ;;  %v1454_v53 = vadd.f32 %v1452_v15, %v3003_v56 }
 0xc79   : > { %1456 = vadd.xlane.f32.xlu1 %v1455_v52 }
 0xc7a   : > { %v1458_v54 = vsel %vm328_vm1, %v1454_v53, 0.0 }
 0xc7b   : > { %1459 = vadd.xlane.f32.xlu0 %v1458_v54 }
 0xd06   : > { %v1457_v57 = vpop.xlane.xlu1 %1456 }
 0xd07   : > { %v1461_v58 = vmul.f32 0.03125, %v1457_v57 }
 0xd08   : > { %v1460_v59 = vpop.xlane.xlu0 %1459 }
 0xd09   : > { %v1463_v60 = vsub.f32 %v1453_v51, %v1461_v58  ;;  %v1462_v61 = vmul.f32 0.03125, %v1460_v59 }
 0xd0b   : > { %v1464_v62 = vsub.f32 %v1454_v53, %v1462_v61  ;;  %v1465_v19 = vmul.f32 %v1463_v60, %v1463_v60 }
 0xd0d   : > { %v1467_v55 = vsel %vm328_vm1, %v1465_v19, 0.0  ;;  %v1466_v63 = vmul.f32 %v1464_v62, %v1464_v62 }
 0xd0e   : > { %1468 = vadd.xlane.f32.xlu1 %v1467_v55 }
 0xd0f   : > { %v1470_v23 = vsel %vm328_vm1, %v1466_v63, 0.0 }
 0xd10   : > { %1471 = vadd.xlane.f32.xlu0 %v1470_v23 }
 0xd26   :  { %1503 = vperm.xlu0 (%p294_p10), %2021, %v2850_v0  }
 0xd2a   :  { %1508 = vperm.xlu0 (%p294_p10), %2021, %v2852_v1  }
 0xd9b   : > { %v1469_v56 = vpop.xlane.xlu1 %1468 }
 0xd9c   : > { %v1473_v7 = vmul.f32 0.03125, %v1469_v56 }
 0xd9d   : > { %v1472_v8 = vpop.xlane.xlu0 %1471 }
 0xd9e   : > { %v1475_v9 = vadd.f32 1e-05, %v1473_v7  ;;  %v1474_v11 = vmul.f32 0.03125, %v1472_v8 }
 0xda0   : > { %2017 = vrsqrt.f32 %v1475_v9  ;;  %v1476_v12 = vadd.f32 1e-05, %v1474_v11 }
 0xda2   : > { %2019 = vrsqrt.f32 %v1476_v12 }
 0xda5   :  { %v1504_v29 = vpop.permute.xlu0 (%p294_p10), %1503 }
 0xda9   :  { %v1509_v30 = vpop.permute.xlu0 (%p294_p10), %1508 }
 0xdaa   : > { %v2018_v13 = vpop.eup %2017 }
 0xdab   : > { %v1479_v6 = vmul.f32 %v2018_v13, %v1463_v60 }
 0xdac   : > { %v2020_v17 = vpop.eup %2019 }
 0xdad   : > { %v1489_v21 = vmul.f32 %v1704_v16, %v1479_v6  ;;  %v1480_v22 = vmul.f32 %v2020_v17, %v1464_v62  ;;  %296 = sbr.rel (!%p294_p10) target bundleno = 321 (0x141), region = 175 }
 0xdaf   : > { %v1499_v24 = vadd.f32 %v1705_v20, %v1489_v21   ;;  %v1490_v25 = vmul.f32 %v1704_v16, %v1480_v22 }
 0xdb1   : > { %v1500_v14 = vadd.f32 %v1705_v20, %v1490_v25   ;;  %v3136_v4 = vmov %v1499_v24  ;;  %v1511_v31 = vmul.f32 (%p294_p10), %v1504_v29, %v1499_v24 }
 0xdb3   : > { %v3135_v5 = vmov %v1500_v14  ;;  %v1512_v32 = vmul.f32 (%p294_p10), %v1509_v30, %v1500_v14 }
 0xdb5   :  { %v1513_v33 = vpack.c.bf16 %v1512_v32, %v1511_v31 }
 0xdb7   :  { %1882 = vmatmul.mubr.msk.bf16.vlgmr.msra.gmra.mrb[0].mxu0 %vm328_vm1, %v1513_v33 }
 0xe8a   :  { %v1575_v3 = vpop.f32.mrb[0].mxu0 }
 0xe8b   :  { %v1576_v0 = vadd.f32 %v1706_v2, %v1575_v3  ;;  %v1883_v34 = vpop.f32.mrb[1].mxu0 }
 0xe8c   :  { %v1578_v35 = vpop.f32.mrb[2].mxu0 }
 0xe8d   :  { %v1579_v36 = vadd.f32 %v1706_v2, %v1578_v35  ;;  %v1884_v4 = vpop.f32.mrb[3].mxu0  ;;  %v1582_v37 = vmul.f32 %v1576_v0, %v1504_v29 }
 0xe8f   :  { %v1583_v1 = vmul.f32 %v1579_v36, %v1509_v30  ;;  %v1585_v38 = vsel %vm1001_vm8, %v1582_v37, 0.0 }
 0xe90   :  { %1587 = vst [vmem:[#allocation29] sm:$0xff] %v1585_v38 }
 0xe91   :  { %v1586_v5 = vsel %vm1001_vm8, %v1583_v1, 0.0 }
 0xe92   :  { %1588 = vst [vmem:[#allocation29 + $0x8] sm:$0xff] %v1586_v5 }
 0xe93   :  { %2409 = shalt.err (!%p2406_p1)
}
 0xe94   :  { %s2410_s14 = scalar_lea.hbm %s3124_s17, 256 }
 0xe95   :  { %p2411_p2 = scmp.ne.s32.totalorder %s3124_s17, %s2410_s14  ;;  %p2414_p3 = scmp.lt.u32.totalorder %s2410_s14, %s3124_s17 }
 0xe97   :  { %p2416_p4 = pnand %p2414_p3, %p2411_p2 }
 0xe99   :  { %2419 = shalt.err (!%p2416_p4)
}
 0xe9a   :  { %s3137_s10 = smov 8   ;;  %s3138_s6 = smov 128  }
 0xe9b   :  { %1600 = dma.vmem_to_hbm [thread:$0]  %s1595_s21, 256, %s3124_s17, [#allocation4], %s3138_s6, %s3138_s6, %s3137_s10  }
 0xe9c   :  { %2450 = dma.done.wait [#allocation4], 256  }
 0xe9d   :  { %2451 = vsyncadd [#allocation4], 4294967040 }
 0xe9e   :  { %1604 = vsyncpa [#allocation3], 1 }
 0xe9f   :  { %1605 = vsyncpa [#allocation6], 1 }
 0xea0   :  { %1606 = vsyncpa [#allocation9], 1 }
 0xea1   :  { %1607 = vsyncpa [#allocation12], 1 }
 0xea2   :  { %1608 = vsyncpa [#allocation15], 1 }
 0xea3   :  { %1609 = vsyncpa [#allocation18], 1 }
 0xea4   :  { %1610 = vsyncpa [#allocation21], 1 }
 0xea5   :  { %1611 = vsyncpa [#allocation24], 1 }
 0xea6   :  { %1612 = vsyncpa [#allocation27], 1 }
 0xea7   :  { %1613 = vsyncpa [#allocation4], 1 }

// kernel: fwd.2
= control target key start
LH: loop header
LB: loop body
LE: loop exit
PB: predicated region body
PF: predicated region fallthrough
CT: control target
= control target key end

     0   :  { %s4309_s0 = inlined_call_operand.hbm [shape: f32[2,35,16], index: 0, kind: input, shape index: {}]   ;;  %s4310_s1 = inlined_call_operand.hbm [shape: f32[2,32,1], index: 1, kind: input, shape index: {}]   ;;  %s4311_s2 = inlined_call_operand.hbm [shape: f32[2,32,32], index: 2, kind: input, shape index: {}]   ;;  %s4312_s3 = inlined_call_operand.hbm [shape: bf16[64,256], index: 3, kind: input, shape index: {}]   ;;  %s4313_s4 = inlined_call_operand.hbm [shape: bf16[128,16], index: 4, kind: input, shape index: {}]   ;;  %s4314_s5 = inlined_call_operand.hbm [shape: bf16[16,32], index: 5, kind: input, shape index: {}]   ;;  %s4315_s6 = inlined_call_operand.hbm [shape: f32[1,32], index: 6, kind: input, shape index: {}]   ;;  %s4316_s7 = inlined_call_operand.hbm [shape: bf16[16,160,64], index: 7, kind: input, shape index: {}]   ;;  %s4317_s8 = inlined_call_operand.hbm [shape: f32[16,1,64], index: 8, kind: input, shape index: {}]   ;;  %s4318_s9 = inlined_call_operand.hbm [shape: bf16[16,32,64], index: 9, kind: input, shape index: {}]   ;;  %s4319_s10 = inlined_call_operand.hbm [shape: f32[16,1,64], index: 10, kind: input, shape index: {}]   ;;  %s4320_s11 = inlined_call_operand.hbm [shape: bf16[32,64], index: 11, kind: input, shape index: {}]   ;;  %s4321_s12 = inlined_call_operand.hbm [shape: f32[1,64], index: 12, kind: input, shape index: {}]   ;;  %s4322_s13 = inlined_call_operand.hbm [shape: f32[2,32,128], index: 13, kind: output, shape index: {}]  }
   0x1   :  { %4389 = sst [smem:[#allocation55_spill]] %s4309_s0 }
   0x2   :  { %4390 = sst [smem:[#allocation56_spill]] %s4310_s1 }
   0x3   :  { %4391 = sst [smem:[#allocation57_spill]] %s4311_s2 }
   0x4   :  { %4392 = sst [smem:[#allocation58_spill]] %s4312_s3 }
   0x5   :  { %4393 = sst [smem:[#allocation59_spill]] %s4313_s4 }
   0x6   :  { %4394 = sst [smem:[#allocation60_spill]] %s4314_s5 }
   0x7   :  { %4395 = sst [smem:[#allocation61_spill]] %s4315_s6 }
   0x8   :  { %4396 = sst [smem:[#allocation62_spill]] %s4316_s7 }
   0x9   :  { %4397 = sst [smem:[#allocation63_spill]] %s4317_s8 }
   0xa   :  { %4398 = sst [smem:[#allocation64_spill]] %s4318_s9 }
   0xb   :  { %4399 = sst [smem:[#allocation65_spill]] %s4319_s10 }
   0xc   :  { %4400 = sst [smem:[#allocation66_spill]] %s4320_s11 }
   0xd   :  { %4401 = sst [smem:[#allocation67_spill]] %s4321_s12 }
   0xe   :  { %4402 = sst [smem:[#allocation68_spill]] %s4322_s13 }
   0xf   :  { %18 = vsyncpa [#allocation5], 0 }
  0x10   :  { %20 = vsyncpa [#allocation5 + $0x1], 0 }
  0x11   :  { %21 = vsyncpa [#allocation8], 0 }
  0x12   :  { %23 = vsyncpa [#allocation8 + $0x1], 0 }
  0x13   :  { %24 = vsyncpa [#allocation11], 0 }
  0x14   :  { %25 = vsyncpa [#allocation14], 0 }
  0x15   :  { %26 = vsyncpa [#allocation17], 0 }
  0x16   :  { %28 = vsyncpa [#allocation17 + $0x1], 0 }
  0x17   :  { %29 = vsyncpa [#allocation20], 0 }
  0x18   :  { %31 = vsyncpa [#allocation20 + $0x1], 0 }
  0x19   :  { %32 = vsyncpa [#allocation23], 0 }
  0x1a   :  { %33 = vsyncpa [#allocation6], 0 }
  0x1b   :  { %35 = vsyncpa [#allocation6 + $0x1], 0  ;;  %s3426_s25 = smov 0   ;;  %s3428_s26 = smov 0  }
  0x1c   :  { %s3430_s27 = smov 0   ;;  %s3432_s28 = smov 0  }
  0x1d   :  { %s3434_s29 = smov 0   ;;  %s3436_s30 = smov 0  }
  0x1e   :  { %s3438_s14 = smov 0   ;;  %s3440_s15 = smov 0  }
  0x1f   :  { %s3442_s16 = smov 0   ;;  %s3444_s17 = smov 0  }
  0x20   :  { %s3446_s18 = smov 0  }
  0x21 LB: > { %4403 = sst [smem:[#allocation34_spill]] %s3290_s26  ;;  %s3482_s19 = sadd.s32 4294967295, %s3326_s18   ;;  %s3326_s18 = sphi %s3446_s18, %s41_s18   ;;  %s3322_s17 = sphi %s3444_s17, %s4515_s17   ;;  %s3318_s16 = sphi %s3442_s16, %s4514_s16   ;;  %s3314_s15 = sphi %s3440_s15, %s4513_s15   ;;  %s3310_s14 = sphi %s3438_s14, %s4512_s14   ;;  %s3306_s30 = sphi %s3436_s30, %s4509_s30   ;;  %s3302_s29 = sphi %s3434_s29, %s4508_s29   ;;  %s3298_s28 = sphi %s3432_s28, %s4507_s28   ;;  %s3294_s27 = sphi %s3430_s27, %s4506_s27   ;;  %s3290_s26 = sphi %s3428_s26, %s4505_s26   ;;  %s3286_s25 = sphi %s3426_s25, %s4504_s25  }
  0x22   : > { %4404 = sst [smem:[#allocation35_spill]] %s3294_s27  ;;  %p2295_p0 = scmp.ge.s32.totalorder %s3326_s18, 1 }
  0x23   : > { %4405 = sst [smem:[#allocation36_spill]] %s3298_s28  ;;  %p4329_p1 = scmp.eq.s32.totalorder %s3482_s19, 0 }
  0x24   : > { %4406 = sst [smem:[#allocation37_spill]] %s3302_s29  ;;  %p392_p2 = scmp.lt.s32.totalorder %s3326_s18, 33 }
  0x25   : > { %4407 = sst [smem:[#allocation38_spill]] %s3306_s30  ;;  %s3328_s21 = smov [#allocation10]  }
  0x26   : > { %4408 = sst [smem:[#allocation39_spill]] %s3310_s14  ;;  %p3487_p3 = pnand %p2295_p0, %p392_p2 }
  0x27   : > { %4409 = sst [smem:[#allocation40_spill]] %s3314_s15  ;;  %s404_s22 = sshll.u32 %s3328_s21, 4  ;;  %s405_s22 = int_to_ptr.vmem [resolvable:$true] %s404_s22 }
  0x28   : > { %4410 = sst [smem:[#allocation41_spill]] %s3326_s18  ;;  %p2526_p4 = pneg %p3487_p3 }
  0x29   : > { %4411 = sst [smem:[#allocation42_spill]] %s3482_s19  ;;  %s3329_s24 = smov [#allocation13]  }
  0x2a   : > { %s4412_s20 = scalar_select %p3487_p3, 1, 0 }
  0x2b   : > { %p3495_p5 = pnand %p2526_p4, %p4329_p1  ;;  %s430_s13 = sshll.u32 %s3329_s24, 4  ;;  %s431_s13 = int_to_ptr.vmem [resolvable:$true] %s430_s13 }
  0x2c   : > { %4413 = sst [smem:[#allocation43_spill]] %s4412_s20 }
  0x2d   : > { %s4414_s23 = scalar_select %p3495_p5, 1, 0 }
  0x2e   : > { %s4415_s3 = sld [smem:[#allocation58_spill]]  ;;  %p3507_p7 = pneg %p3495_p5 }
  0x30   : > { %s4416_s21 = scalar_select %p3507_p7, 1, 0 }
  0x34   : > { %s2802_s10 = scalar_lea.hbm %s4415_s3, 1024 }
  0x35   : > { %p2803_p6 = scmp.ne.s32.totalorder %s4415_s3, %s2802_s10  ;;  %p2809_p10 = scmp.lt.u32.totalorder %s2802_s10, %s4415_s3 }
  0x37   : > { %p2805_p8 = pnand %p3507_p7, %p2803_p6 }
  0x39   : > { %p2806_p9 = pneg %p2805_p8 }
  0x3b   : > { %p2811_p11 = pnand %p2809_p10, %p2806_p9 }
  0x3d   : > { %2814 = shalt.err (!%p2811_p11)
}
  0x3e   : > { %s2815_s14 = scalar_lea.vmem %s405_s22, 1024  ;;  %p2823_p2 = scmp.lt.s32.totalorder %s405_s22, %s405_s22 }
  0x3f   : > { %p2816_p12 = scmp.ne.s32.totalorder %s405_s22, %s2815_s14  ;;  %p2824_p4 = scmp.lt.s32.totalorder %s2815_s14, %s2815_s14 }
  0x41   : > { %p2818_p13 = pnand %p2816_p12, %p3507_p7  ;;  %p2825_p1 = por %p2824_p4, %p2823_p2 }
  0x43   : > { %p2819_p0 = pneg %p2818_p13 }
  0x45   : > { %p2826_p3 = pnand %p2825_p1, %p2819_p0 }
  0x47   : > { %2829 = shalt.err (!%p2826_p3)
}
  0x48   : > { %s4340_s0 = smov 128   ;;  %s4342_s8 = smov 8  }
  0x49   : > { %2529 = dma.hbm_to_vmem [thread:$0]  (!%p3495_p5), %s4415_s3, 1024, %s405_s22, [#allocation11], %s4340_s0, %s4340_s0, %s4342_s8  }
  0x4a   : > { %s3332_s15 = smov [#allocation22]   ;;  %s4417_s5 = sld [smem:[#allocation60_spill]] }
  0x4b   : > { %s454_s20 = sshll.u32 %s3332_s15, 4  ;;  %s455_s20 = int_to_ptr.vmem [resolvable:$true] %s454_s20 }
  0x50   : > { %s2830_s6 = scalar_lea.hbm %s4417_s5, 128 }
  0x51   : > { %p2831_p1 = scmp.ne.s32.totalorder %s4417_s5, %s2830_s6  ;;  %p2837_p8 = scmp.lt.u32.totalorder %s2830_s6, %s4417_s5 }
  0x53   : > { %p2833_p3 = pnand %p2831_p1, %p3507_p7 }
  0x55   : > { %p2834_p6 = pneg %p2833_p3 }
  0x57   : > { %p2839_p9 = pnand %p2837_p8, %p2834_p6 }
  0x59   : > { %2842 = shalt.err (!%p2839_p9)
}
  0x5a   : > { %s2843_s22 = scalar_lea.vmem %s431_s13, 128  ;;  %p2851_p13 = scmp.lt.s32.totalorder %s431_s13, %s431_s13 }
  0x5b   : > { %p2844_p10 = scmp.ne.s32.totalorder %s431_s13, %s2843_s22  ;;  %p2852_p0 = scmp.lt.s32.totalorder %s2843_s22, %s2843_s22 }
  0x5d   : > { %p2846_p11 = pnand %p2844_p10, %p3507_p7  ;;  %p2853_p2 = por %p2852_p0, %p2851_p13 }
  0x5f   : > { %p2847_p12 = pneg %p2846_p11 }
  0x61   : > { %p2854_p4 = pnand %p2853_p2, %p2847_p12 }
  0x63   : > { %2857 = shalt.err (!%p2854_p4)
}
  0x64   : > { %s4336_s4 = smov 64   ;;  %s4338_s9 = smov 4  }
  0x65   : > { %2535 = dma.hbm_to_vmem [thread:$0]  (!%p3495_p5), %s4417_s5, 128, %s431_s13, [#allocation14], %s4336_s4, %s4336_s4, %s4338_s9  }
  0x66   : > { %s4418_s11 = sld [smem:[#allocation66_spill]] }
  0x6c   : > { %s2858_s12 = scalar_lea.hbm %s4418_s11, 256 }
  0x6d   : > { %p2859_p1 = scmp.ne.s32.totalorder %s4418_s11, %s2858_s12  ;;  %p2865_p8 = scmp.lt.u32.totalorder %s2858_s12, %s4418_s11 }
  0x6f   : > { %p2861_p3 = pnand %p2859_p1, %p3507_p7 }
  0x71   : > { %p2862_p6 = pneg %p2861_p3 }
  0x73   : > { %p2867_p9 = pnand %p2865_p8, %p2862_p6 }
  0x75   : > { %2870 = shalt.err (!%p2867_p9)
}
  0x76   : > { %s2871_s2 = scalar_lea.vmem %s455_s20, 256  ;;  %p2879_p13 = scmp.lt.s32.totalorder %s455_s20, %s455_s20 }
  0x77   : > { %p2872_p10 = scmp.ne.s32.totalorder %s455_s20, %s2871_s2  ;;  %p2880_p0 = scmp.lt.s32.totalorder %s2871_s2, %s2871_s2 }
  0x79   : > { %p2874_p11 = pnand %p2872_p10, %p3507_p7  ;;  %p2881_p2 = por %p2880_p0, %p2879_p13 }
  0x7b   : > { %p2875_p12 = pneg %p2874_p11 }
  0x7d   : > { %p2882_p4 = pnand %p2881_p2, %p2875_p12 }
  0x7f   : > { %2885 = shalt.err (!%p2882_p4)
}
  0x80   : > { %2541 = dma.hbm_to_vmem [thread:$0]  (!%p3495_p5), %s4418_s11, 256, %s455_s20, [#allocation23], %s4336_s4, %s4336_s4, %s4338_s9  }
  0x81   : > { %s2294_s7 = sadd.s32 4294967294, %s3326_s18   ;;  %p67_p1 = scmp.ne.s32.totalorder %s3306_s30, %s3302_s29 }
  0x82   : > { %p4347_p3 = scmp.eq.s32.totalorder %s3326_s18, 0  ;;  %p73_p6 = scmp.ne.s32.totalorder %s3302_s29, %s3298_s28 }
  0x83   : > { %p379_p8 = scmp.eq.s32.totalorder %s3482_s19, 31  ;;  %p385_p10 = scmp.eq.s32.totalorder %s2294_s7, 31 }
  0x84   : > { %p69_p9 = por %p4347_p3, %p67_p1  ;;  %p4419_p11 = scmp.eq.s32.totalorder %s3482_s19, 0 }
  0x85   : > { %p3585_p13 = por %p379_p8, %p67_p1  ;;  %p3589_p0 = por %p385_p10, %p73_p6 }
  0x86   : > { %p3581_p12 = por %p4419_p11, %p73_p6  ;;  %p4346_p2 = scmp.lt.s32.totalorder %s3326_s18, 32 }
  0x87   : > { %s4422_s20 = scalar_select %p3585_p13, 1, 0 }
  0x88   : > { %s4420_s15 = scalar_select %p3581_p12, 1, 0 }
  0x89   : > { %4423 = sst [smem:[#allocation45_spill]] %s4422_s20  ;;  %s3595_s14 = sand.u32 1, %s3306_s30  }
  0x8a   : > { %4421 = sst [smem:[#allocation44_spill]] %s4420_s15  ;;  %s3598_s22 = sand.u32 1, %s3326_s18  }
  0x8b   : > { %s4424_s24 = scalar_select %p3589_p0, 1, 0 }
  0x8c   : > { %p3602_p4 = pnand %p4346_p2, %p69_p9  ;;  %s4345_s13 = sshll.u32 %s3595_s14, 5 }
  0x8d   : > { %4425 = sst [smem:[#allocation46_spill]] %s4424_s24  ;;  %s4344_s6 = sshll.u32 %s3322_s17, 9 }
  0x8e   : > { %s4426_s2 = scalar_select %p3602_p4, 1, 0 }
  0x8f   : > { %s4427_s1 = sld [smem:[#allocation56_spill]]  ;;  %s504_s12 = scalar_lea.vmem [#allocation7], %s4345_s13 }
  0x90   : > { %s511_s10 = sshll.u32 %s504_s12, 4  ;;  %p3624_p6 = pneg %p3602_p4  ;;  %s3617_s10 = int_to_ptr.vmem [resolvable:$true] %s511_s10 }
  0x92   : > { %s4428_s3 = scalar_select %p3624_p6, 1, 0 }
  0x95   : > { %s3613_s9 = scalar_lea.hbm %s4427_s1, %s4344_s6  ;;  %s2891_s6 = scalar_lea.hbm %s4427_s1, 1024 }
  0x96   : > { %s2886_s8 = scalar_lea.hbm %s3613_s9, 512  ;;  %p2892_p10 = scmp.lt.u32.totalorder %s3613_s9, %s4427_s1 }
  0x97   : > { %p2887_p1 = scmp.ne.s32.totalorder %s3613_s9, %s2886_s8  ;;  %p2893_p11 = scmp.lt.u32.totalorder %s2891_s6, %s2886_s8 }
  0x98   : > { %p2895_p3 = scmp.lt.u32.totalorder %s2886_s8, %s3613_s9 }
  0x99   : > { %p2889_p8 = pnand %p3624_p6, %p2887_p1  ;;  %p2894_p2 = por %p2893_p11, %p2892_p10 }
  0x9b   : > { %p2890_p9 = pneg %p2889_p8  ;;  %p2896_p0 = por %p2895_p3, %p2894_p2 }
  0x9d   : > { %p2897_p13 = pnand %p2896_p0, %p2890_p9 }
  0x9f   : > { %2900 = shalt.err (!%p2897_p13)
}
  0xa0   : > { %s2901_s0 = scalar_lea.vmem %s3617_s10, 512  ;;  %s3335_s4 = smov [#allocation7]  }
  0xa1   : > { %p2902_p1 = scmp.ne.s32.totalorder %s3617_s10, %s2901_s0  ;;  %s2906_s7 = sshll.u32 %s3335_s4, 4  ;;  %s2907_s7 = int_to_ptr.vmem [resolvable:$false] %s2906_s7 }
  0xa2   : > { %s2908_s13 = scalar_lea.vmem %s2907_s7, 1024  ;;  %p2909_p5 = scmp.lt.s32.totalorder %s3617_s10, %s2907_s7 }
  0xa3   : > { %p2904_p8 = pnand %p2902_p1, %p3624_p6  ;;  %p2910_p7 = scmp.lt.s32.totalorder %s2908_s13, %s2901_s0 }
  0xa5   : > { %p2905_p12 = pneg %p2904_p8  ;;  %p2911_p10 = por %p2910_p7, %p2909_p5 }
  0xa7   : > { %p2912_p11 = pnand %p2911_p10, %p2905_p12 }
  0xa9   : > { %2915 = shalt.err (!%p2912_p11)
}
  0xaa   : > { %s4429_s8 = smov 8   ;;  %s4430_s6 = smov 128  }
  0xab   : > { %s4431_s12 = scalar_lea.sflag [#allocation8], %s3598_s22  ;;  %s4432_s0 = sshll.u32 %s3322_s17, 9 }
  0xac   : > { %2551 = dma.hbm_to_vmem [thread:$0]  (!%p3602_p4), %s3613_s9, 512, %s3617_s10, %s4431_s12, %s4430_s6, %s4430_s6, %s4429_s8  }
  0xad   : > { %s4433_s13 = sld [smem:[#allocation57_spill]]  ;;  %s4434_s5 = sshll.u32 %s3595_s14, 5 }
  0xae   : > { %s525_s11 = scalar_lea.vmem [#allocation9], %s4434_s5  ;;  %s50_s28 = sadd.s32 1, %s3318_s16 }
  0xaf   : > { %s532_s24 = sshll.u32 %s525_s11, 4  ;;  %p51_p5 = scmp.ge.s32.totalorder %s50_s28, 16  ;;  %s3661_s24 = int_to_ptr.vmem [resolvable:$true] %s532_s24 }
  0xb0   : > { %4435 = sst [smem:[#allocation47_spill]] %s3661_s24  ;;  %s222_s20 = sadd.s32 1, %s3294_s27 }
  0xb1   : > { %p229_p7 = scmp.ne.s32.totalorder %s3294_s27, %s3290_s26  ;;  %p235_p3 = scmp.ne.s32.totalorder %s3290_s26, %s3286_s25 }
  0xb2   : > { %s4517_s28 = smov (%p51_p5, %s50_s28), 0  ;;  %s4437_s9 = sadd.s32 1, %s3322_s17 }
  0xb3   : > { %s3657_s1 = scalar_lea.hbm %s4433_s13, %s4432_s0  ;;  %4436 = sst [smem:[#allocation48_spill]] %s4517_s28 }
  0xb4   : > { %s4519_s9 = smov (!%p51_p5, %s4437_s9), %s3322_s17  ;;  %s219_s5 = ssub.s32 %s3318_s16, %s4517_s28 }
  0xb5   : > { %p4438_p12 = scmp.eq.s32.totalorder %s3326_s18, 0  ;;  %p55_p0 = scmp.ge.s32.totalorder %s4519_s9, 2 }
  0xb6   : > { %p220_p2 = scmp.eq.s32.totalorder %s219_s5, 0  ;;  %p4439_p9 = scmp.eq.s32.totalorder %s3482_s19, 0 }
  0xb7   : > { %p231_p13 = por %p229_p7, %p4438_p12  ;;  %s4521_s9 = smov (%p55_p0, %s4519_s9), 0 }
  0xb8   : > { %p3680_p1 = por %p235_p3, %p4439_p9  ;;  %4442 = sst [smem:[#allocation50_spill]] %s4521_s9 }
  0xb9   : > { %s3687_s25 = scalar_select %p220_p2, %s3294_s27, %s222_s20  }
  0xba   : > { %s4440_s11 = scalar_select %p3680_p1, 1, 0 }
  0xbb   : > { %4443 = sst [smem:[#allocation51_spill]] %s3687_s25  ;;  %s57_s10 = ssub.s32 %s3322_s17, %s4521_s9 }
  0xbc   : > { %4441 = sst [smem:[#allocation49_spill]] %s4440_s11  ;;  %s3692_s12 = sand.u32 1, %s3294_s27  }
  0xbd   : > { %p58_p8 = scmp.eq.s32.totalorder %s57_s10, 0  ;;  %s2482_s0 = smul.u32 80, %s3692_s12 }
  0xbe   : > { %s2483_s4 = smul.u32 1280, %s3318_s16  ;;  %p4444_p10 = scmp.lt.s32.totalorder %s3326_s18, 32 }
  0xbf   : > { %s4447_s5 = sadd.s32 1, %s3306_s30  ;;  %s4449_s20 = sld [smem:[#allocation62_spill]] }
  0xc0   : > { %p3698_p11 = pnand %p4444_p10, %p231_p13  ;;  %s546_s10 = scalar_lea.vmem [#allocation16], %s2482_s0 }
  0xc1   : > { %s3705_s28 = scalar_select %p58_p8, %s3306_s30, %s4447_s5  }
  0xc2   : > { %s4445_s7 = scalar_select %p3698_p11, 1, 0 }
  0xc3   : > { %4448 = sst [smem:[#allocation53_spill]] %s3705_s28  ;;  %s553_s9 = sshll.u32 %s546_s10, 4  ;;  %s3712_s9 = int_to_ptr.vmem [resolvable:$true] %s553_s9 }
  0xc4   : > { %4446 = sst [smem:[#allocation52_spill]] %s4445_s7  ;;  %p3719_p7 = pneg %p3698_p11 }
  0xc5   : > { %s3710_s25 = scalar_lea.hbm %s4449_s20, %s2483_s4  ;;  %s2921_s4 = scalar_lea.hbm %s4449_s20, 20480 }
  0xc6   : > { %s2916_s18 = scalar_lea.hbm %s3710_s25, 1280  ;;  %p2922_p13 = scmp.lt.u32.totalorder %s3710_s25, %s4449_s20 }
  0xc7   : > { %p2917_p5 = scmp.ne.s32.totalorder %s3710_s25, %s2916_s18  ;;  %p2923_p0 = scmp.lt.u32.totalorder %s2921_s4, %s2916_s18 }
  0xc8   : > { %s4450_s5 = scalar_select %p3719_p7, 1, 0 }
  0xc9   : > { %p2919_p3 = pnand %p3719_p7, %p2917_p5  ;;  %p2924_p2 = por %p2923_p0, %p2922_p13 }
  0xca   : > { %4451 = sst [smem:[#allocation54_spill]] %s4450_s5  ;;  %p2925_p9 = scmp.lt.u32.totalorder %s2916_s18, %s3710_s25 }
  0xcb   : > { %p2920_p12 = pneg %p2919_p3 }
  0xcc   : > { %p2926_p8 = por %p2925_p9, %p2924_p2 }
  0xce   : > { %p2927_p10 = pnand %p2926_p8, %p2920_p12 }
  0xd0   : > { %2930 = shalt.err (!%p2927_p10)
}
  0xd1   : > { %s2931_s27 = scalar_lea.vmem %s3712_s9, 1280  ;;  %s3336_s26 = smov [#allocation16]  }
  0xd2   : > { %p2932_p5 = scmp.ne.s32.totalorder %s3712_s9, %s2931_s27  ;;  %s2936_s11 = sshll.u32 %s3336_s26, 4  ;;  %s2937_s11 = int_to_ptr.vmem [resolvable:$false] %s2936_s11 }
  0xd3   : > { %s2938_s0 = scalar_lea.vmem %s2937_s11, 2560  ;;  %p2939_p4 = scmp.lt.s32.totalorder %s3712_s9, %s2937_s11 }
  0xd4   : > { %p2934_p3 = pnand %p2932_p5, %p3719_p7  ;;  %p2940_p6 = scmp.lt.s32.totalorder %s2938_s0, %s2931_s27 }
  0xd6   : > { %p2935_p1 = pneg %p2934_p3  ;;  %p2941_p13 = por %p2940_p6, %p2939_p4 }
  0xd8   : > { %p2942_p0 = pnand %p2941_p13, %p2935_p1 }
  0xda   : > { %2945 = shalt.err (!%p2942_p0)
}
  0xdb   : > { %s4452_s18 = smov 4   ;;  %s4453_s4 = smov 64  }
  0xdc   : > { %s4454_s10 = scalar_lea.sflag [#allocation17], %s3598_s22  ;;  %s2312_s26 = sshll.u32 %s3692_s12, 4 }
  0xdd   : > { %2557 = dma.hbm_to_vmem [thread:$0]  (!%p3698_p11), %s3710_s25, 1280, %s3712_s9, %s4454_s10, %s4453_s4, %s4453_s4, %s4452_s18  }
  0xde   : > { %s2391_s11 = sshll.u32 %s3318_s16, 8  ;;  %s4455_s20 = sld [smem:[#allocation64_spill]] }
  0xdf   : > { %s584_s30 = scalar_lea.vmem [#allocation19], %s2312_s26  ;;  %s3337_s15 = smov [#allocation12]  }
  0xe0   : > { %s591_s19 = sshll.u32 %s584_s30, 4  ;;  %s3756_s29 = sshll.u32 %s3337_s15, 4  ;;  %s3754_s19 = int_to_ptr.vmem [resolvable:$true] %s591_s19  ;;  %s418_s29 = int_to_ptr.vmem [resolvable:$true] %s3756_s29 }
  0xe1   : > { %s4381_s24 = scalar_lea.sflag [#allocation20], %s3598_s22 }
  0xe4   : > { %s3752_s28 = scalar_lea.hbm %s4455_s20, %s2391_s11  ;;  %s2951_s11 = scalar_lea.hbm %s4455_s20, 4096 }
  0xe5   : > { %s2946_s9 = scalar_lea.hbm %s3752_s28, 256  ;;  %p2952_p12 = scmp.lt.u32.totalorder %s3752_s28, %s4455_s20 }
  0xe6   : > { %p2947_p4 = scmp.ne.s32.totalorder %s3752_s28, %s2946_s9  ;;  %p2953_p2 = scmp.lt.u32.totalorder %s2951_s11, %s2946_s9 }
  0xe7   : > { %p2955_p8 = scmp.lt.u32.totalorder %s2946_s9, %s3752_s28 }
  0xe8   : > { %p2949_p6 = pnand %p2947_p4, %p3719_p7  ;;  %p2954_p9 = por %p2953_p2, %p2952_p12 }
  0xea   : > { %p2950_p1 = pneg %p2949_p6  ;;  %p2956_p10 = por %p2955_p8, %p2954_p9 }
  0xec   : > { %p2957_p5 = pnand %p2956_p10, %p2950_p1 }
  0xee   : > { %2960 = shalt.err (!%p2957_p5)
}
  0xef   : > { %s2961_s30 = scalar_lea.vmem %s3754_s19, 256  ;;  %s3338_s15 = smov [#allocation19]  }
  0xf0   : > { %p2962_p3 = scmp.ne.s32.totalorder %s3754_s19, %s2961_s30  ;;  %s2966_s26 = sshll.u32 %s3338_s15, 4  ;;  %s2967_s26 = int_to_ptr.vmem [resolvable:$false] %s2966_s26 }
  0xf1   : > { %s2968_s25 = scalar_lea.vmem %s2967_s26, 512  ;;  %p2969_p4 = scmp.lt.s32.totalorder %s3754_s19, %s2967_s26 }
  0xf2   : > { %p2964_p13 = pnand %p2962_p3, %p3719_p7  ;;  %p2970_p6 = scmp.lt.s32.totalorder %s2968_s25, %s2961_s30 }
  0xf4   : > { %p2965_p0 = pneg %p2964_p13  ;;  %p2971_p12 = por %p2970_p6, %p2969_p4 }
  0xf6   : > { %p2972_p2 = pnand %p2971_p12, %p2965_p0 }
  0xf8   : > { %2975 = shalt.err (!%p2972_p2)
}
  0xf9   : > { %2563 = dma.hbm_to_vmem [thread:$0]  (!%p3698_p11), %s3752_s28, 256, %s3754_s19, %s4381_s24, %s4453_s4, %s4453_s4, %s4452_s18  }
  0xfa   : > { %s4456_s11 = sld [smem:[#allocation59_spill]]  ;;  %p4457_p9 = scmp.ne.s32.totalorder %s4416_s21, 0 }
 0x100   : > { %s2976_s27 = scalar_lea.hbm %s4456_s11, 1024 }
 0x101   : > { %p2977_p1 = scmp.ne.s32.totalorder %s4456_s11, %s2976_s27  ;;  %p2983_p5 = scmp.lt.u32.totalorder %s2976_s27, %s4456_s11 }
 0x103   : > { %p2979_p8 = pnand %p2977_p1, %p4457_p9 }
 0x105   : > { %p2980_p10 = pneg %p2979_p8 }
 0x107   : > { %p2985_p3 = pnand %p2983_p5, %p2980_p10 }
 0x109   : > { %2988 = shalt.err (!%p2985_p3)
}
 0x10a   : > { %s2989_s25 = scalar_lea.vmem %s418_s29, 1024  ;;  %p2997_p6 = scmp.lt.s32.totalorder %s418_s29, %s418_s29 }
 0x10b   : > { %p2990_p13 = scmp.ne.s32.totalorder %s418_s29, %s2989_s25  ;;  %p2998_p12 = scmp.lt.s32.totalorder %s2989_s25, %s2989_s25 }
 0x10d   : > { %p2992_p0 = pnand %p2990_p13, %p4457_p9  ;;  %p2999_p2 = por %p2998_p12, %p2997_p6 }
 0x10f   : > { %p2993_p4 = pneg %p2992_p0 }
 0x111   : > { %p3000_p11 = pnand %p2999_p2, %p2993_p4 }
 0x113   : > { %3003 = shalt.err (!%p3000_p11)
}
 0x114   : > { %p4458_p1 = scmp.ne.s32.totalorder %s4414_s23, 0  ;;  %s3339_s9 = smov [#allocation15]  }
 0x115   : > { %s444_s10 = sshll.u32 %s3339_s9, 4  ;;  %s3340_s27 = smov [#allocation24]   ;;  %s445_s10 = int_to_ptr.vmem [resolvable:$true] %s444_s10 }
 0x116   : > { %2532 = dma.hbm_to_vmem [thread:$0]  (!%p4458_p1), %s4456_s11, 1024, %s418_s29, [#allocation11], %s4453_s4, %s4453_s4, %s4452_s18  }
 0x117   : > { %s468_s0 = sshll.u32 %s3340_s27, 4  ;;  %s4459_s26 = sld [smem:[#allocation61_spill]]  ;;  %s469_s0 = int_to_ptr.vmem [resolvable:$true] %s468_s0 }
 0x11d   : > { %s4460_s24 = smov %s4459_s26  ;;  %s3004_s25 = scalar_lea.hbm %s4459_s26, 16 }
 0x11e   : > { %p3005_p11 = scmp.ne.s32.totalorder %s4460_s24, %s3004_s25  ;;  %p3011_p5 = scmp.lt.u32.totalorder %s3004_s25, %s4460_s24 }
 0x120   : > { %p3007_p8 = pnand %p3005_p11, %p4457_p9 }
 0x122   : > { %p3008_p10 = pneg %p3007_p8 }
 0x124   : > { %p3013_p3 = pnand %p3011_p5, %p3008_p10 }
 0x126   : > { %3016 = shalt.err (!%p3013_p3)
}
 0x127   : > { %s3017_s29 = scalar_lea.vmem %s445_s10, 16  ;;  %s3024_s18 = scalar_lea.vmem %s445_s10, 32 }
 0x128   : > { %p3018_p13 = scmp.ne.s32.totalorder %s445_s10, %s3017_s29  ;;  %p3025_p6 = scmp.lt.s32.totalorder %s445_s10, %s445_s10 }
 0x129   : > { %p3026_p12 = scmp.lt.s32.totalorder %s3024_s18, %s3017_s29 }
 0x12a   : > { %p3020_p0 = pnand %p3018_p13, %p4457_p9 }
 0x12b   : > { %p3027_p2 = por %p3026_p12, %p3025_p6 }
 0x12c   : > { %p3021_p4 = pneg %p3020_p0 }
 0x12e   : > { %p3028_p7 = pnand %p3027_p2, %p3021_p4 }
 0x130   : > { %3031 = shalt.err (!%p3028_p7)
}
 0x131   : > { %2538 = dma.hbm_to_vmem [thread:$0]  (!%p4458_p1), %s4460_s24, 16, %s445_s10, [#allocation14]  }
 0x132   : > { %s4461_s19 = sld [smem:[#allocation67_spill]] }
 0x138   : > { %s3032_s9 = scalar_lea.hbm %s4461_s19, 16 }
 0x139   : > { %p3033_p11 = scmp.ne.s32.totalorder %s4461_s19, %s3032_s9  ;;  %p3039_p7 = scmp.lt.u32.totalorder %s3032_s9, %s4461_s19 }
 0x13b   : > { %p3035_p8 = pnand %p3033_p11, %p4457_p9 }
 0x13d   : > { %p3036_p10 = pneg %p3035_p8 }
 0x13f   : > { %p3041_p5 = pnand %p3039_p7, %p3036_p10 }
 0x141   : > { %3044 = shalt.err (!%p3041_p5)
}
 0x142   : > { %s3045_s25 = scalar_lea.vmem %s469_s0, 16  ;;  %s3052_s10 = scalar_lea.vmem %s469_s0, 32 }
 0x143   : > { %p3046_p3 = scmp.ne.s32.totalorder %s469_s0, %s3045_s25  ;;  %p3053_p4 = scmp.lt.s32.totalorder %s469_s0, %s469_s0 }
 0x144   : > { %p3054_p6 = scmp.lt.s32.totalorder %s3052_s10, %s3045_s25 }
 0x145   : > { %p3048_p13 = pnand %p3046_p3, %p4457_p9 }
 0x146   : > { %p3055_p12 = por %p3054_p6, %p3053_p4 }
 0x147   : > { %p3049_p0 = pneg %p3048_p13 }
 0x149   : > { %p3056_p2 = pnand %p3055_p12, %p3049_p0 }
 0x14b   : > { %3059 = shalt.err (!%p3056_p2)
}
 0x14c   : > { %2544 = dma.hbm_to_vmem [thread:$0]  (!%p4458_p1), %s4461_s19, 16, %s469_s0, [#allocation23]  }
 0x14d   : > { %s2480_s21 = smul.u32 40, %s3595_s14  ;;  %s2311_s7 = sshll.u32 %s3318_s16, 4 }
 0x14e   : > { %s2481_s18 = smul.u32 640, %s3322_s17  ;;  %s4462_s4 = sld [smem:[#allocation63_spill]] }
 0x14f   : > { %s4463_s30 = sld [smem:[#allocation55_spill]]  ;;  %s483_s26 = scalar_lea.vmem [#allocation4], %s2480_s21 }
 0x150   : > { %s490_s0 = sshll.u32 %s483_s26, 4  ;;  %s566_s25 = scalar_lea.vmem [#allocation18], %s3692_s12  ;;  %s3858_s0 = int_to_ptr.vmem [resolvable:$true] %s490_s0 }
 0x151   : > { %s3861_s28 = sshll.u32 %s566_s25, 4  ;;  %s480_s29 = scalar_lea.sflag [#allocation5], %s3595_s14  ;;  %s574_s28 = int_to_ptr.vmem [resolvable:$true] %s3861_s28 }
 0x152   : > { %p4465_p1 = scmp.ne.s32.totalorder %s4428_s3, 0 }
 0x154   : > { %s3851_s9 = scalar_lea.hbm %s4462_s4, %s2311_s7 }
 0x155   : > { %s4464_s10 = smov %s4463_s30  ;;  %s3856_s15 = scalar_lea.hbm %s4463_s30, %s2481_s18 }
 0x156   : > { %s3060_s20 = scalar_lea.hbm %s3856_s15, 640  ;;  %s3065_s23 = scalar_lea.hbm %s4464_s10, 1280 }
 0x157   : > { %p3061_p9 = scmp.ne.s32.totalorder %s3856_s15, %s3060_s20  ;;  %p3066_p10 = scmp.lt.u32.totalorder %s3856_s15, %s4464_s10 }
 0x158   : > { %p3067_p7 = scmp.lt.u32.totalorder %s3065_s23, %s3060_s20  ;;  %p3069_p3 = scmp.lt.u32.totalorder %s3060_s20, %s3856_s15 }
 0x159   : > { %p3063_p11 = pnand %p3061_p9, %p4465_p1 }
 0x15a   : > { %p3068_p5 = por %p3067_p7, %p3066_p10 }
 0x15b   : > { %p3064_p8 = pneg %p3063_p11 }
 0x15c   : > { %p3070_p13 = por %p3069_p3, %p3068_p5 }
 0x15e   : > { %p3071_p0 = pnand %p3070_p13, %p3064_p8 }
 0x160   : > { %3074 = shalt.err (!%p3071_p0)
}
 0x161   : > { %s3075_s21 = scalar_lea.vmem %s3858_s0, 640  ;;  %s3341_s26 = smov [#allocation4]  }
 0x162   : > { %p3076_p4 = scmp.ne.s32.totalorder %s3858_s0, %s3075_s21  ;;  %s3080_s25 = sshll.u32 %s3341_s26, 4  ;;  %s3081_s25 = int_to_ptr.vmem [resolvable:$false] %s3080_s25 }
 0x163   : > { %s3082_s5 = scalar_lea.vmem %s3081_s25, 1280  ;;  %p3083_p2 = scmp.lt.s32.totalorder %s3858_s0, %s3081_s25 }
 0x164   : > { %p3078_p6 = pnand %p3076_p4, %p4465_p1  ;;  %p3084_p9 = scmp.lt.s32.totalorder %s3082_s5, %s3075_s21 }
 0x166   : > { %p3079_p12 = pneg %p3078_p6  ;;  %p3085_p11 = por %p3084_p9, %p3083_p2 }
 0x168   : > { %p3086_p10 = pnand %p3085_p11, %p3079_p12 }
 0x16a   : > { %3089 = shalt.err (!%p3086_p10)
}
 0x16b   : > { %p4466_p8 = scmp.ne.s32.totalorder %s4426_s2, 0  ;;  %s3090_s20 = scalar_lea.hbm %s3657_s1, 512 }
 0x16c   : > { %p3091_p7 = scmp.ne.s32.totalorder %s3657_s1, %s3090_s20  ;;  %s3095_s27 = scalar_lea.hbm %s4433_s13, 1024 }
 0x16d   : > { %2548 = dma.hbm_to_vmem [thread:$0]  (!%p4466_p8), %s3856_s15, 640, %s3858_s0, %s480_s29, %s4430_s6, %s4430_s6, %s4429_s8  }
 0x16e   : > { %p3093_p5 = pnand %p3091_p7, %p4465_p1  ;;  %p3096_p13 = scmp.lt.u32.totalorder %s3657_s1, %s4433_s13 }
 0x16f   : > { %p3097_p0 = scmp.lt.u32.totalorder %s3095_s27, %s3090_s20  ;;  %p3099_p6 = scmp.lt.u32.totalorder %s3090_s20, %s3657_s1 }
 0x170   : > { %p3094_p3 = pneg %p3093_p5 }
 0x171   : > { %p3098_p4 = por %p3097_p0, %p3096_p13 }
 0x173   : > { %p3100_p12 = por %p3099_p6, %p3098_p4 }
 0x175   : > { %p3101_p2 = pnand %p3100_p12, %p3094_p3 }
 0x177   : > { %3104 = shalt.err (!%p3101_p2)
}
 0x178   : > { %s4467_s14 = sld [smem:[#allocation47_spill]]  ;;  %s3342_s0 = smov [#allocation9]  }
 0x179   : > { %s3110_s29 = sshll.u32 %s3342_s0, 4  ;;  %s3111_s29 = int_to_ptr.vmem [resolvable:$false] %s3110_s29 }
 0x17a   : > { %s3112_s26 = scalar_lea.vmem %s3111_s29, 1024 }
 0x17e   : > { %s3105_s15 = scalar_lea.vmem %s4467_s14, 512  ;;  %p3113_p7 = scmp.lt.s32.totalorder %s4467_s14, %s3111_s29 }
 0x17f   : > { %p3106_p9 = scmp.ne.s32.totalorder %s4467_s14, %s3105_s15  ;;  %p3114_p5 = scmp.lt.s32.totalorder %s3112_s26, %s3105_s15 }
 0x181   : > { %p3108_p11 = pnand %p3106_p9, %p4465_p1  ;;  %p3115_p13 = por %p3114_p5, %p3113_p7 }
 0x183   : > { %p3109_p10 = pneg %p3108_p11 }
 0x185   : > { %p3116_p0 = pnand %p3115_p13, %p3109_p10 }
 0x187   : > { %3119 = shalt.err (!%p3116_p0)
}
 0x188   : > { %s4468_s25 = scalar_lea.sflag [#allocation8], %s3598_s22  ;;  %s4469_s3 = sld [smem:[#allocation54_spill]] }
 0x189   : > { %2554 = dma.hbm_to_vmem [thread:$0]  (!%p4466_p8), %s3657_s1, 512, %s4467_s14, %s4468_s25, %s4430_s6, %s4430_s6, %s4429_s8  }
 0x18a   : > { %s3120_s5 = scalar_lea.hbm %s3851_s9, 16  ;;  %s3125_s18 = scalar_lea.hbm %s4462_s4, 256 }
 0x18b   : > { %p3121_p1 = scmp.ne.s32.totalorder %s3851_s9, %s3120_s5  ;;  %p3126_p12 = scmp.lt.u32.totalorder %s3851_s9, %s4462_s4 }
 0x18c   : > { %p3127_p2 = scmp.lt.u32.totalorder %s3125_s18, %s3120_s5  ;;  %p3129_p11 = scmp.lt.u32.totalorder %s3120_s5, %s3851_s9 }
 0x18e   : > { %p4470_p3 = scmp.ne.s32.totalorder %s4469_s3, 0  ;;  %p3128_p9 = por %p3127_p2, %p3126_p12 }
 0x190   : > { %p3123_p4 = pnand %p3121_p1, %p4470_p3  ;;  %p3130_p10 = por %p3129_p11, %p3128_p9 }
 0x192   : > { %p3124_p6 = pneg %p3123_p4 }
 0x194   : > { %p3131_p7 = pnand %p3130_p10, %p3124_p6 }
 0x196   : > { %3134 = shalt.err (!%p3131_p7)
}
 0x197   : > { %s3135_s1 = scalar_lea.vmem %s574_s28, 16  ;;  %s3343_s8 = smov [#allocation18]  }
 0x198   : > { %p3136_p8 = scmp.ne.s32.totalorder %s574_s28, %s3135_s1  ;;  %s3140_s6 = sshll.u32 %s3343_s8, 4  ;;  %s3141_s6 = int_to_ptr.vmem [resolvable:$false] %s3140_s6 }
 0x199   : > { %s3142_s30 = scalar_lea.vmem %s3141_s6, 32  ;;  %p3143_p0 = scmp.lt.s32.totalorder %s574_s28, %s3141_s6 }
 0x19a   : > { %p3138_p5 = pnand %p3136_p8, %p4470_p3  ;;  %p3144_p1 = scmp.lt.s32.totalorder %s3142_s30, %s3135_s1 }
 0x19c   : > { %p3139_p13 = pneg %p3138_p5  ;;  %p3145_p4 = por %p3144_p1, %p3143_p0 }
 0x19e   : > { %p3146_p2 = pnand %p3145_p4, %p3139_p13 }
 0x1a0   : > { %3149 = shalt.err (!%p3146_p2)
}
 0x1a1   : > { %s4471_s21 = sld [smem:[#allocation52_spill]]  ;;  %s4473_s14 = scalar_lea.sflag [#allocation17], %s3598_s22 }
 0x1a2   : > { %s4474_s29 = sld [smem:[#allocation65_spill]]  ;;  %s604_s25 = scalar_lea.vmem [#allocation21], %s3692_s12 }
 0x1a3   : > { %s611_s2 = sshll.u32 %s604_s25, 4  ;;  %s612_s2 = int_to_ptr.vmem [resolvable:$true] %s611_s2 }
 0x1a7   : > { %p4472_p12 = scmp.ne.s32.totalorder %s4471_s21, 0 }
 0x1a8   : > { %s4475_s5 = smov %s4474_s29  ;;  %s3941_s26 = scalar_lea.hbm %s4474_s29, %s2311_s7 }
 0x1a9   : > { %2560 = dma.hbm_to_vmem [thread:$0]  (!%p4472_p12), %s3851_s9, 16, %s574_s28, %s4473_s14  }
 0x1aa   : > { %s3150_s20 = scalar_lea.hbm %s3941_s26, 16  ;;  %s3155_s28 = scalar_lea.hbm %s4475_s5, 256 }
 0x1ab   : > { %p3151_p6 = scmp.ne.s32.totalorder %s3941_s26, %s3150_s20  ;;  %p3156_p10 = scmp.lt.u32.totalorder %s3941_s26, %s4475_s5 }
 0x1ac   : > { %p3157_p7 = scmp.lt.u32.totalorder %s3155_s28, %s3150_s20  ;;  %p3159_p5 = scmp.lt.u32.totalorder %s3150_s20, %s3941_s26 }
 0x1ad   : > { %p3153_p9 = pnand %p3151_p6, %p4470_p3 }
 0x1ae   : > { %p3158_p8 = por %p3157_p7, %p3156_p10 }
 0x1af   : > { %p3154_p11 = pneg %p3153_p9 }
 0x1b0   : > { %p3160_p13 = por %p3159_p5, %p3158_p8 }
 0x1b2   : > { %p3161_p0 = pnand %p3160_p13, %p3154_p11 }
 0x1b4   : > { %3164 = shalt.err (!%p3161_p0)
}
 0x1b5   : > { %s3165_s12 = scalar_lea.vmem %s612_s2, 16  ;;  %s3344_s7 = smov [#allocation21]  }
 0x1b6   : > { %p3166_p1 = scmp.ne.s32.totalorder %s612_s2, %s3165_s12  ;;  %s3170_s1 = sshll.u32 %s3344_s7, 4  ;;  %s3171_s1 = int_to_ptr.vmem [resolvable:$false] %s3170_s1 }
 0x1b7   : > { %s3172_s8 = scalar_lea.vmem %s3171_s1, 32  ;;  %p3173_p6 = scmp.lt.s32.totalorder %s612_s2, %s3171_s1 }
 0x1b8   : > { %p3168_p4 = pnand %p3166_p1, %p4470_p3  ;;  %p3174_p9 = scmp.lt.s32.totalorder %s3172_s8, %s3165_s12 }
 0x1ba   : > { %p3169_p2 = pneg %p3168_p4  ;;  %p3175_p12 = por %p3174_p9, %p3173_p6 }
 0x1bc   : > { %p3176_p7 = pnand %p3175_p12, %p3169_p2 }
 0x1be   : > { %3179 = shalt.err (!%p3176_p7)
}
 0x1bf   : > { %p4476_p10 = scmp.ne.s32.totalorder %s4471_s21, 0  ;;  %s4477_s6 = scalar_lea.sflag [#allocation20], %s3598_s22 }
 0x1c0   : > { %s4478_s30 = sld [smem:[#allocation43_spill]] }
 0x1c1   : > { %2566 = dma.hbm_to_vmem [thread:$0]  (!%p4476_p10), %s3941_s26, 16, %s612_s2, %s4477_s6  }
 0x1c6   : > { %p4479_p11 = scmp.ne.s32.totalorder %s4478_s30, 0 }
 0x1c7   : > { %s4480_s3 = sld [smem:[#allocation37_spill]] (!%p4479_p11)  ;;  %s4481_s14 = sld [smem:[#allocation44_spill]] (!%p4479_p11) }
 0x1c8   : > { %620 = sbr.rel (%p4479_p11) target bundleno = 2594 (0xa22), region = 72 }
 0x1cd   : > { %s3966_s15 = sand.u32 (!%p4479_p11), 1, %s4480_s3   ;;  %p4482_p3 = scmp.ne.s32.totalorder (!%p4479_p11), %s4481_s14, 0 }
 0x1ce   : > { %s2484_s0 = smul.u32 (!%p4479_p11), 40, %s3966_s15  ;;  %s623_s29 = scalar_lea.sflag (!%p4479_p11), [#allocation5], %s3966_s15 }
 0x1d0   : > { %s3970_s25 = scalar_lea.vmem [#allocation4], %s2484_s0 }
 0x1d1   : > { %3253 = dma.done.wait (%p4482_p3), %s623_s29, 640  }
 0x1d2   : > { %3255 = vsyncadd (%p4482_p3), %s623_s29, 4294966656  ;;  %s4483_s22 = sld [smem:[#allocation42_spill]]  ;;  %s2317_s26 = sshll.u32 %s3966_s15, 5 }
 0x1d3   : > { %s635_s20 = scalar_lea.vmem [#allocation7], %s2317_s26 }
 0x1d8   : > { %s631_s21 = sand.u32 1, %s4483_s22  }
 0x1d9   : > { %s632_s2 = scalar_lea.sflag [#allocation8], %s631_s21 }
 0x1da   : > { %3257 = dma.done.wait (%p4482_p3), %s632_s2, 1024  }
 0x1db   : > { %3259 = vsyncadd (%p4482_p3), %s632_s2, 4294966272  ;;  %s3982_s18 = scalar_lea.vmem [#allocation9], %s2317_s26  ;;  %p4484_p12 = scmp.eq.s32.totalorder %s4483_s22, 0 }
 0x1dd   : > { %3261 = dma.done.wait (%p4484_p12), [#allocation11], 2048   ;;  %p4485_p8 = pmov %p4484_p12 }
 0x1df   : > { %3263 = vsyncadd (%p4485_p8), [#allocation11], 4294965248  ;;  %p4486_p5 = pmov %p4485_p8 }
 0x1e1   : > { %3265 = dma.done.wait (%p4486_p5), [#allocation14], 144   ;;  %p4487_p13 = pmov %p4486_p5 }
 0x1e2   : > { %s4488_s9 = sld [smem:[#allocation34_spill]]  ;;  %s4489_s28 = sld [smem:[#allocation49_spill]] }
 0x1e3   : > { %3267 = vsyncadd (%p4487_p13), [#allocation14], 4294967152  ;;  %s666_s12 = scalar_lea.sflag [#allocation17], %s631_s21 }
 0x1e8   : > { %s3993_s23 = sand.u32 1, %s4488_s9   ;;  %p4490_p0 = scmp.ne.s32.totalorder %s4489_s28, 0 }
 0x1e9   : > { %s2485_s27 = smul.u32 80, %s3993_s23 }
 0x1eb   : > { %s3996_s7 = scalar_lea.vmem [#allocation16], %s2485_s27 }
 0x1ec   : > { %3269 = dma.done.wait (%p4490_p0), %s666_s12, 1296  }
 0x1ed   : > { %3271 = vsyncadd (%p4490_p0), %s666_s12, 4294966000  ;;  %s2323_s1 = sshll.u32 %s3993_s23, 4  ;;  %s677_s8 = scalar_lea.vmem [#allocation18], %s3993_s23 }
 0x1ee   : > { %s683_s6 = scalar_lea.sflag [#allocation20], %s631_s21  ;;  %s4004_s30 = scalar_lea.vmem [#allocation19], %s2323_s1 }
 0x1ef   : > { %3273 = dma.done.wait (%p4490_p0), %s683_s6, 272  }
 0x1f0   : > { %3275 = vsyncadd (%p4490_p0), %s683_s6, 4294967024  ;;  %s694_s3 = scalar_lea.vmem [#allocation21], %s3993_s23  ;;  %p4491_p1 = pmov %p4486_p5 }
 0x1f2   : > { %3277 = dma.done.wait (%p4491_p1), [#allocation23], 272   ;;  %p4492_p4 = pmov %p4491_p1 }
 0x1f3   : > { %v4015_v0 = vld [vmem:[%s635_s20] sm:$0xff]  ;;  %v4017_v1 = vld [vmem:[%s635_s20 + $0x8] sm:$0xff]  ;;  %v4019_v2 = vld [vmem:[%s635_s20 + $0x10] sm:$0xff]  ;;  %s4023_s14 = scalar_lea.vmem [#allocation25], %s2317_s26  ;;  %s4493_s0 = sld [smem:[#allocation39_spill]] }
 0x1f4   : > { %3279 = vsyncadd (%p4492_p4), [#allocation23], 4294967024  ;;  %v4021_v3 = vld [vmem:[%s635_s20 + $0x18] sm:$0xff] }
 0x1f9   : > { %p2327_p2 = scmp.ne.s32.totalorder %s4493_s0, 0 }
 0x1fa   : > { %v2695_v4 = vld [vmem:[#allocation10 + $0x4] ss:$8 sps:$4 sm:$0xff] (!%p2327_p2)   ;;  %v2697_v5 = vld [vmem:[#allocation10] ss:$8 sps:$4 sm:$0xff] (!%p2327_p2)   ;;  %v3345_v6 = vmov (!%p2327_p2), 0   ;;  %v790_v7 = vld [vmem:[%s3970_s25] sm:$0xff] (!%p2327_p2) }
 0x1fb   : > { %781 = sbr.rel (%p2327_p2) target bundleno = 1230 (0x4ce), region = 128  ;;  %935 = vmatprep.mubr.bf16.mxu0 (!%p2327_p2), %v3345_v6  ;;  %v791_v8 = vld [vmem:[%s3970_s25 + $0x8] sm:$0xff] (!%p2327_p2)  ;;  %868 = vmatprep.mubr.bf16.mxu1 (!%p2327_p2), %v3345_v6  ;;  %vm829_vm0 = vcmask (!%p2327_p2), 130048   ;;  %v792_v12 = vld [vmem:[%s3970_s25 + $0x10] sm:$0xff] (!%p2327_p2)  ;;  %v793_v13 = vld [vmem:[%s3970_s25 + $0x18] sm:$0xff] (!%p2327_p2)  ;;  %vm959_vm2 = vcmask (!%p2327_p2), 1046528  }
 0x1fc   : > { %903 = vmatprep.subr.bf16.mxu0 (!%p2327_p2), %v2695_v4  ;;  %v795_v9 = vpack.c.bf16 (!%p2327_p2), %v791_v8, %v790_v7  ;;  %v2698_v10 = vld [vmem:[#allocation10 + $0x20] ss:$8 sps:$4 sm:$0xff] (!%p2327_p2)   ;;  %2694 = vset.pattern.permute.xlu1 (!%p2327_p2), %v3345_v6  ;;  %v2700_v11 = vld [vmem:[#allocation10 + $0x24] ss:$8 sps:$4 sm:$0xff] (!%p2327_p2)   ;;  %v796_v14 = vpack.c.bf16 (!%p2327_p2), %v793_v13, %v792_v12  ;;  %v2703_v16 = vld [vmem:[#allocation10 + $0x34] ss:$8 sps:$4 sm:$0xff] (!%p2327_p2)  }
 0x1fd   : > { %904 = vmatpush1.bf16.msra.mxu0 (!%p2327_p2), %v2697_v5  ;;  %2693 = vset.pattern.permute.xlu0 (!%p2327_p2), %v3345_v6  ;;  %v794_v17 = vld [vmem:[%s3970_s25 + $0x20] sm:$0x7] (!%p2327_p2)  ;;  %v2704_v19 = vld [vmem:[#allocation10 + $0x14] ss:$8 sps:$4 sm:$0xff] (!%p2327_p2)   ;;  %vm798_vm1 = vsmask.f32 (!%p2327_p2), 7424 }
 0x1fe   : > { %v800_v15 = vshrl.u32 (!%p2327_p2), %v795_v9, 16  ;;  %1376 = vperm.xlu1 (!%p2327_p2), %2694, %v4019_v2   ;;  %1366 = vperm.xlu0 (!%p2327_p2), %2693, %v4015_v0   ;;  %v802_v18 = vshll.u32 (!%p2327_p2), %v795_v9, 16  ;;  %v807_v20 = vshll.u32 (!%p2327_p2), %v796_v14, 16  ;;  %v797_v21 = vpack.c.bf16 (!%p2327_p2), %v794_v17, %v794_v17  ;;  %v2706_v22 = vld [vmem:[#allocation10 + $0x10] ss:$8 sps:$4 sm:$0xff] (!%p2327_p2)   ;;  %v2707_v50 = vld [vmem:[#allocation12] sm:$0xff] (!%p2327_p2)  }
 0x1ff   : > { %981 = vmatprep.subr.bf16.mxu0 (!%p2327_p2), %v2700_v11  ;;  %836 = vmatprep.subr.bf16.mxu1 (!%p2327_p2), %v2704_v19  ;;  %v811_v27 = vshrl.u32 (!%p2327_p2), %v796_v14, 16  ;;  %v960_v28 = vrot.slane (!%p2327_p2), %v795_v9, 1  ;;  %v961_v30 = vrot.slane (!%p2327_p2), %v796_v14, 1  ;;  %v2701_v35 = vld [vmem:[#allocation10 + $0x30] ss:$8 sps:$4 sm:$0xff] (!%p2327_p2)   ;;  %v2708_v51 = vld [vmem:[#allocation12 + $0x8] sm:$0xff] (!%p2327_p2)  }
 0x200   : > { %2334 = vmatmul.mubr.msk.bf16.vlgmr.msra.gmra.mrb[0].mxu0 (!%p2327_p2), %vm829_vm0, %v795_v9  ;;  %v804_v23 = vrot.slane (!%p2327_p2), %v802_v18, 1  ;;  %v809_v24 = vrot.slane (!%p2327_p2), %v807_v20, 1  ;;  %837 = vmatpush1.bf16.msra.mxu1 (!%p2327_p2), %v2706_v22  ;;  %v815_v26 = vshll.u32 (!%p2327_p2), %v797_v21, 16  ;;  %v963_v36 = vrot.slane (!%p2327_p2), %v797_v21, 1  ;;  %v2709_v52 = vld [vmem:[#allocation12 + $0x10] sm:$0xff] (!%p2327_p2)   ;;  %v2710_v53 = vld [vmem:[#allocation12 + $0x18] sm:$0xff] (!%p2327_p2)  }
 0x201   : > { %982 = vmatpush1.bf16.msra.mxu0 (!%p2327_p2), %v2698_v10  ;;  %945 = vmatprep.mubr.bf16.mxu0 (!%p2327_p2), %v3345_v6  ;;  %v962_v34 = vsel (!%p2327_p2), %vm959_vm2, %v960_v28, %v961_v30  ;;  %v1043_v37 = vrot.slane (!%p2327_p2), %v800_v15, 1  ;;  %v1044_v39 = vrot.slane (!%p2327_p2), %v802_v18, 2  ;;  %v1047_v40 = vrot.slane (!%p2327_p2), %v807_v20, 2  ;;  %v2711_v54 = vld [vmem:[#allocation12 + $0x20] sm:$0xff] (!%p2327_p2)   ;;  %v2712_v55 = vld [vmem:[#allocation12 + $0x28] sm:$0xff] (!%p2327_p2)   ;;  %v2713_v56 = vld [vmem:[#allocation12 + $0x30] sm:$0xff] (!%p2327_p2)  }
 0x202   : > { %1072 = vmatprep.subr.bf16.mxu0 %v2703_v16  ;;  %v805_v25 = vor.u32 %v804_v23, %v800_v15  ;;  %1381 = vperm.xlu1 %2694, %v4021_v3   ;;  %v817_v31 = vrot.slane %v815_v26, 1  ;;  %v813_v32 = vor.u32 %v811_v27, %v809_v24  ;;  %v964_v38 = vsel %vm959_vm2, %v961_v30, %v963_v36  ;;  %v2714_v57 = vld [vmem:[#allocation12 + $0x38] sm:$0xff]   ;;  %v4055_v58 = vld [vmem:[#allocation13] sm:$0xff]  }
 0x203   : > { %1371 = vperm.xlu0 %2693, %v4017_v1   ;;  %v1046_v41 = vrot.slane %v811_v27, 1  ;;  %v1045_v42 = vor.u32 %v1044_v39, %v1043_v37  ;;  %v1050_v44 = vshrl.u32 %v797_v21, 16  ;;  %vm1042_vm3 = vsmask.f32 6400  ;;  %2414 = vmatprep.subr.bf16.mxu1 %v2707_v50 }
 0x204   : > { %v810_v29 = vsel %vm798_vm1, %v805_v25, %v809_v24  ;;  %v818_v33 = vsel %vm798_vm1, %v813_v32, %v817_v31  ;;  %v1053_v47 = vrot.slane %v815_v26, 2  ;;  %vm1388_vm12 = vcmask 261120  }
 0x205   : > { %2330 = vmatmul.mubr.msk.bf16.vlgmr.msra.gmra.mrb[0].mxu1 %vm829_vm0, %v810_v29  ;;  %v1048_v43 = vor.u32 %v1047_v40, %v1046_v41  ;;  %v1052_v46 = vrot.slane %v1050_v44, 1 }
 0x206   : > { %878 = vmatprep.mubr.bf16.mxu1 %v3345_v6  ;;  %2415 = vmatpush3.bf16.msra.mxu1 %v2707_v50 }
 0x207   : > { %v1049_v45 = vsel %vm1042_vm3, %v1045_v42, %v1048_v43  ;;  %v1054_v48 = vor.u32 %v1053_v47, %v1052_v46  ;;  %2416 = vmatprep.subr.bf16.mxu1 %v2708_v51 }
 0x208   : > { %2335 = vmatmul.mubr.msk.bf16.gmra.mrb[4].mxu0 %vm829_vm0, %v796_v14 }
 0x209   : > { %1013 = vmatprep.mubr.bf16.mxu0 %v3345_v6  ;;  %v1055_v49 = vsel %vm1042_vm3, %v1048_v43, %v1054_v48 }
 0x20a   : > { %2417 = vmatpush3.bf16.msra.mxu1 %v2708_v51 }
 0x20b   : > { %2418 = vmatprep.subr.bf16.mxu1 %v2709_v52 }
 0x20d   : > { %2331 = vmatmul.mubr.msk.bf16.gmra.mrb[4].mxu1 %vm829_vm0, %v818_v33 }
 0x20e   : > { %2419 = vmatpush3.bf16.msra.mxu1 %v2709_v52 }
 0x20f   : > { %2420 = vmatprep.subr.bf16.mxu1 %v2710_v53 }
 0x210   : > { %2338 = vmatmul.mubr.msk.bf16.vlgmr.msra.gmra.mrb[0].mxu0 %vm829_vm0, %v962_v34 }
 0x211   : > { %1073 = vmatpush1.bf16.msra.mxu0 %v2701_v35  ;;  %1023 = vmatprep.mubr.bf16.mxu0 %v3345_v6 }
 0x212   : > { %2421 = vmatpush3.bf16.msra.mxu1 %v2710_v53 }
 0x213   : > { %2422 = vmatprep.subr.bf16.mxu1 %v2711_v54 }
 0x216   : > { %2423 = vmatpush3.bf16.msra.mxu1 %v2711_v54 }
 0x217   : > { %2424 = vmatprep.subr.bf16.mxu1 %v2712_v55 }
 0x218   : > { %2339 = vmatmul.mubr.msk.bf16.gmra.mrb[4].mxu0 %vm829_vm0, %v964_v38 }
 0x219   : > { %1104 = vmatprep.mubr.bf16.mxu0 %v3345_v6 }
 0x21a   : > { %2425 = vmatpush3.bf16.msra.mxu1 %v2712_v55 }
 0x21b   : > { %2426 = vmatprep.subr.bf16.mxu1 %v2713_v56 }
 0x21e   : > { %2427 = vmatpush3.bf16.msra.mxu1 %v2713_v56 }
 0x21f   : > { %2428 = vmatprep.subr.bf16.mxu1 %v2714_v57 }
 0x220   : > { %2342 = vmatmul.mubr.msk.bf16.vlgmr.msra.gmra.mrb[0].mxu0 %vm829_vm0, %v1049_v45 }
 0x221   : > { %1114 = vmatprep.mubr.bf16.mxu0 %v3345_v6 }
 0x222   : > { %2429 = vmatpush3.bf16.msra.mxu1 %v2714_v57 }
 0x223   : > { %2434 = vmatprep.subr.bf16.mxu1 %v4055_v58 }
 0x228   : > { %2343 = vmatmul.mubr.msk.bf16.gmra.mrb[4].mxu0 %vm829_vm0, %v1055_v49 }
 0x2d8   : > { %v870_v59 = vpop.f32.mrb[0].mxu1 }
 0x2d9   : > { %v872_v60 = vpop.f32.mrb[1].mxu1 }
 0x2da   : > { %v874_v61 = vpop.f32.mrb[2].mxu1 }
 0x2db   : > { %v876_v62 = vpop.f32.mrb[3].mxu1 }
 0x2e0   : > { %v880_v63 = vpop.f32.mrb[4].mxu1 }
 0x2e1   : > { %v882_v4 = vpop.f32.mrb[5].mxu1 }
 0x2e2   : > { %v884_v5 = vpop.f32.mrb[6].mxu1 }
 0x2e3   : > { %v886_v6 = vpop.f32.mrb[7].mxu1 }
 0x2f3   : > { %v1106_v7 = vpop.f32.mrb[0].mxu0 }
 0x2f4   : > { %v2456_v8 = vadd.f32 %v1106_v7, %v870_v59  ;;  %v1108_v9 = vpop.f32.mrb[1].mxu0 }
 0x2f5   : > { %v2457_v10 = vadd.f32 %v1108_v9, %v872_v60  ;;  %v1110_v11 = vpop.f32.mrb[2].mxu0  ;;  %v2352_v9 = vld [vmem:[#allocation15] ss:$0 sm:$0xff] }
 0x2f6   : > { %v1133_v12 = vmul.f32 %v2456_v8, %v2456_v8  ;;  %v2458_v13 = vadd.f32 %v1110_v11, %v874_v61  ;;  %v1112_v14 = vpop.f32.mrb[3].mxu0  ;;  %v3346_v8 = vmov 0.0  }
 0x2f7   : > { %v1137_v15 = vmul.f32 %v2457_v10, %v2457_v10  ;;  %v2459_v16 = vadd.f32 %v1112_v14, %v876_v62  ;;  %1393 = vst.msk [vmem:[#allocation3] sm:$0xff] %vm1388_vm12, %v3346_v8  ;;  %1394 = vst.msk [vmem:[#allocation3 + $0x8] sm:$0xff] %vm1388_vm12, %v3346_v8  ;;  %v1367_v10 = vpop.permute.xlu0 %1366 }
 0x2f8   : > { %v1134_v17 = vmul.f32 %v2458_v13, %v2458_v13  ;;  %1395 = vst.msk [vmem:[#allocation3 + $0x10] sm:$0xff] %vm1388_vm12, %v3346_v8  ;;  %1396 = vst.msk [vmem:[#allocation3 + $0x18] sm:$0xff] %vm1388_vm12, %v3346_v8 }
 0x2f9   : > { %v1141_v18 = vadd.f32 %v1137_v15, %v1133_v12  ;;  %v1138_v19 = vmul.f32 %v2459_v16, %v2459_v16 }
 0x2fb   : > { %v1145_v20 = vadd.f32 1e-06, %v1141_v18  ;;  %v1142_v21 = vadd.f32 %v1138_v19, %v1134_v17  ;;  %v1116_v22 = vpop.f32.mrb[4].mxu0 }
 0x2fc   : > { %v2460_v23 = vadd.f32 %v1116_v22, %v880_v63  ;;  %v1118_v24 = vpop.f32.mrb[5].mxu0  ;;  %v1372_v22 = vpop.permute.xlu0 %1371 }
 0x2fd   : > { %2716 = vrsqrt.f32 %v1145_v20  ;;  %v1146_v25 = vadd.f32 1e-06, %v1142_v21  ;;  %v2461_v26 = vadd.f32 %v1118_v24, %v882_v4  ;;  %v1120_v27 = vpop.f32.mrb[6].mxu0  ;;  %vm1151_vm4 = vcmp.eq.f32.partialorder %v1145_v20, inf }
 0x2fe   : > { %v1135_v28 = vmul.f32 %v2460_v23, %v2460_v23  ;;  %v2462_v29 = vadd.f32 %v1120_v27, %v884_v5  ;;  %v1122_v30 = vpop.f32.mrb[7].mxu0  ;;  %v1154_v44 = vand.u32 2147483648, %v1145_v20  ;;  %vm1153_vm6 = vcmp.eq.f32.partialorder %v1145_v20, 0.0 }
 0x2ff   : > { %2718 = vrsqrt.f32 %v1146_v25  ;;  %v1139_v31 = vmul.f32 %v2461_v26, %v2461_v26  ;;  %v2463_v32 = vadd.f32 %v1122_v30, %v886_v6  ;;  %vm1158_vm5 = vcmp.eq.f32.partialorder %v1146_v25, inf }
 0x300   : > { %v1136_v33 = vmul.f32 %v2462_v29, %v2462_v29  ;;  %v1161_v45 = vand.u32 2147483648, %v1146_v25  ;;  %vm1160_vm7 = vcmp.eq.f32.partialorder %v1146_v25, 0.0 }
 0x301   : > { %v1143_v34 = vadd.f32 %v1139_v31, %v1135_v28  ;;  %v1140_v35 = vmul.f32 %v2463_v32, %v2463_v32 }
 0x303   : > { %v1147_v36 = vadd.f32 1e-06, %v1143_v34  ;;  %v1144_v37 = vadd.f32 %v1140_v35, %v1136_v33 }
 0x305   : > { %2720 = vrsqrt.f32 %v1147_v36  ;;  %v1148_v38 = vadd.f32 1e-06, %v1144_v37  ;;  %vm1165_vm8 = vcmp.eq.f32.partialorder %v1147_v36, inf  ;;  %v1168_v55 = vand.u32 2147483648, %v1147_v36 }
 0x306   : > { %vm1167_vm10 = vcmp.eq.f32.partialorder %v1147_v36, 0.0 }
 0x307   : > { %v2717_v39 = vpop.eup %2716  ;;  %2722 = vrsqrt.f32 %v1148_v38  ;;  %vm1172_vm9 = vcmp.eq.f32.partialorder %v1148_v38, inf  ;;  %v1175_v56 = vand.u32 2147483648, %v1148_v38  ;;  %vm1174_vm11 = vcmp.eq.f32.partialorder %v1148_v38, 0.0 }
 0x308   : > { %v1150_v40 = vmul.f32 %v2717_v39, %v1145_v20 }
 0x309   : > { %v2719_v41 = vpop.eup %2718 }
 0x30a   : > { %v1152_v42 = vsel %vm1151_vm4, %v1145_v20, %v1150_v40  ;;  %v1157_v43 = vmul.f32 %v2719_v41, %v1146_v25 }
 0x30b   : > { %v1155_v47 = vsel %vm1153_vm6, %v1154_v44, %v1152_v42 }
 0x30c   : > { %v1159_v46 = vsel %vm1158_vm5, %v1146_v25, %v1157_v43 }
 0x30d   : > { %v1162_v48 = vsel %vm1160_vm7, %v1161_v45, %v1159_v46 }
 0x30e   : > { %v1177_v49 = vpack.c.bf16 %v1162_v48, %v1155_v47 }
 0x30f   : > { %v2721_v50 = vpop.eup %2720 }
 0x310   : > { %2430 = vmatprep.mubr.bf16.mxu1 %v1177_v49  ;;  %v1164_v51 = vmul.f32 %v2721_v50, %v1147_v36 }
 0x311   : > { %v2723_v52 = vpop.eup %2722 }
 0x312   : > { %v1166_v53 = vsel %vm1165_vm8, %v1147_v36, %v1164_v51  ;;  %v1171_v54 = vmul.f32 %v2723_v52, %v1148_v38 }
 0x313   : > { %v1169_v59 = vsel %vm1167_vm10, %v1168_v55, %v1166_v53 }
 0x314   : > { %v1173_v57 = vsel %vm1172_vm9, %v1148_v38, %v1171_v54 }
 0x315   : > { %v1176_v60 = vsel %vm1174_vm11, %v1175_v56, %v1173_v57 }
 0x316   : > { %v1178_v61 = vpack.c.bf16 %v1176_v60, %v1169_v59 }
 0x318   : > { %2431 = vmatmul.mubr.bf16.vlgmr.msra.gmra.mrb[8].mxu1 %v1178_v61 }
 0x319   : > { %2435 = vmatpush3.bf16.msra.mxu1 %v4055_v58  ;;  %v1377_v58 = vpop.permute.xlu1 %1376 }
 0x31d   : > { %v1382_v20 = vpop.permute.xlu1 %1381 }
 0x3eb   : > { %v2432_v62 = vpop.f32.mrb[8].mxu1 }
 0x3ec   : > { %v1277_v63 = vpop.f32.mrb[9].mxu1 }
 0x3ed   : > { %v2433_v4 = vpop.f32.mrb[10].mxu1 }
 0x3ee   : > { %v1293_v5 = vpack.c.bf16 %v2433_v4, %v2432_v62  ;;  %v1280_v6 = vpop.f32.mrb[11].mxu1 }
 0x3ef   : > { %v1292_v7 = vpack.c.bf16 %v1280_v6, %v1277_v63 }
 0x3f1   : > { %2436 = vmatprep.mubr.msk.bf16.mxu1 %vm829_vm0, %v1292_v7 }
 0x3f2   : > { %2437 = vmatmul.mubr.msk.bf16.vlgmr.msra.gmra.mrb[12].mxu1 %vm829_vm0, %v1293_v5 }
 0x4c5   : > { %v2438_v11 = vpop.f32.mrb[12].mxu1 }
 0x4c6   : > { %v1358_v12 = vadd.f32 %v2438_v11, %v2352_v9  ;;  %v1349_v13 = vpop.f32.mrb[13].mxu1 }
 0x4c7   : > { %v1350_v14 = vadd.f32 %v2352_v9, %v1349_v13  ;;  %v2439_v15 = vpop.f32.mrb[14].mxu1 }
 0x4c8   : > { %v1386_v16 = vmul.f32 %v1377_v58, %v1358_v12  ;;  %v1361_v17 = vadd.f32 %v2439_v15, %v2352_v9  ;;  %v1352_v18 = vpop.f32.mrb[15].mxu1 }
 0x4c9   : > { %v1384_v19 = vmul.f32 %v1367_v10, %v1350_v14  ;;  %v1353_v21 = vadd.f32 %v2352_v9, %v1352_v18 }
 0x4ca   : > { %1391 = vst.msk [vmem:[#allocation2 + $0x10] sm:$0xff] %vm1388_vm12, %v1386_v16  ;;  %v1387_v23 = vmul.f32 %v1382_v20, %v1361_v17 }
 0x4cb   : > { %1389 = vst.msk [vmem:[#allocation2] sm:$0xff] %vm1388_vm12, %v1384_v19  ;;  %v1385_v24 = vmul.f32 %v1372_v22, %v1353_v21 }
 0x4cc   : > { %1392 = vst.msk [vmem:[#allocation2 + $0x18] sm:$0xff] %vm1388_vm12, %v1387_v23 }
 0x4cd   : > { %1390 = vst.msk [vmem:[#allocation2 + $0x8] sm:$0xff] %vm1388_vm12, %v1385_v24 }
 0x4ce PF: > { %vm1405_vm13 = vcmask 1041408   ;;  %vm1422_vm14 = vcmask 1046528   ;;  %vm1466_vm15 = vcmask 1044480   ;;  %vm1444_vm0 = vcmask 1045504   ;;  %v2756_v32 = vld [vmem:[%s3996_s7] sm:$0xff]   ;;  %v2757_v46 = vld [vmem:[%s3996_s7 + $0x8] sm:$0xff]  }
 0x4cf   : > { %v3347_v37 = vmov 0   ;;  %v2758_v60 = vld [vmem:[%s3996_s7 + $0x10] sm:$0xff]   ;;  %s3348_s29 = smov 32   ;;  %s3349_s25 = smov 96   ;;  %v2759_v13 = vld [vmem:[%s3996_s7 + $0x18] sm:$0xff]   ;;  %vm1488_vm1 = vcmask 1043456  }
 0x4d0   : > { %1614 = vmatprep.subr.bf16.mxu0 %v3347_v37  ;;  %2755 = vset.pattern.permute.xlu1 %v3347_v37  ;;  %s3350_s22 = smov 64   ;;  %v2760_v19 = vld [vmem:[%s3996_s7 + $0x20] sm:$0xff]   ;;  %vm1502_vm2 = vcmask 261120   ;;  %vm1507_vm3 = vcmask 523264   ;;  %vm1512_vm4 = vcmask 785408   ;;  %s4494_s21 = sld [smem:[#allocation39_spill]] }
 0x4d1   : > { %v4073_v27 = vld [vmem:[#allocation2 + $0x10] sm:$0xff]  ;;  %1615 = vmatpush1.bf16.msra.mxu0 %v2756_v32  ;;  %2754 = vset.pattern.permute.xlu0 %v3347_v37 }
 0x4d2   : > { %v4069_v25 = vld [vmem:[#allocation2] sm:$0xff]  ;;  %v1409_v30 = vrot.slane %v4073_v27, 6  ;;  %1616 = vmatprep.subr.bf16.mxu0 %v3347_v37 }
 0x4d3   : > { %v1406_v28 = vrot.slane %v4069_v25, 6  ;;  %v4078_v31 = vld [vmem:[#allocation2 + $0x18] sm:$0xff] }
 0x4d4   : > { %v4071_v26 = vld [vmem:[#allocation2 + $0x8] sm:$0xff]  ;;  %v1411_v36 = vrot.slane %v4078_v31, 6 }
 0x4d5   : > { %v1407_v29 = vrot.slane %v4071_v26, 6  ;;  %v4088_v35 = vsel %vm1405_vm13, 0.0, %v1406_v28  ;;  %1617 = vmatpush1.bf16.msra.mxu0 %v2757_v46  ;;  %v2761_v32 = vld [vmem:[%s3996_s7 + $0x28] sm:$0xff]  }
 0x4d6   : > { %v1423_v38 = vrot.slane %v4088_v35, 1  ;;  %v1467_v41 = vrot.slane %v4088_v35, 3  ;;  %v1445_v44 = vrot.slane %v4088_v35, 2  ;;  %v4108_v50 = vsel %vm1405_vm13, %v1409_v30, %v1411_v36  ;;  %1618 = vmatprep.subr.bf16.mxu0 %v3347_v37  ;;  %p2378_p6 = scmp.ne.s32.totalorder %s4494_s21, 15 }
 0x4d7   : > { %v4082_v33 = vsel %vm1405_vm13, %v1406_v28, %v1407_v29  ;;  %v4085_v34 = vsel %vm1405_vm13, %v1407_v29, %v1409_v30  ;;  %v1419_v57 = vsel %vm1405_vm13, %v1411_v36, 0.0  ;;  %v1428_v59 = vrot.slane %v4108_v50, 1  ;;  %v2762_v36 = vld [vmem:[%s3996_s7 + $0x30] sm:$0xff]   ;;  %s3351_s26 = smov (!%p2378_p6), 96   ;;  %s3352_s2 = smov (!%p2378_p6), 64  }
 0x4d8   : > { %v1424_v39 = vrot.slane %v4082_v33, 1  ;;  %v1426_v40 = vrot.slane %v4085_v34, 1  ;;  %v1468_v42 = vrot.slane %v4082_v33, 3  ;;  %v1470_v43 = vrot.slane %v4085_v34, 3 }
 0x4d9   : > { %v1446_v45 = vrot.slane %v4082_v33, 2  ;;  %v1448_v49 = vrot.slane %v4085_v34, 2  ;;  %v1430_v62 = vrot.slane %v1419_v57, 1  ;;  %v1450_v63 = vrot.slane %v4108_v50, 2  ;;  %1619 = vmatpush1.bf16.msra.mxu0 %v2758_v60 }
 0x4da   : > { %v1425_v47 = vsel %vm1422_vm14, %v1423_v38, %v1424_v39  ;;  %v1427_v48 = vsel %vm1422_vm14, %v1424_v39, %v1426_v40  ;;  %v1469_v52 = vsel %vm1466_vm15, %v1467_v41, %v1468_v42  ;;  %v1471_v53 = vsel %vm1466_vm15, %v1468_v42, %v1470_v43  ;;  %1620 = vmatprep.subr.bf16.mxu0 %v3347_v37  ;;  %v2763_v38 = vld [vmem:[%s3996_s7 + $0x38] sm:$0xff]   ;;  %v2764_v39 = vld [vmem:[%s3996_s7 + $0x40] sm:$0xff]  }
 0x4db   : > { %v2724_v51 = vpack.i.bf16 %v1427_v48, %v1425_v47  ;;  %v1447_v54 = vsel %vm1444_vm0, %v1445_v44, %v1446_v45  ;;  %v2734_v55 = vpack.i.bf16 %v1471_v53, %v1469_v52  ;;  %v1449_v56 = vsel %vm1444_vm0, %v1446_v45, %v1448_v49 }
 0x4dc   : > { %v2729_v61 = vpack.i.bf16 %v1449_v56, %v1447_v54  ;;  %v1452_v4 = vrot.slane %v1419_v57, 2  ;;  %v1429_v5 = vsel %vm1422_vm14, %v1426_v40, %v1428_v59  ;;  %v1472_v6 = vrot.slane %v4108_v50, 3  ;;  %v2765_v40 = vld [vmem:[%s3996_s7 + $0x48] sm:$0xff]  }
 0x4dd   : > { %2725 = vrot.lane.b32.xlu0 %v2724_v51, %s3348_s29  ;;  %2735 = vrot.lane.b32.xlu1 %v2734_v55, %s3349_s25  ;;  %v1474_v7 = vrot.slane %v1419_v57, 3  ;;  %v1431_v8 = vsel %vm1422_vm14, %v1428_v59, %v1430_v62  ;;  %v1451_v58 = vsel %vm1444_vm0, %v1448_v49, %v1450_v63  ;;  %v1489_v16 = vrot.slane %v4088_v35, 4 }
 0x4de   : > { %v1453_v9 = vsel %vm1444_vm0, %v1450_v63, %v1452_v4  ;;  %v2739_v10 = vpack.i.bf16 %v1431_v8, %v1429_v5  ;;  %v1473_v11 = vsel %vm1466_vm15, %v1470_v43, %v1472_v6  ;;  %v1490_v17 = vrot.slane %v4082_v33, 4  ;;  %1621 = vmatpush1.bf16.msra.mxu0 %v2759_v13 }
 0x4df   : > { %v1475_v12 = vsel %vm1466_vm15, %v1472_v6, %v1474_v7  ;;  %v2744_v14 = vpack.i.bf16 %v1453_v9, %v1451_v58  ;;  %v1492_v18 = vrot.slane %v4085_v34, 4  ;;  %v1494_v20 = vrot.slane %v4108_v50, 4  ;;  %1622 = vmatprep.subr.bf16.mxu0 %v3347_v37  ;;  %v2356_v9 = vld [vmem:[%s677_s8] ss:$0 sm:$0xff] }
 0x4e0   : > { %v2749_v15 = vpack.i.bf16 %v1475_v12, %v1473_v11  ;;  %v1496_v21 = vrot.slane %v1419_v57, 4  ;;  %v1491_v22 = vsel %vm1488_vm1, %v1489_v16, %v1490_v17 }
 0x4e1   : > { %2730 = vrot.lane.b32.xlu0 %v2729_v61, %s3350_s22  ;;  %2740 = vrot.lane.b32.xlu1 %v2739_v10, %s3348_s29  ;;  %v1493_v23 = vsel %vm1488_vm1, %v1490_v17, %v1492_v18  ;;  %v1495_v28 = vsel %vm1488_vm1, %v1492_v18, %v1494_v20 }
 0x4e2   : > { %v1518_v24 = vpack.c.bf16 %v1493_v23, %v1491_v22  ;;  %v1497_v29 = vsel %vm1488_vm1, %v1494_v20, %v1496_v21  ;;  %1623 = vmatpush1.bf16.msra.mxu0 %v2760_v19 }
 0x4e3   : > { %v1520_v30 = vpack.c.bf16 %v1497_v29, %v1495_v28  ;;  %1624 = vmatprep.subr.bf16.mxu0 %v3347_v37 }
 0x4e4   : > { %2367 = vmatprep.mubr.msk.bf16.mxu0 %vm1502_vm2, %v1518_v24 }
 0x4e5   : > { %2745 = vrot.lane.b32.xlu0 %v2744_v14, %s3350_s22  ;;  %2750 = vrot.lane.b32.xlu1 %v2749_v15, %s3349_s25 }
 0x4e6   : > { %1625 = vmatpush1.bf16.msra.mxu0 %v2761_v32 }
 0x4e7   : > { %1626 = vmatprep.subr.bf16.mxu0 %v3347_v37 }
 0x4ea   : > { %1627 = vmatpush1.bf16.msra.mxu0 %v2762_v36 }
 0x4eb   : > { %1628 = vmatprep.subr.bf16.mxu0 %v3347_v37 }
 0x4ee   : > { %1629 = vmatpush1.bf16.msra.mxu0 %v2763_v38  ;;  %v2766_v38 = vld [vmem:[%s4004_s30] sm:$0xff]  }
 0x4ef   : > { %1630 = vmatprep.subr.bf16.mxu0 %v3347_v37  ;;  %2440 = vmatprep.subr.bf16.mxu1 %v2766_v38 }
 0x4f0   : > { %2441 = vmatpush3.bf16.msra.mxu1 %v2766_v38 }
 0x4f2   : > { %1631 = vmatpush1.bf16.msra.mxu0 %v2764_v39 }
 0x4f3   : > { %1632 = vmatprep.subr.bf16.mxu0 %v3347_v37 }
 0x4f6   : > { %1633 = vmatpush1.bf16.msra.mxu0 %v2765_v40 }
 0x54f   : > { %v2726_v41 = vpop.permute.xlu0 %2725  ;;  %v2736_v42 = vpop.permute.xlu1 %2735 }
 0x550   : > { %v2728_v43 = vunpack.i.h.bf16 %v2726_v41  ;;  %v2727_v44 = vunpack.i.l.bf16 %v2726_v41  ;;  %v2738_v45 = vunpack.i.h.bf16 %v2736_v42  ;;  %v2737_v46 = vunpack.i.l.bf16 %v2736_v42  ;;  %v2767_v42 = vld [vmem:[%s4004_s30 + $0x8] sm:$0xff]  }
 0x551   : > { %2442 = vmatprep.subr.bf16.mxu1 %v2767_v42 }
 0x552   : > { %v1504_v52 = vsel %vm1502_vm2, %v4082_v33, %v2728_v43  ;;  %v1503_v53 = vsel %vm1502_vm2, %v4088_v35, %v2727_v44  ;;  %2443 = vmatpush3.bf16.msra.mxu1 %v2767_v42 }
 0x553   : > { %v2731_v47 = vpop.permute.xlu0 %2730  ;;  %v2741_v51 = vpop.permute.xlu1 %2740 }
 0x554   : > { %v2733_v48 = vunpack.i.h.bf16 %v2731_v47  ;;  %v2732_v49 = vunpack.i.l.bf16 %v2731_v47  ;;  %v2743_v37 = vunpack.i.h.bf16 %v2741_v51  ;;  %v2742_v54 = vunpack.i.l.bf16 %v2741_v51 }
 0x556   : > { %v1508_v55 = vsel %vm1507_vm3, %v1503_v53, %v2732_v49  ;;  %v1509_v56 = vsel %vm1507_vm3, %v1504_v52, %v2733_v48  ;;  %v1506_v57 = vsel %vm1502_vm2, %v4108_v50, %v2743_v37  ;;  %v1505_v59 = vsel %vm1502_vm2, %v4085_v34, %v2742_v54 }
 0x557   : > { %v2746_v60 = vpop.permute.xlu0 %2745  ;;  %v1513_v61 = vsel %vm1512_vm4, %v1508_v55, %v2737_v46  ;;  %v1514_v33 = vsel %vm1512_vm4, %v1509_v56, %v2738_v45  ;;  %v2751_v63 = vpop.permute.xlu1 %2750 }
 0x558   : > { %v2748_v62 = vunpack.i.h.bf16 %v2746_v60  ;;  %v2747_v35 = vunpack.i.l.bf16 %v2746_v60  ;;  %v1517_v4 = vpack.c.bf16 %v1514_v33, %v1513_v61  ;;  %v2753_v5 = vunpack.i.h.bf16 %v2751_v63  ;;  %v2373_v60 = vld [vmem:[%s694_s3] ss:$0 sm:$0xff] }
 0x559   : > { %v2752_v6 = vunpack.i.l.bf16 %v2751_v63 }
 0x55a   : > { %v1511_v7 = vsel %vm1507_vm3, %v1506_v57, %v2748_v62  ;;  %v1510_v8 = vsel %vm1507_vm3, %v1505_v59, %v2747_v35  ;;  %1647 = vmatmul.mubr.bf16.vlgmr.msra.gmra.mrb[0].mxu0 %v1517_v4 }
 0x55b   : > { %2368 = vmatprep.mubr.msk.bf16.mxu0 %vm1502_vm2, %v1520_v30  ;;  %v1515_v34 = vsel %vm1512_vm4, %v1510_v8, %v2752_v6  ;;  %v1516_v50 = vsel %vm1512_vm4, %v1511_v7, %v2753_v5 }
 0x55c   : > { %v1519_v58 = vpack.c.bf16 %v1516_v50, %v1515_v34 }
 0x562   : > { %1655 = vmatmul.mubr.bf16.gmra.mrb[4].mxu0 %v1519_v58 }
 0x62d   : > { %v1648_v10 = vpop.f32.mrb[0].mxu0 }
 0x62e   : > { %v1649_v11 = vadd.f32 %v2356_v9, %v1648_v10  ;;  %v1650_v12 = vpop.f32.mrb[1].mxu0 }
 0x62f   : > { %v1651_v13 = vpop.f32.mrb[2].mxu0 }
 0x630   : > { %v2369_v14 = vmul.f32 -1.442695, %v1649_v11  ;;  %v1652_v15 = vadd.f32 %v2356_v9, %v1651_v13  ;;  %v1653_v16 = vpop.f32.mrb[3].mxu0  ;;  %v1824_v13 = vld [vmem:[#allocation3 + $0x8] sm:$0xff] }
 0x631   : > { %v1825_v16 = vld [vmem:[#allocation3 + $0x10] sm:$0xff] }
 0x632   : > { %2768 = vpow2.f32 %v2369_v14  ;;  %v2370_v17 = vmul.f32 -1.442695, %v1652_v15 }
 0x634   : > { %2770 = vpow2.f32 %v2370_v17 }
 0x635   : > { %v1656_v18 = vpop.f32.mrb[4].mxu0 }
 0x636   : > { %v1657_v19 = vadd.f32 %v2356_v9, %v1656_v18  ;;  %v1658_v20 = vpop.f32.mrb[5].mxu0 }
 0x637   : > { %v1659_v21 = vpop.f32.mrb[6].mxu0 }
 0x638   : > { %v2371_v22 = vmul.f32 -1.442695, %v1657_v19  ;;  %v1660_v23 = vadd.f32 %v2356_v9, %v1659_v21  ;;  %v1661_v24 = vpop.f32.mrb[7].mxu0 }
 0x639   : > { %v2793_v24 = vld [vmem:[#allocation22 + $0x8] sm:$0xff] (!%p2378_p6)  }
 0x63a   : > { %2772 = vpow2.f32 %v2371_v22  ;;  %v2372_v28 = vmul.f32 -1.442695, %v1660_v23 }
 0x63c   : > { %v2769_v29 = vpop.eup %2768  ;;  %2774 = vpow2.f32 %v2372_v28 }
 0x63d   : > { %v1679_v30 = vadd.f32 1.0, %v2769_v29 }
 0x63e   : > { %v2771_v32 = vpop.eup %2770 }
 0x63f   : > { %2776 = vrcp.f32 %v1679_v30  ;;  %v1680_v36 = vadd.f32 1.0, %v2771_v32 }
 0x641   : > { %2778 = vrcp.f32 %v1680_v36 }
 0x644   : > { %v2773_v39 = vpop.eup %2772 }
 0x645   : > { %v1681_v40 = vadd.f32 1.0, %v2773_v39 }
 0x646   : > { %v2775_v41 = vpop.eup %2774 }
 0x647   : > { %2780 = vrcp.f32 %v1681_v40  ;;  %v1682_v43 = vadd.f32 1.0, %v2775_v41 }
 0x649   : > { %v2777_v44 = vpop.eup %2776  ;;  %2782 = vrcp.f32 %v1682_v43  ;;  %v2379_v43 = vld [vmem:[#allocation24] ss:$0 sm:$0xff] (!%p2378_p6) }
 0x64a   : > { %1695 = vrot.lane.b32.xlu0 %v2777_v44, %s3349_s25  ;;  %2784 = vtanh.f32 %v1649_v11 }
 0x64b   : > { %v2779_v45 = vpop.eup %2778  ;;  %2786 = vtanh.f32 %v1652_v15 }
 0x64c   : > { %1697 = vrot.lane.b32.xlu1 %v2779_v45, %s3349_s25  ;;  %2788 = vtanh.f32 %v1657_v19  ;;  %v1826_v19 = vld [vmem:[#allocation3 + $0x18] sm:$0xff] }
 0x64d   : > { %2790 = vtanh.f32 %v1660_v23  ;;  %v2792_v23 = vld [vmem:[#allocation22] sm:$0xff] (!%p2378_p6)  }
 0x64e   : > { %2448 = vmatprep.subr.bf16.mxu0 (!%p2378_p6), %v2792_v23 }
 0x64f   : > { %2449 = vmatpush3.bf16.msra.mxu0 (!%p2378_p6), %v2792_v23 }
 0x650   : > { %2450 = vmatprep.subr.bf16.mxu0 (!%p2378_p6), %v2793_v24 }
 0x651   : > { %v2781_v46 = vpop.eup %2780 }
 0x652   : > { %1699 = vrot.lane.b32.xlu0 %v2781_v46, %s3349_s25 }
 0x653   : > { %v2783_v47 = vpop.eup %2782  ;;  %2451 = vmatpush3.bf16.msra.mxu0 (!%p2378_p6), %v2793_v24 }
 0x654   : > { %1701 = vrot.lane.b32.xlu1 %v2783_v47, %s3349_s25  ;;  %v2785_v49 = vpop.eup %2784 }
 0x655   : > { %v2787_v51 = vpop.eup %2786 }
 0x656   : > { %1797 = vperm.xlu0 %2754, %v4015_v0  }
 0x658   : > { %1802 = vperm.xlu1 %2755, %v4017_v1   ;;  %v2789_v1 = vpop.eup %2788 }
 0x659   : > { %v2791_v55 = vpop.eup %2790 }
 0x65a   : > { %1812 = vperm.xlu0 %2754, %v4021_v3  }
 0x65c   : > { %1807 = vperm.xlu1 %2755, %v4019_v2  }
 0x6bc   : > { %v1696_v48 = vpop.permute.xlu0 %1695 }
 0x6bd   : > { %v1707_v53 = vmul.f32 %v2785_v49, %v1696_v48 }
 0x6be   : > { %v1698_v52 = vpop.permute.xlu1 %1697 }
 0x6bf   : > { %v1708_v37 = vmul.f32 %v2787_v51, %v1698_v52 }
 0x6c1   : > { %v1711_v54 = vpack.c.bf16 %v1708_v37, %v1707_v53 }
 0x6c3   : > { %2444 = vmatprep.mubr.msk.bf16.mxu1 %vm1502_vm2, %v1711_v54 }
 0x6c4   : > { %v1700_v0 = vpop.permute.xlu0 %1699 }
 0x6c5   : > { %v1709_v56 = vmul.f32 %v2789_v1, %v1700_v0 }
 0x6c6   : > { %v1702_v3 = vpop.permute.xlu1 %1701 }
 0x6c7   : > { %v1710_v2 = vmul.f32 %v2791_v55, %v1702_v3 }
 0x6c9   : > { %v1712_v57 = vpack.c.bf16 %v1710_v2, %v1709_v56 }
 0x6cb   : > { %2445 = vmatmul.mubr.msk.bf16.vlgmr.msra.gmra.mrb[0].mxu1 %vm1502_vm2, %v1712_v57 }
 0x6d5   : > { %v4182_v61 = vpop.permute.xlu0 %1797 }
 0x6d7   : > { %v4178_v59 = vpop.permute.xlu1 %1802 }
 0x6d9   : > { %v4189_v58 = vpop.permute.xlu0 %1812 }
 0x6db   : > { %v4184_v5 = vpop.permute.xlu1 %1807 }
 0x79e   : > { %v2446_v33 = vpop.f32.mrb[0].mxu1 }
 0x79f   : > { %v1785_v62 = vadd.f32 %v2446_v33, %v2373_v60  ;;  %v1776_v35 = vpop.f32.mrb[1].mxu1 }
 0x7a0   : > { %v1777_v63 = vadd.f32 %v2373_v60, %v1776_v35  ;;  %v2447_v4 = vpop.f32.mrb[2].mxu1  ;;  %v1947_v35 = vld [vmem:[%s3982_s18] sm:$0xff] (!%p2378_p6) }
 0x7a1   : > { %v1788_v6 = vadd.f32 %v2447_v4, %v2373_v60  ;;  %v1779_v7 = vpop.f32.mrb[3].mxu1  ;;  %v1793_v8 = vadd.f32 %v1785_v62, %v4073_v27 }
 0x7a2   : > { %v1791_v34 = vadd.f32 %v1777_v63, %v4069_v25  ;;  %v1780_v50 = vadd.f32 %v2373_v60, %v1779_v7  ;;  %1831 = vrot.lane.b32.xlu1 %v1777_v63, %s3349_s25 }
 0x7a3   : > { %v1817_v9 = vmul.f32 %v4184_v5, %v1793_v8  ;;  %v1794_v10 = vadd.f32 %v1788_v6, %v4078_v31  ;;  %v1823_v31 = vld [vmem:[#allocation3] sm:$0xff]  ;;  %v1950_v8 = vld [vmem:[%s3982_s18 + $0x18] sm:$0xff] (!%p2378_p6) }
 0x7a4   : > { %v1815_v11 = vmul.f32 %v4182_v61, %v1791_v34  ;;  %v1792_v12 = vadd.f32 %v1780_v50, %v4071_v26  ;;  %1833 = vrot.lane.b32.xlu0 %v1780_v50, %s3349_s25  ;;  %v1948_v34 = vld [vmem:[%s3982_s18 + $0x8] sm:$0xff] (!%p2378_p6) }
 0x7a5   : > { %1821 = vst.msk [vmem:[#allocation2 + $0x10] sm:$0xff] %vm1502_vm2, %v1817_v9  ;;  %v1818_v27 = vmul.f32 %v4189_v58, %v1794_v10 }
 0x7a6   : > { %1819 = vst.msk [vmem:[#allocation2] sm:$0xff] %vm1502_vm2, %v1815_v11  ;;  %v1816_v25 = vmul.f32 %v4178_v59, %v1792_v12  ;;  %1835 = vrot.lane.b32.xlu1 %v1785_v62, %s3349_s25  ;;  %v1949_v62 = vld [vmem:[%s3982_s18 + $0x10] sm:$0xff] (!%p2378_p6) }
 0x7a7   : > { %1822 = vst.msk [vmem:[#allocation2 + $0x18] sm:$0xff] %vm1502_vm2, %v1818_v27 }
 0x7a8   : > { %1820 = vst.msk [vmem:[#allocation2 + $0x8] sm:$0xff] %vm1502_vm2, %v1816_v25  ;;  %1837 = vrot.lane.b32.xlu0 %v1788_v6, %s3349_s25 }
 0x814   : > { %v1832_v26 = vpop.permute.xlu1 %1831 }
 0x815   : > { %v1843_v14 = vadd.f32 %v1832_v26, %v1823_v31 }
 0x816   : > { %v1834_v15 = vpop.permute.xlu0 %1833 }
 0x817   : > { %1847 = vst.msk [vmem:[#allocation3] sm:$0xff] %vm1502_vm2, %v1843_v14  ;;  %v1844_v17 = vadd.f32 %v1834_v15, %v1824_v13  ;;  %1854 = sbr.rel (%p2378_p6) target bundleno = 2566 (0xa06), region = 132 }
 0x818   : > { %v1836_v18 = vpop.permute.xlu1 %1835 }
 0x819   : > { %1848 = vst.msk [vmem:[#allocation3 + $0x8] sm:$0xff] %vm1502_vm2, %v1844_v17  ;;  %v1845_v20 = vadd.f32 %v1836_v18, %v1825_v16 }
 0x81a   : > { %v1838_v21 = vpop.permute.xlu0 %1837 }
 0x81b   : > { %1849 = vst.msk [vmem:[#allocation3 + $0x10] sm:$0xff] %vm1502_vm2, %v1845_v20  ;;  %v1846_v22 = vadd.f32 %v1838_v21, %v1826_v19 }
 0x81d   : > { %1850 = vst.msk [vmem:[#allocation3 + $0x18] sm:$0xff] %vm1502_vm2, %v1846_v22 }
 0x81e   : > { %v1855_v28 = vld [vmem:[#allocation3] sm:$0xff] }
 0x81f   : > { %v1859_v32 = vmul.f32 %v1855_v28, %v4182_v61 }
 0x820   : > { %v1856_v29 = vld [vmem:[#allocation3 + $0x8] sm:$0xff] }
 0x821   : > { %v1860_v36 = vmul.f32 %v1856_v29, %v4178_v59 }
 0x822   : > { %v1857_v30 = vld [vmem:[#allocation3 + $0x10] sm:$0xff] }
 0x823   : > { %v1861_v39 = vmul.f32 %v1857_v30, %v4184_v5  ;;  %v1863_v41 = vpack.c.bf16 %v1860_v36, %v1859_v32 }
 0x824   : > { %v1858_v38 = vld [vmem:[#allocation3 + $0x18] sm:$0xff] }
 0x825   : > { %v1862_v40 = vmul.f32 %v1858_v38, %v4189_v58  ;;  %2452 = vmatprep.mubr.msk.bf16.mxu0 %vm1502_vm2, %v1863_v41 }
 0x827   : > { %v1864_v42 = vpack.c.bf16 %v1862_v40, %v1861_v39 }
 0x829   : > { %2453 = vmatmul.mubr.msk.bf16.vlgmr.msra.gmra.mrb[0].mxu0 %vm1502_vm2, %v1864_v42 }
 0x8fc   : > { %v2454_v44 = vpop.f32.mrb[0].mxu0 }
 0x8fd   : > { %v1937_v45 = vadd.f32 %v2454_v44, %v2379_v43  ;;  %v1928_v46 = vpop.f32.mrb[1].mxu0 }
 0x8fe   : > { %v1929_v47 = vadd.f32 %v2379_v43, %v1928_v46  ;;  %v2455_v48 = vpop.f32.mrb[2].mxu0 }
 0x8ff   : > { %v1945_v49 = vmul.f32 %v1937_v45, %v4184_v5  ;;  %v1940_v51 = vadd.f32 %v2455_v48, %v2379_v43  ;;  %v1931_v52 = vpop.f32.mrb[3].mxu0 }
 0x900   : > { %v1943_v53 = vmul.f32 %v1929_v47, %v4182_v61  ;;  %v1932_v37 = vadd.f32 %v2379_v43, %v1931_v52 }
 0x901   : > { %v1955_v54 = vmul.f32 1.442695, %v1945_v49  ;;  %v1946_v0 = vmul.f32 %v1940_v51, %v4189_v58 }
 0x902   : > { %v1951_v1 = vmul.f32 1.442695, %v1943_v53  ;;  %v1944_v55 = vmul.f32 %v1932_v37, %v4178_v59 }
 0x903   : > { %2794 = vpow2.f32 %v1955_v54  ;;  %v1957_v3 = vmul.f32 1.442695, %v1946_v0 }
 0x904   : > { %2796 = vpow2.f32 %v1951_v1  ;;  %v1953_v56 = vmul.f32 1.442695, %v1944_v55 }
 0x905   : > { %2798 = vpow2.f32 %v1957_v3 }
 0x906   : > { %2800 = vpow2.f32 %v1953_v56 }
 0x90d   : > { %v2795_v2 = vpop.eup %2794 }
 0x90e   : > { %v2797_v57 = vpop.eup %2796  ;;  %1967 = vrot.lane.b32.xlu1 %v2795_v2, %s3351_s26 }
 0x90f   : > { %1963 = vrot.lane.b32.xlu0 %v2797_v57, %s3351_s26  ;;  %v2799_v60 = vpop.eup %2798 }
 0x910   : > { %v2801_v33 = vpop.eup %2800 }
 0x912   : > { %1969 = vrot.lane.b32.xlu1 %v2799_v60, %s3351_s26 }
 0x913   : > { %1965 = vrot.lane.b32.xlu0 %v2801_v33, %s3351_s26 }
 0x980   : > { %v1968_v63 = vpop.permute.xlu1 %1967 }
 0x981   : > { %v1964_v4 = vpop.permute.xlu0 %1963  ;;  %v1977_v6 = vmul.f32 %v1968_v63, %v1949_v62 }
 0x982   : > { %v1975_v7 = vmul.f32 %v1964_v4, %v1947_v35 }
 0x983   : > { %v1981_v11 = vadd.f32 %v1977_v6, %v1945_v49 }
 0x984   : > { %v1979_v50 = vadd.f32 %v1975_v7, %v1943_v53  ;;  %v1970_v9 = vpop.permute.xlu1 %1969 }
 0x985   : > { %v1966_v10 = vpop.permute.xlu0 %1965  ;;  %v1978_v27 = vmul.f32 %v1970_v9, %v1950_v8  ;;  %v1985_v26 = vmul.f32 %v1981_v11, %v4184_v5 }
 0x986   : > { %v1983_v12 = vmul.f32 %v1979_v50, %v4182_v61  ;;  %v1976_v25 = vmul.f32 %v1966_v10, %v1948_v34 }
 0x987   : > { %v1982_v13 = vadd.f32 %v1978_v27, %v1946_v0 }
 0x988   : > { %v1980_v31 = vadd.f32 %v1976_v25, %v1944_v55  ;;  %1991 = vrot.lane.b32.xlu0 %v1983_v12, %s3352_s2 }
 0x989   : > { %v1986_v15 = vmul.f32 %v1982_v13, %v4189_v58 }
 0x98a   : > { %v1984_v14 = vmul.f32 %v1980_v31, %v4178_v59 }
 0x98c   : > { %1995 = vrot.lane.b32.xlu0 %v1985_v26, %s3352_s2  ;;  %1993 = vrot.lane.b32.xlu1 %v1984_v14, %s3352_s2 }
 0x990   : > { %1997 = vrot.lane.b32.xlu1 %v1986_v15, %s3352_s2 }
 0x9fa   : > { %v1992_v61 = vpop.permute.xlu0 %1991 }
 0x9fb   : > { %v2003_v16 = vsel %vm1507_vm3, %v1943_v53, %v1992_v61 }
 0x9fc   : > { %v2007_v17 = vsel %vm1512_vm4, %v2003_v16, 0.0 }
 0x9fd   : > { %2011 = vst [vmem:[%s4023_s14] sm:$0xff] %v2007_v17 }
 0x9fe   : > { %v1994_v18 = vpop.permute.xlu1 %1993  ;;  %v1996_v19 = vpop.permute.xlu0 %1995 }
 0x9ff   : > { %v2004_v5 = vsel %vm1507_vm3, %v1944_v55, %v1994_v18  ;;  %v2005_v20 = vsel %vm1507_vm3, %v1945_v49, %v1996_v19 }
 0xa00   : > { %v2008_v59 = vsel %vm1512_vm4, %v2004_v5, 0.0  ;;  %v2009_v21 = vsel %vm1512_vm4, %v2005_v20, 0.0 }
 0xa01   : > { %2012 = vst [vmem:[%s4023_s14 + $0x8] sm:$0xff] %v2008_v59  ;;  %2013 = vst [vmem:[%s4023_s14 + $0x10] sm:$0xff] %v2009_v21 }
 0xa02   : > { %v1998_v58 = vpop.permute.xlu1 %1997 }
 0xa03   : > { %v2006_v22 = vsel %vm1507_vm3, %v1946_v0, %v1998_v58 }
 0xa04   : > { %v2010_v23 = vsel %vm1512_vm4, %v2006_v22, 0.0 }
 0xa05   : > { %2014 = vst [vmem:[%s4023_s14 + $0x18] sm:$0xff] %v2010_v23 }
 0xa06 PF: > { %s4495_s20 = sld [smem:[#allocation40_spill]]  ;;  %s4496_s18 = sld [smem:[#allocation45_spill]] }
 0xa07   : > { %s4497_s27 = sld [smem:[#allocation68_spill]]  ;;  %s2029_s1 = sshll.u32 %s4023_s14, 4  ;;  %s4246_s1 = int_to_ptr.vmem [resolvable:$true] %s2029_s1 }
 0xa08   : > { %s2016_s8 = scalar_lea.sflag [#allocation6], %s3966_s15  ;;  %s3180_s6 = scalar_lea.vmem %s4246_s1, 512 }
 0xa09   : > { %p3181_p9 = scmp.ne.s32.totalorder %s4246_s1, %s3180_s6  ;;  %s3353_s30 = smov [#allocation25]  }
 0xa0a   : > { %s3184_s3 = sshll.u32 %s3353_s30, 4  ;;  %s3185_s3 = int_to_ptr.vmem [resolvable:$false] %s3184_s3 }
 0xa0b   : > { %s3186_s0 = scalar_lea.vmem %s3185_s3, 1024  ;;  %p3187_p3 = scmp.lt.s32.totalorder %s4246_s1, %s3185_s3 }
 0xa0c   : > { %s2392_s9 = sshll.u32 %s4495_s20, 9  ;;  %p4499_p7 = scmp.ne.s32.totalorder %s4496_s18, 0 }
 0xa0d   : > { %s4498_s12 = smov %s4497_s27  ;;  %s4243_s7 = scalar_lea.hbm %s4497_s27, %s2392_s9 }
 0xa0e   : > { %p3182_p10 = pnand %p3181_p9, %p4499_p7  ;;  %p3188_p12 = scmp.lt.s32.totalorder %s3186_s0, %s3180_s6 }
 0xa10   : > { %p3183_p11 = pneg %p3182_p10  ;;  %p3189_p8 = por %p3188_p12, %p3187_p3 }
 0xa12   : > { %p3190_p5 = pnand %p3189_p8, %p3183_p11 }
 0xa14   : > { %3193 = shalt.err (!%p3190_p5)
}
 0xa15   : > { %s3194_s14 = scalar_lea.hbm %s4243_s7, 512  ;;  %s3198_s22 = scalar_lea.hbm %s4498_s12, 1024 }
 0xa16   : > { %p3195_p13 = scmp.ne.s32.totalorder %s4243_s7, %s3194_s14  ;;  %p3199_p4 = scmp.lt.u32.totalorder %s4243_s7, %s4498_s12 }
 0xa17   : > { %p3200_p2 = scmp.lt.u32.totalorder %s3198_s22, %s3194_s14  ;;  %p3202_p9 = scmp.lt.u32.totalorder %s3194_s14, %s4243_s7 }
 0xa18   : > { %p3196_p0 = pnand %p3195_p13, %p4499_p7 }
 0xa19   : > { %p3201_p6 = por %p3200_p2, %p3199_p4 }
 0xa1a   : > { %p3197_p1 = pneg %p3196_p0 }
 0xa1b   : > { %p3203_p10 = por %p3202_p9, %p3201_p6 }
 0xa1d   : > { %p3204_p11 = pnand %p3203_p10, %p3197_p1 }
 0xa1f   : > { %3207 = shalt.err (!%p3204_p11)
}
 0xa20   : > { %s3354_s2 = smov 128   ;;  %s3355_s20 = smov 8  }
 0xa21   : > { %2524 = dma.vmem_to_hbm [thread:$0]  (%p4499_p7), %s4246_s1, 512, %s4243_s7, %s2016_s8, %s3354_s2, %s3354_s2, %s3355_s20  }
 0xa22 PF: > { %s4500_s9 = sld [smem:[#allocation41_spill]]  ;;  %s4501_s28 = sld [smem:[#allocation36_spill]] }
 0xa23   : > { %s4502_s23 = sld [smem:[#allocation46_spill]] }
 0xa28   : > { %p2584_p3 = scmp.ge.s32.totalorder %s4500_s9, 2  ;;  %s2044_s27 = sand.u32 1, %s4501_s28  }
 0xa29   : > { %p4503_p12 = scmp.ne.s32.totalorder %s4502_s23, 0  ;;  %s2045_s6 = scalar_lea.sflag [#allocation6], %s2044_s27 }
 0xa2b   : > { %p2568_p8 = pnand %p2584_p3, %p4503_p12 }
 0xa2d   : > { %3281 = dma.done.wait (!%p2568_p8), %s2045_s6, 512  }
 0xa2e   : > { %3283 = vsyncadd (!%p2568_p8), %s2045_s6, 4294966784  ;;  %s41_s18 = sadd.s32 1, %s4500_s9   ;;  %s4504_s25 = sld [smem:[#allocation34_spill]] }
 0xa2f   : > { %p38_p5 = scmp.ge.s32.totalorder %s41_s18, 34   ;;  %s4505_s26 = sld [smem:[#allocation35_spill]] }
 0xa30   : > { %s4506_s27 = sld [smem:[#allocation51_spill]]  ;;  %s4507_s28 = sld [smem:[#allocation37_spill]] }
 0xa31   : > { %s4508_s29 = sld [smem:[#allocation38_spill]]  ;;  %s4509_s30 = sld [smem:[#allocation53_spill]] }
 0xa32   : > { %s4510_s7 = sld [smem:[#allocation48_spill]]  ;;  %s4511_s1 = sld [smem:[#allocation50_spill]] }
 0xa33   : > { %s4512_s14 = smov %s3318_s16  ;;  %s4513_s15 = smov %s3322_s17 }
 0xa34   :  { %40 = sbr.rel (!%p38_p5) target bundleno = 33 (0x21), region = 221 }
 0xa38   : > { %s4514_s16 = smov %s4510_s7  ;;  %s4515_s17 = smov %s4511_s1 }
 0xa3b   :  { %2050 = vsyncpa [#allocation5], 1 }
 0xa3c   :  { %2052 = vsyncpa [#allocation5 + $0x1], 1 }
 0xa3d   :  { %2053 = vsyncpa [#allocation8], 1 }
 0xa3e   :  { %2055 = vsyncpa [#allocation8 + $0x1], 1 }
 0xa3f   :  { %2056 = vsyncpa [#allocation11], 1 }
 0xa40   :  { %2057 = vsyncpa [#allocation14], 1 }
 0xa41   :  { %2058 = vsyncpa [#allocation17], 1 }
 0xa42   :  { %2060 = vsyncpa [#allocation17 + $0x1], 1 }
 0xa43   :  { %2061 = vsyncpa [#allocation20], 1 }
 0xa44   :  { %2063 = vsyncpa [#allocation20 + $0x1], 1 }
 0xa45   :  { %2064 = vsyncpa [#allocation23], 1 }
 0xa46   :  { %2065 = vsyncpa [#allocation6], 1 }
 0xa47   :  { %2067 = vsyncpa [#allocation6 + $0x1], 1 }

</bundles_post_ra>
